<compile_context>
chip_gen: v6e
topology: v6e:2x2x1
jax: 0.10.0
libtpu: 0.0.40
codegen_flags: <defaults>
</compile_context>

<pallas_src>
import math

import jax
import jax.numpy as jnp
from jax import lax
from jax.experimental import pallas as pl
from jax.experimental.pallas import tpu as pltpu

NEG_SLOPE = 0.01  # PyTorch LeakyReLU default
_HI = jax.lax.Precision.HIGHEST


def _leaky(x):
    return jnp.where(x >= 0, x, NEG_SLOPE * x)


def _round_up(x, m):
    return (x + m - 1) // m * m


# ------------------------------ fused kernel ---------------------------------


def _make_kernel(A, S, C, K, hops, rows, lane):
    """One grid step == one block of rows = P_blk * A agent rows."""
    inv_sqrt_c = 1.0 / math.sqrt(C)          # spec scales by sqrt(comm_size)
    attn_off = S + C + 1
    pad = lane - (attn_off + hops * rows)
    assert pad >= 0

    def kernel(obs_ref, cin_ref, st_ref, msk_ref, pm_ref,
               w1o_ref, w1c_ref, b1_ref,
               wgru_ref, bgru_ref,
               wqkv_ref, bqkv_ref,
               wm2nc_ref, wm2ns_ref, bm2n_ref,
               wc1_ref, bc1_ref, wc2_ref, bc2_ref,
               out_ref):
        f32 = jnp.float32
        obs = obs_ref[...]                       # (rows, OBS)
        cin = cin_ref[...]                       # (rows, C)
        h_prev = st_ref[...] * msk_ref[...]      # (rows, S)   states * masks
        pm = pm_ref[...]                         # (rows, rows) 1.0 iff same process
        same = pm > 0.5

        # ---- common MLP layer 1 + LeakyReLU (split weight == cat([obs, comm])) ----
        h = _leaky(jnp.dot(obs, w1o_ref[...], preferred_element_type=f32)
                   + jnp.dot(cin, w1c_ref[...], preferred_element_type=f32)
                   + b1_ref[...])

        # ---- fused (common layer2 -> GRU input proj) + GRU hidden proj: 1 matmul ----
        # g columns: [0:2S] = gi_rz + gh_rz, [2S:3S] = gi_n, [3S:4S] = gh_n
        g = jnp.dot(jnp.concatenate([h, h_prev], axis=1), wgru_ref[...],
                    preferred_element_type=f32) + bgru_ref[...]
        r = jax.nn.sigmoid(g[:, 0:S])
        z = jax.nn.sigmoid(g[:, S:2 * S])
        n = jnp.tanh(g[:, 2 * S:3 * S] + r * g[:, 3 * S:4 * S])
        x = (1.0 - z) * n + z * h_prev           # (rows, S) new hidden == actor feats

        # ---- CommAttention: hops rounds, block-diagonal masked dense scores ----
        s = x
        comm = None
        attns = []
        for i in range(hops):
            if i > 0:
                # msg2nextstate(cat([comm, s])) with the weight split in two halves
                s = _leaky(jnp.dot(comm, wm2nc_ref[...], preferred_element_type=f32)
                           + jnp.dot(s, wm2ns_ref[...], preferred_element_type=f32)
                           + bm2n_ref[...])
            qkv = jnp.dot(s, wqkv_ref[...], preferred_element_type=f32) + bqkv_ref[...]
            q = qkv[:, 0:K]
            k = qkv[:, K:2 * K]
            v = qkv[:, 2 * K:2 * K + C]
            # q @ k.T without materializing a transpose
            scores = lax.dot_general(q, k, (((1,), (1,)), ((), ())),
                                     preferred_element_type=f32) * inv_sqrt_c
            scores = jnp.where(same, scores, -1e9)           # == masked_fill(-1e9)
            scores = scores - jnp.max(scores, axis=-1, keepdims=True)
            e = jnp.exp(scores)
            attn = e / jnp.sum(e, axis=-1, keepdims=True)     # exact softmax
            comm = jnp.dot(attn, v, preferred_element_type=f32)   # (rows, C)
            attns.append(attn)

        # ---- critic: per-process mean FIRST (linearity-exact reorder), then MLP ----
        mc = jnp.dot(pm * (1.0 / A), x, preferred_element_type=f32)    # (rows, S)
        hc = jnp.dot(mc, wc1_ref[...], preferred_element_type=f32) + bc1_ref[...]
        val = jnp.dot(_leaky(hc), wc2_ref[...], preferred_element_type=f32) + bc2_ref[...]

        # ---- single lane-dense slab store: [x | comm | value | attn_0..h | pad] ----
        parts = [x, comm, val] + attns
        if pad > 0:
            parts.append(jnp.zeros((rows, pad), f32))
        out_ref[...] = jnp.concatenate(parts, axis=1)

    return kernel


# -------------------------------- wrapper -------------------------------------


def _choose_block(P, A, target_rows):
    rows_total = P * A
    if rows_total <= target_rows:
        return P, 1
    p_blk = max(1, target_rows // A)
    while (p_blk * A) % 8:                      # sublane (8) divisibility
        p_blk += 1
    nblk = -(-P // p_blk)
    return p_blk, nblk


def multi_agent_forward(kp, obs, states, communications, masks,
                        dense_p_attn=False, target_rows=128):
    """Fused MultiAgentBase.forward.  Returns (value, x, states, comm, aux)."""
    P, A, OBS = obs.shape
    S = kp["state_size"]
    C = kp["comm_size"]
    K = kp["key_size"]
    hops = kp["num_hops"]
    f32 = jnp.float32

    rows_total = P * A
    p_blk, nblk = _choose_block(P, A, target_rows)
    rows = p_blk * A
    P_pad = p_blk * nblk
    rows_pad = P_pad * A

    def flat(a, feat):
        a3 = a.reshape(P, A, feat).astype(f32)
        if P_pad > P:
            a3 = jnp.concatenate([a3, jnp.zeros((P_pad - P, A, feat), f32)], axis=0)
        return a3.reshape(rows_pad, feat)

    obs2 = flat(obs, OBS)
    cin2 = flat(communications, C)
    st2 = flat(states, S)
    msk2 = flat(masks.reshape(P, A), 1)

    # same-process (block-diagonal) mask; identical for every row block
    rid = jnp.arange(rows) // A
    pm = (rid[:, None] == rid[None, :]).astype(f32)          # (rows, rows)

    attn_off = S + C + 1
    lane = _round_up(attn_off + hops * rows, 128)

    kernel = _make_kernel(A, S, C, K, hops, rows, lane)

    def act_spec(feat):
        return pl.BlockSpec((rows, feat), lambda p: (p, 0))

    def resident(arr):
        return pl.BlockSpec(arr.shape, lambda p: (0, 0))      # fetched once, stays in VMEM

    weights = [kp[name] for name in (
        "w1_obs", "w1_comm", "b1",
        "w_gru", "b_gru",
        "w_qkv", "b_qkv",
        "m2n_wc", "m2n_ws", "m2n_b",
        "crit_w1", "crit_b1", "crit_w2", "crit_b2")]

    fused = pl.pallas_call(
        kernel,
        grid=(nblk,),
        in_specs=[act_spec(OBS), act_spec(C), act_spec(S), act_spec(1), resident(pm)]
                 + [resident(w) for w in weights],
        out_specs=pl.BlockSpec((rows, lane), lambda p: (p, 0)),
        out_shape=jax.ShapeDtypeStruct((rows_pad, lane), f32),
        compiler_params=pltpu.CompilerParams(
            dimension_semantics=("parallel",)),               # shard blocks across TCs (v7x)
    )

    packed = fused(obs2, cin2, st2, msk2, pm, *weights)

    # ---- unpack the slab (plain-JAX layout plumbing, off the hot path) ----
    x3 = packed[:rows_total, 0:S].reshape(P, A, S)
    comm_out = packed[:rows_total, S:S + C].reshape(P, A, C)
    value = packed[:rows_total, S + C:S + C + 1].reshape(P, A)[:, 0:1]

    p_attn = []
    att3 = packed.reshape(nblk, rows, lane)
    eye_blk = jnp.eye(nblk, dtype=f32)
    eye_proc = jnp.eye(p_blk, dtype=f32)
    off = attn_off
    for _ in range(hops):
        blocks = att3[:, :, off:off + rows]                   # (nblk, rows, rows)
        off += rows
        if dense_p_attn:
            # off-block entries of the reference masked softmax are exactly 0
            dense = jnp.einsum("bij,bc->bicj", blocks, eye_blk, precision=_HI)
            dense = dense.reshape(nblk * rows, nblk * rows)[:rows_total, :rows_total]
            p_attn.append(dense)
        else:
            bb = blocks.reshape(nblk, p_blk, A, p_blk, A)
            per = jnp.einsum("bqirj,qr->bqij", bb, eye_proc, precision=_HI)
            p_attn.append(per.reshape(P_pad, A, A)[:P])

    aux = {"p_attn": p_attn}
    return value, x3, x3, comm_out, aux


# ------------------------- parameters (PyTorch layout) -------------------------


def init_raw_params(key, obs_size, state_size, comm_size, key_size, num_hops):
    """Raw PyTorch-style parameters: Linear weight (out, in), bias (out,)."""
    S, C, K = state_size, comm_size, key_size

    def linear(k, in_f, out_f):
        k1, k2 = jax.random.split(k)
        bound = 1.0 / math.sqrt(in_f)
        w = jax.random.uniform(k1, (out_f, in_f), jnp.float32, -bound, bound)
        b = jax.random.uniform(k2, (out_f,), jnp.float32, -bound, bound)
        return w, b

    ks = jax.random.split(key, 10)
    common_w1, common_b1 = linear(ks[0], obs_size + C, S)
    common_w2, common_b2 = linear(ks[1], S, S)
    gru_wih, gru_bih = linear(ks[2], S, 3 * S)        # gate order r | z | n
    gru_whh, gru_bhh = linear(ks[3], S, 3 * S)
    crit_w1, crit_b1 = linear(ks[4], S, S)
    crit_w2, crit_b2 = linear(ks[5], S, 1)
    m2n_w, m2n_b = linear(ks[6], S + C, S)            # input = [comm | state]
    q_w, q_b = linear(ks[7], S, K)
    k_w, k_b = linear(ks[8], S, K)
    v_w, v_b = linear(ks[9], S, C)
    return dict(obs_size=obs_size, state_size=S, comm_size=C, key_size=K,
                num_hops=num_hops,
                common_w1=common_w1, common_b1=common_b1,
                common_w2=common_w2, common_b2=common_b2,
                gru_wih=gru_wih, gru_bih=gru_bih,
                gru_whh=gru_whh, gru_bhh=gru_bhh,
                crit_w1=crit_w1, crit_b1=crit_b1,
                crit_w2=crit_w2, crit_b2=crit_b2,
                m2n_w=m2n_w, m2n_b=m2n_b,
                q_w=q_w, q_b=q_b, k_w=k_w, k_b=k_b, v_w=v_w, v_b=v_b)


def prepare_kernel_params(raw):
    """Pre-transpose / fuse the raw weights into the kernel's layout (offline)."""
    f32 = jnp.float32
    S, C, K, OBS = raw["state_size"], raw["comm_size"], raw["key_size"], raw["obs_size"]

    w1 = raw["common_w1"]                                   # (S, OBS + C)
    w1_obs = jnp.asarray(w1[:, :OBS].T, f32)                # (OBS, S)
    w1_comm = jnp.asarray(w1[:, OBS:].T, f32)               # (C, S)
    b1 = raw["common_b1"][None, :]

    # fold common layer-2 into the GRU input projection, fuse both GRU matmuls
    w2T = raw["common_w2"].T                                # (S, S)
    b2 = raw["common_b2"][None, :]
    wihT = raw["gru_wih"].T                                 # (S, 3S)
    whhT = raw["gru_whh"].T
    bih = raw["gru_bih"][None, :]
    bhh = raw["gru_bhh"][None, :]
    wi_fold = jnp.dot(w2T, wihT, precision=_HI)             # (S, 3S)
    bi_fold = jnp.dot(b2, wihT, precision=_HI) + bih        # (1, 3S)
    zSS = jnp.zeros((S, S), f32)
    w_gru = jnp.concatenate([
        jnp.concatenate([wi_fold[:, :2 * S], wi_fold[:, 2 * S:], zSS], axis=1),  # from h
        jnp.concatenate([whhT[:, :2 * S], zSS, whhT[:, 2 * S:]], axis=1),        # from h_prev
    ], axis=0)                                              # (2S, 4S)
    b_gru = jnp.concatenate([bi_fold[:, :2 * S] + bhh[:, :2 * S],
                             bi_fold[:, 2 * S:], bhh[:, 2 * S:]], axis=1)         # (1, 4S)

    # fused QKV projection: [query | key | value] along the output axis
    w_qkv = jnp.concatenate([raw["q_w"].T, raw["k_w"].T, raw["v_w"].T], axis=1)   # (S, 2K+C)
    b_qkv = jnp.concatenate([raw["q_b"], raw["k_b"], raw["v_b"]])[None, :]

    m2n = raw["m2n_w"]                                      # (S, C + S), input [comm|state]
    m2n_wc = jnp.asarray(m2n[:, :C].T, f32)                 # (C, S)
    m2n_ws = jnp.asarray(m2n[:, C:].T, f32)                 # (S, S)
    m2n_b = raw["m2n_b"][None, :]

    return dict(state_size=S, comm_size=C, key_size=K, num_hops=raw["num_hops"],
                w1_obs=w1_obs, w1_comm=w1_comm, b1=b1,
                w_gru=w_gru, b_gru=b_gru,
                w_qkv=w_qkv, b_qkv=b_qkv,
                m2n_wc=m2n_wc, m2n_ws=m2n_ws, m2n_b=m2n_b,
                crit_w1=raw["crit_w1"].T, crit_b1=raw["crit_b1"][None, :],
                crit_w2=raw["crit_w2"].T, crit_b2=raw["crit_b2"][None, :])


# -------------------- pure-JAX reference (PyTorch semantics) -------------------


def reference_forward(raw, obs, states, communications, masks):
    P, A, _ = obs.shape
    S, C, hops = raw["state_size"], raw["comm_size"], raw["num_hops"]

    def lin(x, w, b):                     # PyTorch Linear: y = x @ W.T + b
        return jnp.dot(x, w.T, precision=_HI) + b

    inp = jnp.concatenate([obs, communications], axis=-1)
    h = _leaky(lin(inp, raw["common_w1"], raw["common_b1"]))
    x = lin(h, raw["common_w2"], raw["common_b2"])

    x2 = x.reshape(-1, S)
    hp = states.reshape(-1, S) * masks.reshape(-1, 1)
    gi = lin(x2, raw["gru_wih"], raw["gru_bih"])
    gh = lin(hp, raw["gru_whh"], raw["gru_bhh"])
    r = jax.nn.sigmoid(gi[:, :S] + gh[:, :S])
    z = jax.nn.sigmoid(gi[:, S:2 * S] + gh[:, S:2 * S])
    n = jnp.tanh(gi[:, 2 * S:] + r * gh[:, 2 * S:])
    hn = (1.0 - z) * n + z * hp
    x3 = hn.reshape(P, A, S)

    pid = jnp.arange(P * A) // A
    mask = pid[:, None] == pid[None, :]
    st = hn
    comm = None
    p_attn = []
    for i in range(hops):
        if i > 0:
            st = _leaky(lin(jnp.concatenate([comm, st], axis=1),
                            raw["m2n_w"], raw["m2n_b"]))
        q = lin(st, raw["q_w"], raw["q_b"])
        k = lin(st, raw["k_w"], raw["k_b"])
        v = lin(st, raw["v_w"], raw["v_b"])
        scores = jnp.dot(q, k.T, precision=_HI) / math.sqrt(C)
        scores = jnp.where(mask, scores, -1e9)
        attn = jax.nn.softmax(scores, axis=-1)
        comm = jnp.dot(attn, v, precision=_HI)
        p_attn.append(attn)
    comm_out = comm.reshape(P, A, C)

    hc = lin(x3, raw["crit_w1"], raw["crit_b1"])
    mc = hc.mean(axis=1)
    value = lin(_leaky(mc), raw["crit_w2"], raw["crit_b2"])
    return value, x3, x3, comm_out, p_attn


# ------------------------------------ main -------------------------------------


if __name__ == "__main__":
    OBS, S, C, K, HOPS = 24, 32, 16, 16, 3
    # loose enough for MXU pass-precision differences, tight enough for real bugs
    TOL = 2e-2

    def run_case(P, A, dense):
        key = jax.random.PRNGKey(0)
        kp_, ko, kst, kcm = jax.random.split(key, 4)
        raw = init_raw_params(kp_, OBS, S, C, K, HOPS)
        kparams = prepare_kernel_params(raw)

        obs = jax.random.normal(ko, (P, A, OBS), jnp.float32)
        states = jax.random.normal(kst, (P, A, S), jnp.float32)
        communications = jax.random.normal(kcm, (P, A, C), jnp.float32)
        masks = jnp.ones((P, A), jnp.float32)

        value, x, states_out, comm_out, aux = multi_agent_forward(
            kparams, obs, states, communications, masks, dense_p_attn=dense)
        jax.block_until_ready((value, x, states_out, comm_out, aux["p_attn"]))

        assert value.shape == (P, 1)
        assert x.shape == (P, A, S)
        assert states_out.shape == (P, A, S)
        assert comm_out.shape == (P, A, C)
        assert len(aux["p_attn"]) == HOPS

        # tolerance-asserted pure-JAX reference (exact PyTorch semantics)
        v_ref, x_ref, _, c_ref, pa_ref = reference_forward(
            raw, obs, states, communications, masks)

        def md(a, b):
            return float(jnp.max(jnp.abs(a - b)))

        assert md(value, v_ref) < TOL
        assert md(x, x_ref) < TOL
        assert md(comm_out, c_ref) < TOL
        eye_p = jnp.eye(P, dtype=jnp.float32)
        for got, ref in zip(aux["p_attn"], pa_ref):
            if dense:
                assert got.shape == (P * A, P * A)
                assert md(got, ref) < TOL
            else:
                assert got.shape == (P, A, A)
                ref_blk = jnp.einsum("piqj,pq->pij", ref.reshape(P, A, P, A),
                                     eye_p, precision=_HI)
                assert md(got, ref_blk) < TOL

    run_case(P=64, A=4, dense=True)    # two 128-row blocks -> grid=(2,), both TCs on v7x
    run_case(P=2, A=4, dense=False)    # tiny single-block path (block == full array)
    print("KERNEL_OK")
</pallas_src>

<mosaic_0001>
module attributes {stable_mosaic.version = 11 : i64} {
  func.func @kernel(%arg0: i32, %arg1: memref<128x24xf32, #tpu.memory_space<vmem>>, %arg2: memref<128x16xf32, #tpu.memory_space<vmem>>, %arg3: memref<128x32xf32, #tpu.memory_space<vmem>>, %arg4: memref<128x1xf32, #tpu.memory_space<vmem>>, %arg5: memref<128x128xf32, #tpu.memory_space<vmem>>, %arg6: memref<24x32xf32, #tpu.memory_space<vmem>>, %arg7: memref<16x32xf32, #tpu.memory_space<vmem>>, %arg8: memref<1x32xf32, #tpu.memory_space<vmem>>, %arg9: memref<64x128xf32, #tpu.memory_space<vmem>>, %arg10: memref<1x128xf32, #tpu.memory_space<vmem>>, %arg11: memref<32x48xf32, #tpu.memory_space<vmem>>, %arg12: memref<1x48xf32, #tpu.memory_space<vmem>>, %arg13: memref<16x32xf32, #tpu.memory_space<vmem>>, %arg14: memref<32x32xf32, #tpu.memory_space<vmem>>, %arg15: memref<1x32xf32, #tpu.memory_space<vmem>>, %arg16: memref<32x32xf32, #tpu.memory_space<vmem>>, %arg17: memref<1x32xf32, #tpu.memory_space<vmem>>, %arg18: memref<32x1xf32, #tpu.memory_space<vmem>>, %arg19: memref<1x1xf32, #tpu.memory_space<vmem>>, %arg20: memref<128x512xf32, #tpu.memory_space<vmem>>) attributes {dimension_semantics = [#tpu.dimension_semantics<parallel>], iteration_bounds = array<i64: 2>, scalar_prefetch = 0 : i64, scratch_operands = 0 : i64, tpu.core_type = #tpu.core_type<tc>, window_params = [{transform_indices = @transform_0, window_bounds = array<i64: 128, 24>}, {transform_indices = @transform_1, window_bounds = array<i64: 128, 16>}, {transform_indices = @transform_2, window_bounds = array<i64: 128, 32>}, {transform_indices = @transform_3, window_bounds = array<i64: 128, 1>}, {pipeline_mode = #tpu.pipeline_mode<synchronous>, transform_indices = @transform_4, window_bounds = array<i64: 128, 128>}, {pipeline_mode = #tpu.pipeline_mode<synchronous>, transform_indices = @transform_5, window_bounds = array<i64: 24, 32>}, {pipeline_mode = #tpu.pipeline_mode<synchronous>, transform_indices = @transform_6, window_bounds = array<i64: 16, 32>}, {pipeline_mode = #tpu.pipeline_mode<synchronous>, transform_indices = @transform_7, window_bounds = array<i64: 1, 32>}, {pipeline_mode = #tpu.pipeline_mode<synchronous>, transform_indices = @transform_8, window_bounds = array<i64: 64, 128>}, {pipeline_mode = #tpu.pipeline_mode<synchronous>, transform_indices = @transform_9, window_bounds = array<i64: 1, 128>}, {pipeline_mode = #tpu.pipeline_mode<synchronous>, transform_indices = @transform_10, window_bounds = array<i64: 32, 48>}, {pipeline_mode = #tpu.pipeline_mode<synchronous>, transform_indices = @transform_11, window_bounds = array<i64: 1, 48>}, {pipeline_mode = #tpu.pipeline_mode<synchronous>, transform_indices = @transform_12, window_bounds = array<i64: 16, 32>}, {pipeline_mode = #tpu.pipeline_mode<synchronous>, transform_indices = @transform_13, window_bounds = array<i64: 32, 32>}, {pipeline_mode = #tpu.pipeline_mode<synchronous>, transform_indices = @transform_14, window_bounds = array<i64: 1, 32>}, {pipeline_mode = #tpu.pipeline_mode<synchronous>, transform_indices = @transform_15, window_bounds = array<i64: 32, 32>}, {pipeline_mode = #tpu.pipeline_mode<synchronous>, transform_indices = @transform_16, window_bounds = array<i64: 1, 32>}, {pipeline_mode = #tpu.pipeline_mode<synchronous>, transform_indices = @transform_17, window_bounds = array<i64: 32, 1>}, {pipeline_mode = #tpu.pipeline_mode<synchronous>, transform_indices = @transform_18, window_bounds = array<i64: 1, 1>}, {transform_indices = @transform_19, window_bounds = array<i64: 128, 512>}]} {
    %c0 = arith.constant 0 : index
    %c0_0 = arith.constant 0 : index
    %0 = vector.load %arg1[%c0, %c0_0] : memref<128x24xf32, #tpu.memory_space<vmem>>, vector<128x24xf32>
    %c0_1 = arith.constant 0 : index
    %c0_2 = arith.constant 0 : index
    %1 = vector.load %arg2[%c0_1, %c0_2] : memref<128x16xf32, #tpu.memory_space<vmem>>, vector<128x16xf32>
    %c0_3 = arith.constant 0 : index
    %c0_4 = arith.constant 0 : index
    %2 = vector.load %arg3[%c0_3, %c0_4] : memref<128x32xf32, #tpu.memory_space<vmem>>, vector<128x32xf32>
    %c0_5 = arith.constant 0 : index
    %c0_6 = arith.constant 0 : index
    %3 = vector.load %arg4[%c0_5, %c0_6] : memref<128x1xf32, #tpu.memory_space<vmem>>, vector<128x1xf32>
    %4 = vector.broadcast %3 : vector<128x1xf32> to vector<128x32xf32>
    %5 = arith.mulf %2, %4 : vector<128x32xf32>
    %c0_7 = arith.constant 0 : index
    %c0_8 = arith.constant 0 : index
    %6 = vector.load %arg5[%c0_7, %c0_8] : memref<128x128xf32, #tpu.memory_space<vmem>>, vector<128x128xf32>
    %cst = arith.constant 5.000000e-01 : f32
    %7 = vector.broadcast %cst : f32 to vector<128x128xf32>
    %8 = arith.cmpf ogt, %6, %7 : vector<128x128xf32>
    %c0_9 = arith.constant 0 : index
    %c0_10 = arith.constant 0 : index
    %9 = vector.load %arg6[%c0_9, %c0_10] : memref<24x32xf32, #tpu.memory_space<vmem>>, vector<24x32xf32>
    %cst_11 = arith.constant dense<0.000000e+00> : vector<128x32xf32>
    %10 = tpu.matmul %0, %9, %cst_11 {dimension_numbers = #tpu.dot_dimension_numbers<[1], [0], [0], [1], [0, 0, 1, 1], [], []>} : vector<128x24xf32>, vector<24x32xf32>, vector<128x32xf32> -> vector<128x32xf32>
    %c0_12 = arith.constant 0 : index
    %c0_13 = arith.constant 0 : index
    %11 = vector.load %arg7[%c0_12, %c0_13] : memref<16x32xf32, #tpu.memory_space<vmem>>, vector<16x32xf32>
    %cst_14 = arith.constant dense<0.000000e+00> : vector<128x32xf32>
    %12 = tpu.matmul %1, %11, %cst_14 {dimension_numbers = #tpu.dot_dimension_numbers<[1], [0], [0], [1], [0, 0, 1, 1], [], []>} : vector<128x16xf32>, vector<16x32xf32>, vector<128x32xf32> -> vector<128x32xf32>
    %13 = arith.addf %10, %12 : vector<128x32xf32>
    %c0_15 = arith.constant 0 : index
    %c0_16 = arith.constant 0 : index
    %14 = vector.load %arg8[%c0_15, %c0_16] : memref<1x32xf32, #tpu.memory_space<vmem>>, vector<1x32xf32>
    %15 = vector.broadcast %14 : vector<1x32xf32> to vector<128x32xf32>
    %16 = arith.addf %13, %15 : vector<128x32xf32>
    %cst_17 = arith.constant 0.000000e+00 : f32
    %17 = vector.broadcast %cst_17 : f32 to vector<128x32xf32>
    %18 = arith.cmpf oge, %16, %17 : vector<128x32xf32>
    %cst_18 = arith.constant 0.00999999977 : f32
    %19 = vector.broadcast %cst_18 : f32 to vector<128x32xf32>
    %20 = arith.mulf %19, %16 : vector<128x32xf32>
    %21 = arith.select %18, %16, %20 : vector<128x32xi1>, vector<128x32xf32>
    %22 = tpu.concatenate %21, %5 in 1 : vector<128x32xf32>, vector<128x32xf32> -> vector<128x64xf32>
    %c0_19 = arith.constant 0 : index
    %c0_20 = arith.constant 0 : index
    %23 = vector.load %arg9[%c0_19, %c0_20] : memref<64x128xf32, #tpu.memory_space<vmem>>, vector<64x128xf32>
    %cst_21 = arith.constant dense<0.000000e+00> : vector<128x128xf32>
    %24 = tpu.matmul %22, %23, %cst_21 {dimension_numbers = #tpu.dot_dimension_numbers<[1], [0], [0], [1], [0, 0, 1, 1], [], []>} : vector<128x64xf32>, vector<64x128xf32>, vector<128x128xf32> -> vector<128x128xf32>
    %c0_22 = arith.constant 0 : index
    %c0_23 = arith.constant 0 : index
    %25 = vector.load %arg10[%c0_22, %c0_23] : memref<1x128xf32, #tpu.memory_space<vmem>>, vector<1x128xf32>
    %26 = vector.broadcast %25 : vector<1x128xf32> to vector<128x128xf32>
    %27 = arith.addf %24, %26 : vector<128x128xf32>
    %28 = vector.extract_strided_slice %27 {offsets = [0, 0], sizes = [128, 32], strides = [1, 1]} : vector<128x128xf32> to vector<128x32xf32>
    %29 = arith.negf %28 : vector<128x32xf32>
    %30 = math.exp %29 : vector<128x32xf32>
    %cst_24 = arith.constant 1.000000e+00 : f32
    %31 = vector.broadcast %cst_24 : f32 to vector<128x32xf32>
    %32 = arith.addf %31, %30 : vector<128x32xf32>
    %33 = arith.divf %31, %32 : vector<128x32xf32>
    %34 = vector.extract_strided_slice %27 {offsets = [0, 32], sizes = [128, 32], strides = [1, 1]} : vector<128x128xf32> to vector<128x32xf32>
    %35 = arith.negf %34 : vector<128x32xf32>
    %36 = math.exp %35 : vector<128x32xf32>
    %cst_25 = arith.constant 1.000000e+00 : f32
    %37 = vector.broadcast %cst_25 : f32 to vector<128x32xf32>
    %38 = arith.addf %37, %36 : vector<128x32xf32>
    %39 = arith.divf %37, %38 : vector<128x32xf32>
    %40 = vector.extract_strided_slice %27 {offsets = [0, 64], sizes = [128, 32], strides = [1, 1]} : vector<128x128xf32> to vector<128x32xf32>
    %41 = vector.extract_strided_slice %27 {offsets = [0, 96], sizes = [128, 32], strides = [1, 1]} : vector<128x128xf32> to vector<128x32xf32>
    %42 = arith.mulf %33, %41 : vector<128x32xf32>
    %43 = arith.addf %40, %42 : vector<128x32xf32>
    %44 = math.tanh %43 : vector<128x32xf32>
    %cst_26 = arith.constant 1.000000e+00 : f32
    %45 = vector.broadcast %cst_26 : f32 to vector<128x32xf32>
    %46 = arith.subf %45, %39 : vector<128x32xf32>
    %47 = arith.mulf %46, %44 : vector<128x32xf32>
    %48 = arith.mulf %39, %5 : vector<128x32xf32>
    %49 = arith.addf %47, %48 : vector<128x32xf32>
    %c0_27 = arith.constant 0 : index
    %c0_28 = arith.constant 0 : index
    %50 = vector.load %arg11[%c0_27, %c0_28] : memref<32x48xf32, #tpu.memory_space<vmem>>, vector<32x48xf32>
    %cst_29 = arith.constant dense<0.000000e+00> : vector<128x48xf32>
    %51 = tpu.matmul %49, %50, %cst_29 {dimension_numbers = #tpu.dot_dimension_numbers<[1], [0], [0], [1], [0, 0, 1, 1], [], []>} : vector<128x32xf32>, vector<32x48xf32>, vector<128x48xf32> -> vector<128x48xf32>
    %c0_30 = arith.constant 0 : index
    %c0_31 = arith.constant 0 : index
    %52 = vector.load %arg12[%c0_30, %c0_31] : memref<1x48xf32, #tpu.memory_space<vmem>>, vector<1x48xf32>
    %53 = vector.broadcast %52 : vector<1x48xf32> to vector<128x48xf32>
    %54 = arith.addf %51, %53 : vector<128x48xf32>
    %55 = vector.extract_strided_slice %54 {offsets = [0, 0], sizes = [128, 16], strides = [1, 1]} : vector<128x48xf32> to vector<128x16xf32>
    %56 = vector.extract_strided_slice %54 {offsets = [0, 16], sizes = [128, 16], strides = [1, 1]} : vector<128x48xf32> to vector<128x16xf32>
    %57 = vector.extract_strided_slice %54 {offsets = [0, 32], sizes = [128, 16], strides = [1, 1]} : vector<128x48xf32> to vector<128x16xf32>
    %cst_32 = arith.constant dense<0.000000e+00> : vector<128x128xf32>
    %58 = tpu.matmul %55, %56, %cst_32 {dimension_numbers = #tpu.dot_dimension_numbers<[1], [1], [0], [0], [0, 0, 1, 0], [], []>} : vector<128x16xf32>, vector<128x16xf32>, vector<128x128xf32> -> vector<128x128xf32>
    %cst_33 = arith.constant 2.500000e-01 : f32
    %59 = vector.broadcast %cst_33 : f32 to vector<128x128xf32>
    %60 = arith.mulf %58, %59 : vector<128x128xf32>
    %cst_34 = arith.constant -1.000000e+09 : f32
    %61 = vector.broadcast %cst_34 : f32 to vector<128x128xf32>
    %62 = arith.select %8, %60, %61 : vector<128x128xi1>, vector<128x128xf32>
    %cst_35 = arith.constant dense<0xFF800000> : vector<128xf32>
    %63 = vector.multi_reduction <maximumf>, %62, %cst_35 [1] : vector<128x128xf32> to vector<128xf32>
    %64 = vector.shape_cast %63 : vector<128xf32> to vector<128x1xf32>
    %65 = vector.broadcast %64 : vector<128x1xf32> to vector<128x128xf32>
    %66 = arith.subf %62, %65 : vector<128x128xf32>
    %67 = math.exp %66 : vector<128x128xf32>
    %cst_36 = arith.constant dense<0.000000e+00> : vector<128xf32>
    %68 = vector.multi_reduction <add>, %67, %cst_36 [1] : vector<128x128xf32> to vector<128xf32>
    %69 = vector.shape_cast %68 : vector<128xf32> to vector<128x1xf32>
    %70 = vector.broadcast %69 : vector<128x1xf32> to vector<128x128xf32>
    %71 = arith.divf %67, %70 : vector<128x128xf32>
    %cst_37 = arith.constant dense<0.000000e+00> : vector<128x16xf32>
    %72 = tpu.matmul %71, %57, %cst_37 {dimension_numbers = #tpu.dot_dimension_numbers<[1], [0], [0], [1], [0, 0, 1, 1], [], []>} : vector<128x128xf32>, vector<128x16xf32>, vector<128x16xf32> -> vector<128x16xf32>
    %c0_38 = arith.constant 0 : index
    %c0_39 = arith.constant 0 : index
    %73 = vector.load %arg13[%c0_38, %c0_39] : memref<16x32xf32, #tpu.memory_space<vmem>>, vector<16x32xf32>
    %cst_40 = arith.constant dense<0.000000e+00> : vector<128x32xf32>
    %74 = tpu.matmul %72, %73, %cst_40 {dimension_numbers = #tpu.dot_dimension_numbers<[1], [0], [0], [1], [0, 0, 1, 1], [], []>} : vector<128x16xf32>, vector<16x32xf32>, vector<128x32xf32> -> vector<128x32xf32>
    %c0_41 = arith.constant 0 : index
    %c0_42 = arith.constant 0 : index
    %75 = vector.load %arg14[%c0_41, %c0_42] : memref<32x32xf32, #tpu.memory_space<vmem>>, vector<32x32xf32>
    %cst_43 = arith.constant dense<0.000000e+00> : vector<128x32xf32>
    %76 = tpu.matmul %49, %75, %cst_43 {dimension_numbers = #tpu.dot_dimension_numbers<[1], [0], [0], [1], [0, 0, 1, 1], [], []>} : vector<128x32xf32>, vector<32x32xf32>, vector<128x32xf32> -> vector<128x32xf32>
    %77 = arith.addf %74, %76 : vector<128x32xf32>
    %c0_44 = arith.constant 0 : index
    %c0_45 = arith.constant 0 : index
    %78 = vector.load %arg15[%c0_44, %c0_45] : memref<1x32xf32, #tpu.memory_space<vmem>>, vector<1x32xf32>
    %79 = vector.broadcast %78 : vector<1x32xf32> to vector<128x32xf32>
    %80 = arith.addf %77, %79 : vector<128x32xf32>
    %cst_46 = arith.constant 0.000000e+00 : f32
    %81 = vector.broadcast %cst_46 : f32 to vector<128x32xf32>
    %82 = arith.cmpf oge, %80, %81 : vector<128x32xf32>
    %cst_47 = arith.constant 0.00999999977 : f32
    %83 = vector.broadcast %cst_47 : f32 to vector<128x32xf32>
    %84 = arith.mulf %83, %80 : vector<128x32xf32>
    %85 = arith.select %82, %80, %84 : vector<128x32xi1>, vector<128x32xf32>
    %c0_48 = arith.constant 0 : index
    %c0_49 = arith.constant 0 : index
    %86 = vector.load %arg11[%c0_48, %c0_49] : memref<32x48xf32, #tpu.memory_space<vmem>>, vector<32x48xf32>
    %cst_50 = arith.constant dense<0.000000e+00> : vector<128x48xf32>
    %87 = tpu.matmul %85, %86, %cst_50 {dimension_numbers = #tpu.dot_dimension_numbers<[1], [0], [0], [1], [0, 0, 1, 1], [], []>} : vector<128x32xf32>, vector<32x48xf32>, vector<128x48xf32> -> vector<128x48xf32>
    %c0_51 = arith.constant 0 : index
    %c0_52 = arith.constant 0 : index
    %88 = vector.load %arg12[%c0_51, %c0_52] : memref<1x48xf32, #tpu.memory_space<vmem>>, vector<1x48xf32>
    %89 = vector.broadcast %88 : vector<1x48xf32> to vector<128x48xf32>
    %90 = arith.addf %87, %89 : vector<128x48xf32>
    %91 = vector.extract_strided_slice %90 {offsets = [0, 0], sizes = [128, 16], strides = [1, 1]} : vector<128x48xf32> to vector<128x16xf32>
    %92 = vector.extract_strided_slice %90 {offsets = [0, 16], sizes = [128, 16], strides = [1, 1]} : vector<128x48xf32> to vector<128x16xf32>
    %93 = vector.extract_strided_slice %90 {offsets = [0, 32], sizes = [128, 16], strides = [1, 1]} : vector<128x48xf32> to vector<128x16xf32>
    %cst_53 = arith.constant dense<0.000000e+00> : vector<128x128xf32>
    %94 = tpu.matmul %91, %92, %cst_53 {dimension_numbers = #tpu.dot_dimension_numbers<[1], [1], [0], [0], [0, 0, 1, 0], [], []>} : vector<128x16xf32>, vector<128x16xf32>, vector<128x128xf32> -> vector<128x128xf32>
    %cst_54 = arith.constant 2.500000e-01 : f32
    %95 = vector.broadcast %cst_54 : f32 to vector<128x128xf32>
    %96 = arith.mulf %94, %95 : vector<128x128xf32>
    %cst_55 = arith.constant -1.000000e+09 : f32
    %97 = vector.broadcast %cst_55 : f32 to vector<128x128xf32>
    %98 = arith.select %8, %96, %97 : vector<128x128xi1>, vector<128x128xf32>
    %cst_56 = arith.constant dense<0xFF800000> : vector<128xf32>
    %99 = vector.multi_reduction <maximumf>, %98, %cst_56 [1] : vector<128x128xf32> to vector<128xf32>
    %100 = vector.shape_cast %99 : vector<128xf32> to vector<128x1xf32>
    %101 = vector.broadcast %100 : vector<128x1xf32> to vector<128x128xf32>
    %102 = arith.subf %98, %101 : vector<128x128xf32>
    %103 = math.exp %102 : vector<128x128xf32>
    %cst_57 = arith.constant dense<0.000000e+00> : vector<128xf32>
    %104 = vector.multi_reduction <add>, %103, %cst_57 [1] : vector<128x128xf32> to vector<128xf32>
    %105 = vector.shape_cast %104 : vector<128xf32> to vector<128x1xf32>
    %106 = vector.broadcast %105 : vector<128x1xf32> to vector<128x128xf32>
    %107 = arith.divf %103, %106 : vector<128x128xf32>
    %cst_58 = arith.constant dense<0.000000e+00> : vector<128x16xf32>
    %108 = tpu.matmul %107, %93, %cst_58 {dimension_numbers = #tpu.dot_dimension_numbers<[1], [0], [0], [1], [0, 0, 1, 1], [], []>} : vector<128x128xf32>, vector<128x16xf32>, vector<128x16xf32> -> vector<128x16xf32>
    %c0_59 = arith.constant 0 : index
    %c0_60 = arith.constant 0 : index
    %109 = vector.load %arg13[%c0_59, %c0_60] : memref<16x32xf32, #tpu.memory_space<vmem>>, vector<16x32xf32>
    %cst_61 = arith.constant dense<0.000000e+00> : vector<128x32xf32>
    %110 = tpu.matmul %108, %109, %cst_61 {dimension_numbers = #tpu.dot_dimension_numbers<[1], [0], [0], [1], [0, 0, 1, 1], [], []>} : vector<128x16xf32>, vector<16x32xf32>, vector<128x32xf32> -> vector<128x32xf32>
    %c0_62 = arith.constant 0 : index
    %c0_63 = arith.constant 0 : index
    %111 = vector.load %arg14[%c0_62, %c0_63] : memref<32x32xf32, #tpu.memory_space<vmem>>, vector<32x32xf32>
    %cst_64 = arith.constant dense<0.000000e+00> : vector<128x32xf32>
    %112 = tpu.matmul %85, %111, %cst_64 {dimension_numbers = #tpu.dot_dimension_numbers<[1], [0], [0], [1], [0, 0, 1, 1], [], []>} : vector<128x32xf32>, vector<32x32xf32>, vector<128x32xf32> -> vector<128x32xf32>
    %113 = arith.addf %110, %112 : vector<128x32xf32>
    %c0_65 = arith.constant 0 : index
    %c0_66 = arith.constant 0 : index
    %114 = vector.load %arg15[%c0_65, %c0_66] : memref<1x32xf32, #tpu.memory_space<vmem>>, vector<1x32xf32>
    %115 = vector.broadcast %114 : vector<1x32xf32> to vector<128x32xf32>
    %116 = arith.addf %113, %115 : vector<128x32xf32>
    %cst_67 = arith.constant 0.000000e+00 : f32
    %117 = vector.broadcast %cst_67 : f32 to vector<128x32xf32>
    %118 = arith.cmpf oge, %116, %117 : vector<128x32xf32>
    %cst_68 = arith.constant 0.00999999977 : f32
    %119 = vector.broadcast %cst_68 : f32 to vector<128x32xf32>
    %120 = arith.mulf %119, %116 : vector<128x32xf32>
    %121 = arith.select %118, %116, %120 : vector<128x32xi1>, vector<128x32xf32>
    %c0_69 = arith.constant 0 : index
    %c0_70 = arith.constant 0 : index
    %122 = vector.load %arg11[%c0_69, %c0_70] : memref<32x48xf32, #tpu.memory_space<vmem>>, vector<32x48xf32>
    %cst_71 = arith.constant dense<0.000000e+00> : vector<128x48xf32>
    %123 = tpu.matmul %121, %122, %cst_71 {dimension_numbers = #tpu.dot_dimension_numbers<[1], [0], [0], [1], [0, 0, 1, 1], [], []>} : vector<128x32xf32>, vector<32x48xf32>, vector<128x48xf32> -> vector<128x48xf32>
    %c0_72 = arith.constant 0 : index
    %c0_73 = arith.constant 0 : index
    %124 = vector.load %arg12[%c0_72, %c0_73] : memref<1x48xf32, #tpu.memory_space<vmem>>, vector<1x48xf32>
    %125 = vector.broadcast %124 : vector<1x48xf32> to vector<128x48xf32>
    %126 = arith.addf %123, %125 : vector<128x48xf32>
    %127 = vector.extract_strided_slice %126 {offsets = [0, 0], sizes = [128, 16], strides = [1, 1]} : vector<128x48xf32> to vector<128x16xf32>
    %128 = vector.extract_strided_slice %126 {offsets = [0, 16], sizes = [128, 16], strides = [1, 1]} : vector<128x48xf32> to vector<128x16xf32>
    %129 = vector.extract_strided_slice %126 {offsets = [0, 32], sizes = [128, 16], strides = [1, 1]} : vector<128x48xf32> to vector<128x16xf32>
    %cst_74 = arith.constant dense<0.000000e+00> : vector<128x128xf32>
    %130 = tpu.matmul %127, %128, %cst_74 {dimension_numbers = #tpu.dot_dimension_numbers<[1], [1], [0], [0], [0, 0, 1, 0], [], []>} : vector<128x16xf32>, vector<128x16xf32>, vector<128x128xf32> -> vector<128x128xf32>
    %cst_75 = arith.constant 2.500000e-01 : f32
    %131 = vector.broadcast %cst_75 : f32 to vector<128x128xf32>
    %132 = arith.mulf %130, %131 : vector<128x128xf32>
    %cst_76 = arith.constant -1.000000e+09 : f32
    %133 = vector.broadcast %cst_76 : f32 to vector<128x128xf32>
    %134 = arith.select %8, %132, %133 : vector<128x128xi1>, vector<128x128xf32>
    %cst_77 = arith.constant dense<0xFF800000> : vector<128xf32>
    %135 = vector.multi_reduction <maximumf>, %134, %cst_77 [1] : vector<128x128xf32> to vector<128xf32>
    %136 = vector.shape_cast %135 : vector<128xf32> to vector<128x1xf32>
    %137 = vector.broadcast %136 : vector<128x1xf32> to vector<128x128xf32>
    %138 = arith.subf %134, %137 : vector<128x128xf32>
    %139 = math.exp %138 : vector<128x128xf32>
    %cst_78 = arith.constant dense<0.000000e+00> : vector<128xf32>
    %140 = vector.multi_reduction <add>, %139, %cst_78 [1] : vector<128x128xf32> to vector<128xf32>
    %141 = vector.shape_cast %140 : vector<128xf32> to vector<128x1xf32>
    %142 = vector.broadcast %141 : vector<128x1xf32> to vector<128x128xf32>
    %143 = arith.divf %139, %142 : vector<128x128xf32>
    %cst_79 = arith.constant dense<0.000000e+00> : vector<128x16xf32>
    %144 = tpu.matmul %143, %129, %cst_79 {dimension_numbers = #tpu.dot_dimension_numbers<[1], [0], [0], [1], [0, 0, 1, 1], [], []>} : vector<128x128xf32>, vector<128x16xf32>, vector<128x16xf32> -> vector<128x16xf32>
    %cst_80 = arith.constant 2.500000e-01 : f32
    %145 = vector.broadcast %cst_80 : f32 to vector<128x128xf32>
    %146 = arith.mulf %6, %145 : vector<128x128xf32>
    %cst_81 = arith.constant dense<0.000000e+00> : vector<128x32xf32>
    %147 = tpu.matmul %146, %49, %cst_81 {dimension_numbers = #tpu.dot_dimension_numbers<[1], [0], [0], [1], [0, 0, 1, 1], [], []>} : vector<128x128xf32>, vector<128x32xf32>, vector<128x32xf32> -> vector<128x32xf32>
    %c0_82 = arith.constant 0 : index
    %c0_83 = arith.constant 0 : index
    %148 = vector.load %arg16[%c0_82, %c0_83] : memref<32x32xf32, #tpu.memory_space<vmem>>, vector<32x32xf32>
    %cst_84 = arith.constant dense<0.000000e+00> : vector<128x32xf32>
    %149 = tpu.matmul %147, %148, %cst_84 {dimension_numbers = #tpu.dot_dimension_numbers<[1], [0], [0], [1], [0, 0, 1, 1], [], []>} : vector<128x32xf32>, vector<32x32xf32>, vector<128x32xf32> -> vector<128x32xf32>
    %c0_85 = arith.constant 0 : index
    %c0_86 = arith.constant 0 : index
    %150 = vector.load %arg17[%c0_85, %c0_86] : memref<1x32xf32, #tpu.memory_space<vmem>>, vector<1x32xf32>
    %151 = vector.broadcast %150 : vector<1x32xf32> to vector<128x32xf32>
    %152 = arith.addf %149, %151 : vector<128x32xf32>
    %cst_87 = arith.constant 0.000000e+00 : f32
    %153 = vector.broadcast %cst_87 : f32 to vector<128x32xf32>
    %154 = arith.cmpf oge, %152, %153 : vector<128x32xf32>
    %cst_88 = arith.constant 0.00999999977 : f32
    %155 = vector.broadcast %cst_88 : f32 to vector<128x32xf32>
    %156 = arith.mulf %155, %152 : vector<128x32xf32>
    %157 = arith.select %154, %152, %156 : vector<128x32xi1>, vector<128x32xf32>
    %c0_89 = arith.constant 0 : index
    %c0_90 = arith.constant 0 : index
    %158 = vector.load %arg18[%c0_89, %c0_90] : memref<32x1xf32, #tpu.memory_space<vmem>>, vector<32x1xf32>
    %cst_91 = arith.constant dense<0.000000e+00> : vector<128x1xf32>
    %159 = tpu.matmul %157, %158, %cst_91 {dimension_numbers = #tpu.dot_dimension_numbers<[1], [0], [0], [1], [0, 0, 1, 1], [], []>} : vector<128x32xf32>, vector<32x1xf32>, vector<128x1xf32> -> vector<128x1xf32>
    %c0_92 = arith.constant 0 : index
    %c0_93 = arith.constant 0 : index
    %160 = vector.load %arg19[%c0_92, %c0_93] : memref<1x1xf32, #tpu.memory_space<vmem>>, vector<1x1xf32>
    %161 = vector.broadcast %160 : vector<1x1xf32> to vector<128x1xf32>
    %162 = arith.addf %159, %161 : vector<128x1xf32>
    %cst_94 = arith.constant 0.000000e+00 : f32
    %163 = vector.broadcast %cst_94 : f32 to vector<128x79xf32>
    %164 = tpu.concatenate %49, %144, %162, %71, %107, %143, %163 in 1 : vector<128x32xf32>, vector<128x16xf32>, vector<128x1xf32>, vector<128x128xf32>, vector<128x128xf32>, vector<128x128xf32>, vector<128x79xf32> -> vector<128x512xf32>
    %c0_95 = arith.constant 0 : index
    %c0_96 = arith.constant 0 : index
    %165 = vector.load %arg20[%c0_95, %c0_96] : memref<128x512xf32, #tpu.memory_space<vmem>>, vector<128x512xf32>
    tpu.vector_store %arg20[%c0_95, %c0_96], %164 {strides = array<i32>} : memref<128x512xf32, #tpu.memory_space<vmem>>, vector<128x512xf32>,
    return
  }
  func.func @transform_0(%arg0: i32) -> (i32, i32) {
    %c0_i32 = arith.constant 0 : i32
    %c0_i32_0 = arith.constant 0 : i32
    return %arg0, %c0_i32 : i32, i32
  }
  func.func @transform_1(%arg0: i32) -> (i32, i32) {
    %c0_i32 = arith.constant 0 : i32
    %c0_i32_0 = arith.constant 0 : i32
    return %arg0, %c0_i32 : i32, i32
  }
  func.func @transform_2(%arg0: i32) -> (i32, i32) {
    %c0_i32 = arith.constant 0 : i32
    %c0_i32_0 = arith.constant 0 : i32
    return %arg0, %c0_i32 : i32, i32
  }
  func.func @transform_3(%arg0: i32) -> (i32, i32) {
    %c0_i32 = arith.constant 0 : i32
    %c0_i32_0 = arith.constant 0 : i32
    return %arg0, %c0_i32 : i32, i32
  }
  func.func @transform_4(%arg0: i32) -> (i32, i32) {
    %c0_i32 = arith.constant 0 : i32
    %c0_i32_0 = arith.constant 0 : i32
    %c0_i32_1 = arith.constant 0 : i32
    return %c0_i32, %c0_i32_0 : i32, i32
  }
  func.func @transform_5(%arg0: i32) -> (i32, i32) {
    %c0_i32 = arith.constant 0 : i32
    %c0_i32_0 = arith.constant 0 : i32
    %c0_i32_1 = arith.constant 0 : i32
    return %c0_i32, %c0_i32_0 : i32, i32
  }
  func.func @transform_6(%arg0: i32) -> (i32, i32) {
    %c0_i32 = arith.constant 0 : i32
    %c0_i32_0 = arith.constant 0 : i32
    %c0_i32_1 = arith.constant 0 : i32
    return %c0_i32, %c0_i32_0 : i32, i32
  }
  func.func @transform_7(%arg0: i32) -> (i32, i32) {
    %c0_i32 = arith.constant 0 : i32
    %c0_i32_0 = arith.constant 0 : i32
    %c0_i32_1 = arith.constant 0 : i32
    return %c0_i32, %c0_i32_0 : i32, i32
  }
  func.func @transform_8(%arg0: i32) -> (i32, i32) {
    %c0_i32 = arith.constant 0 : i32
    %c0_i32_0 = arith.constant 0 : i32
    %c0_i32_1 = arith.constant 0 : i32
    return %c0_i32, %c0_i32_0 : i32, i32
  }
  func.func @transform_9(%arg0: i32) -> (i32, i32) {
    %c0_i32 = arith.constant 0 : i32
    %c0_i32_0 = arith.constant 0 : i32
    %c0_i32_1 = arith.constant 0 : i32
    return %c0_i32, %c0_i32_0 : i32, i32
  }
  func.func @transform_10(%arg0: i32) -> (i32, i32) {
    %c0_i32 = arith.constant 0 : i32
    %c0_i32_0 = arith.constant 0 : i32
    %c0_i32_1 = arith.constant 0 : i32
    return %c0_i32, %c0_i32_0 : i32, i32
  }
  func.func @transform_11(%arg0: i32) -> (i32, i32) {
    %c0_i32 = arith.constant 0 : i32
    %c0_i32_0 = arith.constant 0 : i32
    %c0_i32_1 = arith.constant 0 : i32
    return %c0_i32, %c0_i32_0 : i32, i32
  }
  func.func @transform_12(%arg0: i32) -> (i32, i32) {
    %c0_i32 = arith.constant 0 : i32
    %c0_i32_0 = arith.constant 0 : i32
    %c0_i32_1 = arith.constant 0 : i32
    return %c0_i32, %c0_i32_0 : i32, i32
  }
  func.func @transform_13(%arg0: i32) -> (i32, i32) {
    %c0_i32 = arith.constant 0 : i32
    %c0_i32_0 = arith.constant 0 : i32
    %c0_i32_1 = arith.constant 0 : i32
    return %c0_i32, %c0_i32_0 : i32, i32
  }
  func.func @transform_14(%arg0: i32) -> (i32, i32) {
    %c0_i32 = arith.constant 0 : i32
    %c0_i32_0 = arith.constant 0 : i32
    %c0_i32_1 = arith.constant 0 : i32
    return %c0_i32, %c0_i32_0 : i32, i32
  }
  func.func @transform_15(%arg0: i32) -> (i32, i32) {
    %c0_i32 = arith.constant 0 : i32
    %c0_i32_0 = arith.constant 0 : i32
    %c0_i32_1 = arith.constant 0 : i32
    return %c0_i32, %c0_i32_0 : i32, i32
  }
  func.func @transform_16(%arg0: i32) -> (i32, i32) {
    %c0_i32 = arith.constant 0 : i32
    %c0_i32_0 = arith.constant 0 : i32
    %c0_i32_1 = arith.constant 0 : i32
    return %c0_i32, %c0_i32_0 : i32, i32
  }
  func.func @transform_17(%arg0: i32) -> (i32, i32) {
    %c0_i32 = arith.constant 0 : i32
    %c0_i32_0 = arith.constant 0 : i32
    %c0_i32_1 = arith.constant 0 : i32
    return %c0_i32, %c0_i32_0 : i32, i32
  }
  func.func @transform_18(%arg0: i32) -> (i32, i32) {
    %c0_i32 = arith.constant 0 : i32
    %c0_i32_0 = arith.constant 0 : i32
    %c0_i32_1 = arith.constant 0 : i32
    return %c0_i32, %c0_i32_0 : i32, i32
  }
  func.func @transform_19(%arg0: i32) -> (i32, i32) {
    %c0_i32 = arith.constant 0 : i32
    %c0_i32_0 = arith.constant 0 : i32
    return %arg0, %c0_i32 : i32, i32
  }
}

</mosaic_0001>

<bundles_post_ra>
// kernel: tpu_custom_call.1
= control target key start
LH: loop header
LB: loop body
LE: loop exit
PB: predicated region body
PF: predicated region fallthrough
CT: control target
= control target key end

     0   :  { %s11425_s0 = inlined_call_operand.vmem [shape: f32[256,24], index: 0, kind: input, shape index: {}]   ;;  %s11426_s1 = inlined_call_operand.vmem [shape: f32[256,16], index: 1, kind: input, shape index: {}]   ;;  %s11427_s2 = inlined_call_operand.vmem [shape: f32[256,32], index: 2, kind: input, shape index: {}]   ;;  %s11428_s3 = inlined_call_operand.vmem [shape: f32[256,1], index: 3, kind: input, shape index: {}]   ;;  %s11429_s4 = inlined_call_operand.vmem [shape: f32[128,128], index: 4, kind: input, shape index: {}]   ;;  %s11430_s5 = inlined_call_operand.vmem [shape: f32[24,32], index: 5, kind: input, shape index: {}]   ;;  %s11431_s6 = inlined_call_operand.vmem [shape: f32[16,32], index: 6, kind: input, shape index: {}]   ;;  %s11432_s7 = inlined_call_operand.vmem [shape: f32[1,32], index: 7, kind: input, shape index: {}]   ;;  %s11433_s8 = inlined_call_operand.vmem [shape: f32[64,128], index: 8, kind: input, shape index: {}]   ;;  %s11434_s9 = inlined_call_operand.vmem [shape: f32[1,128], index: 9, kind: input, shape index: {}]   ;;  %s11435_s10 = inlined_call_operand.vmem [shape: f32[32,48], index: 10, kind: input, shape index: {}]   ;;  %s11436_s11 = inlined_call_operand.vmem [shape: f32[1,48], index: 11, kind: input, shape index: {}]   ;;  %s11437_s12 = inlined_call_operand.vmem [shape: f32[16,32], index: 12, kind: input, shape index: {}]   ;;  %s11438_s13 = inlined_call_operand.vmem [shape: f32[32,32], index: 13, kind: input, shape index: {}]   ;;  %s11439_s14 = inlined_call_operand.vmem [shape: f32[1,32], index: 14, kind: input, shape index: {}]   ;;  %s11440_s15 = inlined_call_operand.vmem [shape: f32[32,32], index: 15, kind: input, shape index: {}]   ;;  %s11441_s16 = inlined_call_operand.vmem [shape: f32[1,32], index: 16, kind: input, shape index: {}]   ;;  %s11442_s17 = inlined_call_operand.vmem [shape: f32[32,1], index: 17, kind: input, shape index: {}]   ;;  %s11443_s18 = inlined_call_operand.<no memory space> [shape: f32[1,1], index: 18, kind: input, shape index: {}]   ;;  %s11444_s19 = inlined_call_operand.hbm [shape: f32[256,512], index: 19, kind: output, shape index: {}]  }
   0x1   :  { %11502 = sst [smem:[#allocation40_spill]] %s11425_s0  ;;  %v24_v0 = vstv %s11443_s18 }
   0x2   :  { %11503 = sst [smem:[#allocation41_spill]] %s11426_s1  ;;  %25 = vst [vmem:[#allocation2] sm:$0x1] %v24_v0 }
   0x3   :  { %11504 = sst [smem:[#allocation42_spill]] %s11427_s2 }
   0x4   :  { %11505 = sst [smem:[#allocation43_spill]] %s11428_s3 }
   0x5   :  { %11506 = sst [smem:[#allocation44_spill]] %s11430_s5 }
   0x6   :  { %11507 = sst [smem:[#allocation45_spill]] %s11431_s6 }
   0x7   :  { %26 = vsyncpa [#allocation4], 0 }
   0x8   :  { %28 = vsyncpa [#allocation4 + $0x1], 0  ;;  %s8667_s20 = smov 0   ;;  %s8669_s21 = smov 0  }
   0x9   :  { %s8671_s1 = smov 0   ;;  %s8673_s22 = smov 0  }
   0xa LB: > { %11508 = sst [smem:[#allocation6_spill]] %s8549_s1  ;;  %s8688_s18 = sadd.s32 4294967295, %s8553_s22   ;;  %s8553_s22 = sphi %s8673_s22, %s11600_s22   ;;  %s8549_s1 = sphi %s8671_s1, %s11597_s1   ;;  %s8545_s21 = sphi %s8669_s21, %s11599_s21   ;;  %s8541_s20 = sphi %s8667_s20, %s11598_s20  }
   0xb   : > { %s6563_s2 = sadd.s32 4294967294, %s8553_s22   ;;  %s8692_s23 = sadd.s32 1, %s8553_s22  }
   0xc   : > { %s460_s24 = sadd.s32 1, %s8549_s1  ;;  %s457_s25 = ssub.s32 %s8553_s22, %s8692_s23 }
   0xd   : > { %p470_p0 = scmp.ne.s32.totalorder %s8549_s1, %s8545_s21  ;;  %p458_p1 = scmp.eq.s32.totalorder %s457_s25, 0 }
   0xe   : > { %p471_p2 = scmp.eq.s32.totalorder %s8688_s18, 1  ;;  %p476_p3 = scmp.ne.s32.totalorder %s8545_s21, %s8541_s20 }
   0xf   : > { %p477_p4 = scmp.eq.s32.totalorder %s6563_s2, 1  ;;  %p6566_p7 = scmp.ge.s32.totalorder %s8553_s22, 1 }
  0x10   : > { %s8703_s3 = scalar_select %p458_p1, %s8549_s1, %s460_s24  }
  0x11   : > { %p8705_p5 = por %p471_p2, %p470_p0  ;;  %p8709_p6 = por %p477_p4, %p476_p3 }
  0x12   : > { %11509 = sst [smem:[#allocation7_spill]] %s8703_s3  ;;  %p576_p8 = scmp.lt.s32.totalorder %s8553_s22, 3 }
  0x14   : > { %p577_p9 = pnand %p6566_p7, %p576_p8 }
  0x16   : > { %580 = sbr.rel (%p577_p9) target bundleno = 5415 (0x1527), region = 96 }
  0x1b   : > { %s6568_s28 = sshll.u32 %s8688_s18, 4  ;;  %s11512_s5 = sld [smem:[#allocation44_spill]]  ;;  %v8555_v3 = vmov 0   ;;  %vm869_vm0 = vcmask 130048   ;;  %vm1063_vm1 = vcmask 195584   ;;  %v1416_v53 = vld [vmem:[%s11433_s8 + $0x38] sm:$0xff] }
  0x1c   : > { %s11513_s6 = sld [smem:[#allocation45_spill]]  ;;  %8173 = vset.pattern.permute.xlu1 %v8555_v3  ;;  %8172 = vset.pattern.permute.xlu0 %v8555_v3  ;;  %p648_p10 = scmp.lt.s32.totalorder %s6568_s28, 31  ;;  %v1415_v56 = vld [vmem:[%s11433_s8 + $0x30] sm:$0xff]  ;;  %v1414_v57 = vld [vmem:[%s11433_s8 + $0x28] sm:$0xff]  ;;  %v1413_v58 = vld [vmem:[%s11433_s8 + $0x20] sm:$0xff]  ;;  %vm1392_vm3 = vcmask 261120  }
  0x1d   : > { %s11514_s2 = sld [smem:[#allocation43_spill]]  ;;  %v1412_v59 = vld [vmem:[%s11433_s8 + $0x18] sm:$0xff]  ;;  %v1411_v60 = vld [vmem:[%s11433_s8 + $0x10] sm:$0xff]  ;;  %v1410_v61 = vld [vmem:[%s11433_s8 + $0x8] sm:$0xff]  ;;  %vm1424_vm4 = vcmask 523264   ;;  %s8557_s1 = smov 64  }
  0x1e   : > { %s11602_s28 = smov (!%p648_p10, %s6568_s28), 31  ;;  %s11515_s29 = sld [smem:[#allocation41_spill]]  ;;  %v1409_v62 = vld [vmem:[%s11433_s8] sm:$0xff] }
  0x1f   : > { %s8731_s30 = sshll.u32 %s11602_s28, 3  ;;  %s11501_s28 = smov 32  }
  0x20   : > { %s8558_s3 = smov 96  }
  0x21   : > { %v866_v1 = vld [vmem:[%s11512_s5 + $0x10] sm:$0xff]  ;;  %v865_v4 = vld [vmem:[%s11512_s5 + $0x8] sm:$0xff]  ;;  %v864_v6 = vld [vmem:[%s11512_s5] sm:$0xff] }
  0x22   : > { %v868_v2 = vld [vmem:[%s11513_s6 + $0x8] sm:$0xff]  ;;  %v867_v5 = vld [vmem:[%s11513_s6] sm:$0xff]  ;;  %7383 = vmatprep.subr.mxu1 %v866_v1 }
  0x23   : > { %7355 = vmatprep.subr.mxu0 %v868_v2  ;;  %7384 = vmatpush3.msra.mxu1 %v866_v1  ;;  %s8737_s24 = scalar_lea.vmem %s11514_s2, %s8731_s30  ;;  %s11516_s2 = sld [smem:[#allocation40_spill]] }
  0x24   : > { %7356 = vmatpush3.msra.mxu0 %v868_v2  ;;  %7385 = vmatprep.subr.mxu1 %v865_v4  ;;  %v722_v7 = vld [vmem:[%s8737_s24 + $0x10] sm:$0xff]  ;;  %v720_v8 = vld [vmem:[%s8737_s24] sm:$0xff]  ;;  %v723_v9 = vld [vmem:[%s8737_s24 + $0x18] sm:$0xff]  ;;  %s8747_s0 = scalar_lea.vmem %s11515_s29, %s8731_s30 }
  0x25   : > { %7357 = vmatprep.subr.mxu0 %v867_v5  ;;  %7386 = vmatpush3.msra.mxu1 %v865_v4  ;;  %v721_v10 = vld [vmem:[%s8737_s24 + $0x8] sm:$0xff]  ;;  %v724_v12 = vld [vmem:[%s8737_s24 + $0x20] sm:$0xff]  ;;  %v690_v17 = vld [vmem:[%s8747_s0 + $0x10] sm:$0xff] }
  0x26   : > { %7358 = vmatpush3.msra.mxu0 %v867_v5  ;;  %7387 = vmatprep.subr.mxu1 %v864_v6  ;;  %v725_v11 = vld [vmem:[%s8737_s24 + $0x28] sm:$0xff]  ;;  %v688_v13 = vld [vmem:[%s8747_s0] sm:$0xff]  ;;  %v691_v19 = vld [vmem:[%s8747_s0 + $0x18] sm:$0xff] }
  0x27   : > { %7388 = vmatpush3.msra.mxu1 %v864_v6  ;;  %748 = vperm.xlu1 %8173, %v722_v7   ;;  %v689_v15 = vld [vmem:[%s8747_s0 + $0x8] sm:$0xff]  ;;  %v692_v21 = vld [vmem:[%s8747_s0 + $0x20] sm:$0xff]  ;;  %v727_v23 = vld [vmem:[%s8737_s24 + $0x38] sm:$0xff] }
  0x28   : > { %738 = vperm.xlu0 %8172, %v720_v8   ;;  %7359 = vmatprep.mubr.msk.f32.mxu0 %vm869_vm0, %v688_v13  ;;  %v726_v24 = vld [vmem:[%s8737_s24 + $0x30] sm:$0xff]  ;;  %v693_v25 = vld [vmem:[%s8747_s0 + $0x28] sm:$0xff]  ;;  %v728_v30 = vld [vmem:[%s8737_s24 + $0x40] sm:$0xff] }
  0x29   : > { %s8753_s5 = scalar_lea.vmem %s11516_s2, %s8731_s30  ;;  %7360 = vmatmul.mubr.msk.f32.vlgmr.msra.gmra.mxu0 %vm869_vm0, %v689_v15  ;;  %v694_v27 = vld [vmem:[%s8747_s0 + $0x30] sm:$0xff]  ;;  %v729_v29 = vld [vmem:[%s8737_s24 + $0x48] sm:$0xff]  ;;  %v695_v31 = vld [vmem:[%s8747_s0 + $0x38] sm:$0xff]  ;;  %7413 = vmatprep.subr.mxu0 %v1416_v53  ;;  %s8561_s2 = smov 48  }
  0x2a   : > { %v672_v14 = vld [vmem:[%s8753_s5] sm:$0xff]  ;;  %v673_v16 = vld [vmem:[%s8753_s5 + $0x8] sm:$0xff]  ;;  %v674_v18 = vld [vmem:[%s8753_s5 + $0x10] sm:$0xff]  ;;  %7362 = vmatprep.mubr.msk.f32.mxu0 %vm869_vm0, %v690_v17  ;;  %7414 = vmatpush3.msra.mxu0 %v1416_v53 }
  0x2b   : > { %753 = vperm.xlu1 %8173, %v723_v9   ;;  %7389 = vmatprep.mubr.msk.f32.mxu1 %vm1063_vm1, %v672_v14  ;;  %v675_v20 = vld [vmem:[%s8753_s5 + $0x18] sm:$0xff]  ;;  %v676_v22 = vld [vmem:[%s8753_s5 + $0x20] sm:$0xff]  ;;  %v677_v26 = vld [vmem:[%s8753_s5 + $0x28] sm:$0xff] }
  0x2c   : > { %743 = vperm.xlu0 %8172, %v721_v10   ;;  %7390 = vmatmul.mubr.msk.f32.vlgmr.msra.gmra.mxu1 %vm1063_vm1, %v673_v16  ;;  %v678_v28 = vld [vmem:[%s8753_s5 + $0x30] sm:$0xff]  ;;  %v679_v32 = vld [vmem:[%s8753_s5 + $0x38] sm:$0xff]  ;;  %v696_v33 = vld [vmem:[%s8747_s0 + $0x40] sm:$0xff] }
  0x2d   : > { %7392 = vmatprep.mubr.msk.f32.mxu1 %vm1063_vm1, %v674_v18  ;;  %7363 = vmatmul.mubr.msk.f32.gmra.mxu0 %vm869_vm0, %v691_v19  ;;  %v680_v34 = vld [vmem:[%s8753_s5 + $0x40] sm:$0xff]  ;;  %v731_v35 = vld [vmem:[%s8737_s24 + $0x58] sm:$0xff]  ;;  %v730_v36 = vld [vmem:[%s8737_s24 + $0x50] sm:$0xff] }
  0x2e   : > { %7365 = vmatprep.mubr.msk.f32.mxu0 %vm869_vm0, %v692_v21  ;;  %v697_v37 = vld [vmem:[%s8747_s0 + $0x48] sm:$0xff]  ;;  %v698_v39 = vld [vmem:[%s8747_s0 + $0x50] sm:$0xff]  ;;  %v732_v42 = vld [vmem:[%s8737_s24 + $0x60] sm:$0xff]  ;;  %7415 = vmatprep.subr.mxu0 %v1415_v56 }
  0x2f   : > { %763 = vperm.xlu1 %8173, %v725_v11   ;;  %v681_v38 = vld [vmem:[%s8753_s5 + $0x48] sm:$0xff]  ;;  %v682_v40 = vld [vmem:[%s8753_s5 + $0x50] sm:$0xff]  ;;  %v699_v43 = vld [vmem:[%s8747_s0 + $0x58] sm:$0xff]  ;;  %7416 = vmatpush3.msra.mxu0 %v1415_v56 }
  0x30   : > { %758 = vperm.xlu0 %8172, %v724_v12   ;;  %7393 = vmatmul.mubr.msk.f32.gmra.mxu1 %vm1063_vm1, %v675_v20  ;;  %v733_v41 = vld [vmem:[%s8737_s24 + $0x68] sm:$0xff]  ;;  %v683_v44 = vld [vmem:[%s8753_s5 + $0x58] sm:$0xff]  ;;  %v700_v45 = vld [vmem:[%s8747_s0 + $0x60] sm:$0xff] }
  0x31   : > { %7395 = vmatprep.mubr.msk.f32.mxu1 %vm1063_vm1, %v676_v22  ;;  %7366 = vmatmul.mubr.msk.f32.gmra.mxu0 %vm869_vm0, %v693_v25  ;;  %v684_v46 = vld [vmem:[%s8753_s5 + $0x60] sm:$0xff]  ;;  %v735_v47 = vld [vmem:[%s8737_s24 + $0x78] sm:$0xff]  ;;  %v734_v48 = vld [vmem:[%s8737_s24 + $0x70] sm:$0xff]  ;;  %s8559_s24 = smov 112  }
  0x32   : > { %7368 = vmatprep.mubr.msk.f32.mxu0 %vm869_vm0, %v694_v27  ;;  %v701_v49 = vld [vmem:[%s8747_s0 + $0x68] sm:$0xff]  ;;  %v702_v51 = vld [vmem:[%s8747_s0 + $0x70] sm:$0xff]  ;;  %v703_v54 = vld [vmem:[%s8747_s0 + $0x78] sm:$0xff]  ;;  %7417 = vmatprep.subr.mxu0 %v1414_v57  ;;  %s11517_s0 = sld [smem:[#allocation42_spill]] }
  0x33   : > { %773 = vperm.xlu1 %8173, %v727_v23   ;;  %v685_v50 = vld [vmem:[%s8753_s5 + $0x68] sm:$0xff]  ;;  %v686_v52 = vld [vmem:[%s8753_s5 + $0x70] sm:$0xff]  ;;  %v687_v55 = vld [vmem:[%s8753_s5 + $0x78] sm:$0xff]  ;;  %7418 = vmatpush3.msra.mxu0 %v1414_v57 }
  0x34   : > { %768 = vperm.xlu0 %8172, %v726_v24   ;;  %7396 = vmatmul.mubr.msk.f32.gmra.mxu1 %vm1063_vm1, %v677_v26 }
  0x35   : > { %7398 = vmatprep.mubr.msk.f32.mxu1 %vm1063_vm1, %v678_v28  ;;  %7369 = vmatmul.mubr.msk.f32.gmra.mxu0 %vm869_vm0, %v695_v31 }
  0x36   : > { %7371 = vmatprep.mubr.msk.f32.mxu0 %vm869_vm0, %v696_v33  ;;  %7419 = vmatprep.subr.mxu0 %v1413_v58 }
  0x37   : > { %783 = vperm.xlu1 %8173, %v729_v29   ;;  %7420 = vmatpush3.msra.mxu0 %v1413_v58 }
  0x38   : > { %778 = vperm.xlu0 %8172, %v728_v30   ;;  %7399 = vmatmul.mubr.msk.f32.gmra.mxu1 %vm1063_vm1, %v679_v32  ;;  %s8859_s6 = scalar_lea.vmem %s11517_s0, %s8731_s30 }
  0x39   : > { %7401 = vmatprep.mubr.msk.f32.mxu1 %vm1063_vm1, %v680_v34  ;;  %7372 = vmatmul.mubr.msk.f32.gmra.mxu0 %vm869_vm0, %v697_v37  ;;  %v704_v63 = vld [vmem:[%s8859_s6] sm:$0xff]  ;;  %v706_v1 = vld [vmem:[%s8859_s6 + $0x10] sm:$0xff]  ;;  %v705_v4 = vld [vmem:[%s8859_s6 + $0x8] sm:$0xff] }
  0x3a   : > { %7374 = vmatprep.mubr.msk.f32.mxu0 %vm869_vm0, %v698_v39  ;;  %7421 = vmatprep.subr.mxu0 %v1412_v59  ;;  %v707_v9 = vld [vmem:[%s8859_s6 + $0x18] sm:$0xff]  ;;  %v708_v10 = vld [vmem:[%s8859_s6 + $0x20] sm:$0xff]  ;;  %v709_v15 = vld [vmem:[%s8859_s6 + $0x28] sm:$0xff] }
  0x3b   : > { %793 = vperm.xlu1 %8173, %v731_v35   ;;  %7422 = vmatpush3.msra.mxu0 %v1412_v59  ;;  %v710_v16 = vld [vmem:[%s8859_s6 + $0x30] sm:$0xff]  ;;  %v711_v21 = vld [vmem:[%s8859_s6 + $0x38] sm:$0xff]  ;;  %v712_v22 = vld [vmem:[%s8859_s6 + $0x40] sm:$0xff] }
  0x3c   : > { %788 = vperm.xlu0 %8172, %v730_v36   ;;  %7402 = vmatmul.mubr.msk.f32.gmra.mxu1 %vm1063_vm1, %v681_v38  ;;  %v713_v27 = vld [vmem:[%s8859_s6 + $0x48] sm:$0xff]  ;;  %v714_v28 = vld [vmem:[%s8859_s6 + $0x50] sm:$0xff]  ;;  %v715_v33 = vld [vmem:[%s8859_s6 + $0x58] sm:$0xff] }
  0x3d   : > { %7404 = vmatprep.mubr.msk.f32.mxu1 %vm1063_vm1, %v682_v40  ;;  %7375 = vmatmul.mubr.msk.f32.gmra.mxu0 %vm869_vm0, %v699_v43  ;;  %v716_v34 = vld [vmem:[%s8859_s6 + $0x60] sm:$0xff]  ;;  %v717_v39 = vld [vmem:[%s8859_s6 + $0x68] sm:$0xff]  ;;  %v718_v40 = vld [vmem:[%s8859_s6 + $0x70] sm:$0xff] }
  0x3e   : > { %7377 = vmatprep.mubr.msk.f32.mxu0 %vm869_vm0, %v700_v45  ;;  %7423 = vmatprep.subr.mxu0 %v1411_v60  ;;  %v719_v45 = vld [vmem:[%s8859_s6 + $0x78] sm:$0xff] }
  0x3f   : > { %803 = vperm.xlu1 %8173, %v733_v41   ;;  %7424 = vmatpush3.msra.mxu0 %v1411_v60 }
  0x40   : > { %798 = vperm.xlu0 %8172, %v732_v42   ;;  %7405 = vmatmul.mubr.msk.f32.gmra.mxu1 %vm1063_vm1, %v683_v44 }
  0x41   : > { %7407 = vmatprep.mubr.msk.f32.mxu1 %vm1063_vm1, %v684_v46  ;;  %7378 = vmatmul.mubr.msk.f32.gmra.mxu0 %vm869_vm0, %v701_v49 }
  0x42   : > { %7380 = vmatprep.mubr.msk.f32.mxu0 %vm869_vm0, %v702_v51  ;;  %7425 = vmatprep.subr.mxu0 %v1410_v61 }
  0x43   : > { %813 = vperm.xlu1 %8173, %v735_v47   ;;  %7426 = vmatpush3.msra.mxu0 %v1410_v61 }
  0x44   : > { %808 = vperm.xlu0 %8172, %v734_v48   ;;  %7408 = vmatmul.mubr.msk.f32.gmra.mxu1 %vm1063_vm1, %v685_v50 }
  0x45   : > { %7410 = vmatprep.mubr.msk.f32.mxu1 %vm1063_vm1, %v686_v52  ;;  %7381 = vmatmul.mubr.msk.f32.gmra.mxu0 %vm869_vm0, %v703_v54 }
  0x46   : > { %7427 = vmatprep.subr.mxu0 %v1409_v62 }
  0x47   : > { %7428 = vmatpush3.msra.mxu0 %v1409_v62 }
  0x48   : > { %7411 = vmatmul.mubr.msk.f32.gmra.mxu1 %vm1063_vm1, %v687_v55 }
  0xa2   : > { %v749_v0 = vpop.permute.xlu1 %748 }
  0xa3   : > { %v739_v2 = vpop.permute.xlu0 %738  ;;  %v818_v5 = vmul.f32 %v749_v0, %v706_v1 }
  0xa4   : > { %v816_v3 = vmul.f32 %v739_v2, %v704_v63  ;;  %v8896_v2 = vld [vmem:[%s11432_s7] ss:$0 sm:$0xff] }
  0xa6   : > { %1344 = vrot.lane.b32.xlu0 %v816_v3, %s11501_s28  ;;  %v754_v6 = vpop.permute.xlu1 %753 }
  0xa7   : > { %v744_v7 = vpop.permute.xlu0 %743  ;;  %v819_v13 = vmul.f32 %v754_v6, %v707_v9 }
  0xa8   : > { %v817_v8 = vmul.f32 %v744_v7, %v705_v4 }
  0xaa   : > { %1346 = vrot.lane.b32.xlu1 %v817_v8, %s11501_s28  ;;  %1348 = vrot.lane.b32.xlu0 %v818_v5, %s11501_s28  ;;  %v764_v11 = vpop.permute.xlu1 %763 }
  0xab   : > { %v759_v12 = vpop.permute.xlu0 %758  ;;  %v821_v19 = vmul.f32 %v764_v11, %v709_v15 }
  0xac   : > { %v820_v14 = vmul.f32 %v759_v12, %v708_v10 }
  0xae   : > { %1350 = vrot.lane.b32.xlu1 %v819_v13, %s11501_s28  ;;  %1352 = vrot.lane.b32.xlu0 %v820_v14, %s11501_s28  ;;  %v774_v17 = vpop.permute.xlu1 %773 }
  0xaf   : > { %v769_v18 = vpop.permute.xlu0 %768  ;;  %v823_v25 = vmul.f32 %v774_v17, %v711_v21 }
  0xb0   : > { %v822_v20 = vmul.f32 %v769_v18, %v710_v16 }
  0xb2   : > { %1354 = vrot.lane.b32.xlu1 %v821_v19, %s11501_s28  ;;  %1356 = vrot.lane.b32.xlu0 %v822_v20, %s11501_s28  ;;  %v784_v23 = vpop.permute.xlu1 %783 }
  0xb3   : > { %v779_v24 = vpop.permute.xlu0 %778  ;;  %v825_v31 = vmul.f32 %v784_v23, %v713_v27 }
  0xb4   : > { %v824_v26 = vmul.f32 %v779_v24, %v712_v22 }
  0xb6   : > { %1358 = vrot.lane.b32.xlu1 %v823_v25, %s11501_s28  ;;  %1360 = vrot.lane.b32.xlu0 %v824_v26, %s11501_s28  ;;  %v794_v29 = vpop.permute.xlu1 %793 }
  0xb7   : > { %v789_v30 = vpop.permute.xlu0 %788  ;;  %v827_v37 = vmul.f32 %v794_v29, %v715_v33 }
  0xb8   : > { %v826_v32 = vmul.f32 %v789_v30, %v714_v28 }
  0xba   : > { %1362 = vrot.lane.b32.xlu1 %v825_v31, %s11501_s28  ;;  %1364 = vrot.lane.b32.xlu0 %v826_v32, %s11501_s28  ;;  %v804_v35 = vpop.permute.xlu1 %803 }
  0xbb   : > { %v799_v36 = vpop.permute.xlu0 %798  ;;  %v829_v42 = vmul.f32 %v804_v35, %v717_v39 }
  0xbc   : > { %v828_v38 = vmul.f32 %v799_v36, %v716_v34 }
  0xbe   : > { %1366 = vrot.lane.b32.xlu1 %v827_v37, %s11501_s28  ;;  %1368 = vrot.lane.b32.xlu0 %v828_v38, %s11501_s28  ;;  %v814_v44 = vpop.permute.xlu1 %813 }
  0xbf   : > { %v809_v41 = vpop.permute.xlu0 %808  ;;  %v831_v46 = vmul.f32 %v814_v44, %v719_v45 }
  0xc0   : > { %v830_v43 = vmul.f32 %v809_v41, %v718_v40 }
  0xc2   : > { %1370 = vrot.lane.b32.xlu1 %v829_v42, %s11501_s28  ;;  %1372 = vrot.lane.b32.xlu0 %v830_v43, %s11501_s28 }
  0xc6   : > { %1374 = vrot.lane.b32.xlu1 %v831_v46, %s11501_s28 }
  0xe9   : > { %v7361_v47 = vpop.f32.mrf.mxu0 }
  0xeb   : > { %v984_v49 = vpop.f32.mrf.mxu0 }
  0xec   : > { %v7391_v48 = vpop.f32.mrf.mxu1 }
  0xed   : > { %v7364_v51 = vpop.f32.mrf.mxu0  ;;  %v1184_v9 = vadd.f32 %v7391_v48, %v7361_v47 }
  0xee   : > { %v1178_v50 = vpop.f32.mrf.mxu1 }
  0xef   : > { %v994_v53 = vpop.f32.mrf.mxu0  ;;  %v1179_v1 = vadd.f32 %v1178_v50, %v984_v49  ;;  %v1265_v15 = vadd.f32 %v8896_v2, %v1184_v9 }
  0xf0   : > { %v7394_v52 = vpop.f32.mrf.mxu1 }
  0xf1   : > { %v7367_v55 = vpop.f32.mrf.mxu0  ;;  %v1264_v5 = vadd.f32 %v8896_v2, %v1179_v1  ;;  %v1194_v16 = vadd.f32 %v7394_v52, %v7364_v51  ;;  %v1297_v23 = vmul.f32 0.01, %v1265_v15  ;;  %vm1281_vm6 = vcmp.ge.f32.partialorder %v1265_v15, 0.0 }
  0xf2   : > { %v1188_v54 = vpop.f32.mrf.mxu1 }
  0xf3   : > { %v1004_v57 = vpop.f32.mrf.mxu0  ;;  %v1189_v6 = vadd.f32 %v1188_v54, %v994_v53  ;;  %v1296_v10 = vmul.f32 0.01, %v1264_v5  ;;  %vm1280_vm2 = vcmp.ge.f32.partialorder %v1264_v5, 0.0  ;;  %v1267_v24 = vadd.f32 %v8896_v2, %v1194_v16 }
  0xf4   : > { %v7397_v56 = vpop.f32.mrf.mxu1  ;;  %v1313_v38 = vsel %vm1281_vm6, %v1265_v15, %v1297_v23 }
  0xf5   : > { %v7370_v59 = vpop.f32.mrf.mxu0  ;;  %v1266_v11 = vadd.f32 %v8896_v2, %v1189_v6  ;;  %v1312_v19 = vsel %vm1280_vm2, %v1264_v5, %v1296_v10  ;;  %v1204_v25 = vadd.f32 %v7397_v56, %v7367_v55  ;;  %v1299_v34 = vmul.f32 0.01, %v1267_v24 }
  0xf6   : > { %v1198_v58 = vpop.f32.mrf.mxu1  ;;  %vm1283_vm8 = vcmp.ge.f32.partialorder %v1267_v24, 0.0 }
  0xf7   : > { %v1014_v61 = vpop.f32.mrf.mxu0  ;;  %v1199_v12 = vadd.f32 %v1198_v58, %v1004_v57  ;;  %v1298_v17 = vmul.f32 0.01, %v1266_v11  ;;  %vm1282_vm5 = vcmp.ge.f32.partialorder %v1266_v11, 0.0  ;;  %v1269_v35 = vadd.f32 %v8896_v2, %v1204_v25 }
  0xf8   : > { %v7400_v60 = vpop.f32.mrf.mxu1  ;;  %v1315_v53 = vsel %vm1283_vm8, %v1267_v24, %v1299_v34 }
  0xf9   : > { %v7373_v63 = vpop.f32.mrf.mxu0  ;;  %v1268_v18 = vadd.f32 %v8896_v2, %v1199_v12  ;;  %v1314_v30 = vsel %vm1282_vm5, %v1266_v11, %v1298_v17  ;;  %v1214_v36 = vadd.f32 %v7400_v60, %v7370_v59  ;;  %v1301_v48 = vmul.f32 0.01, %v1269_v35 }
  0xfa   : > { %v1208_v62 = vpop.f32.mrf.mxu1  ;;  %vm1285_vm10 = vcmp.ge.f32.partialorder %v1269_v35, 0.0 }
  0xfb   : > { %v1024_v3 = vpop.f32.mrf.mxu0  ;;  %v1209_v20 = vadd.f32 %v1208_v62, %v1014_v61  ;;  %v1300_v28 = vmul.f32 0.01, %v1268_v18  ;;  %vm1284_vm7 = vcmp.ge.f32.partialorder %v1268_v18, 0.0  ;;  %v1271_v49 = vadd.f32 %v8896_v2, %v1214_v36 }
  0xfc   : > { %v7403_v0 = vpop.f32.mrf.mxu1 }
  0xfd   : > { %v8899_v7 = vpop.f32.mrf.mxu0  ;;  %v1270_v29 = vadd.f32 %v8896_v2, %v1209_v20  ;;  %v1316_v44 = vsel %vm1284_vm7, %v1268_v18, %v1300_v28  ;;  %v1224_v50 = vadd.f32 %v7403_v0, %v7373_v63  ;;  %v1303_v62 = vmul.f32 0.01, %v1271_v49 }
  0xfe   : > { %v1218_v4 = vpop.f32.mrf.mxu1  ;;  %vm1287_vm12 = vcmp.ge.f32.partialorder %v1271_v49, 0.0 }
  0xff   : > { %v1034_v13 = vpop.f32.mrf.mxu0  ;;  %v1219_v31 = vadd.f32 %v1218_v4, %v1024_v3  ;;  %v1302_v42 = vmul.f32 0.01, %v1270_v29  ;;  %vm1286_vm9 = vcmp.ge.f32.partialorder %v1270_v29, 0.0  ;;  %v1273_v63 = vadd.f32 %v8896_v2, %v1224_v50 }
 0x100   : > { %v8901_v8 = vpop.f32.mrf.mxu1  ;;  %v1317_v4 = vsel %vm1285_vm10, %v1269_v35, %v1301_v48  ;;  %v1319_v16 = vsel %vm1287_vm12, %v1271_v49, %v1303_v62 }
 0x101   : > { %v8906_v21 = vpop.f32.mrf.mxu0  ;;  %v1272_v43 = vadd.f32 %v8896_v2, %v1219_v31  ;;  %v1318_v58 = vsel %vm1286_vm9, %v1270_v29, %v1302_v42  ;;  %v1234_v0 = vadd.f32 %v8901_v8, %v8899_v7  ;;  %v1305_v8 = vmul.f32 0.01, %v1273_v63 }
 0x102   : > { %v1228_v14 = vpop.f32.mrf.mxu1  ;;  %vm1289_vm14 = vcmp.ge.f32.partialorder %v1273_v63, 0.0 }
 0x103   : > { %v1044_v32 = vpop.f32.mrf.mxu0  ;;  %v1229_v45 = vadd.f32 %v1228_v14, %v1034_v13  ;;  %v1304_v56 = vmul.f32 0.01, %v1272_v43  ;;  %vm1288_vm11 = vcmp.ge.f32.partialorder %v1272_v43, 0.0  ;;  %v1275_v12 = vadd.f32 %v8896_v2, %v1234_v0 }
 0x104   : > { %v8908_v22 = vpop.f32.mrf.mxu1  ;;  %v1321_v28 = vsel %vm1289_vm14, %v1273_v63, %v1305_v8 }
 0x105   : > { %v7382_v46 = vpop.f32.mrf.mxu0  ;;  %v1274_v57 = vadd.f32 %v8896_v2, %v1229_v45  ;;  %v1320_v11 = vsel %vm1288_vm11, %v1272_v43, %v1304_v56  ;;  %v1244_v13 = vadd.f32 %v8908_v22, %v8906_v21  ;;  %v1307_v21 = vmul.f32 0.01, %v1275_v12 }
 0x106   : > { %v1238_v33 = vpop.f32.mrf.mxu1  ;;  %vm1291_vm1 = vcmp.ge.f32.partialorder %v1275_v12, 0.0 }
 0x107   : > { %v1239_v59 = vadd.f32 %v1238_v33, %v1044_v32  ;;  %v1054_v60 = vpop.f32.mrf.mxu0  ;;  %v1306_v9 = vmul.f32 0.01, %v1274_v57  ;;  %vm1290_vm13 = vcmp.ge.f32.partialorder %v1274_v57, 0.0  ;;  %v1277_v22 = vadd.f32 %v8896_v2, %v1244_v13 }
 0x108   : > { %v7412_v47 = vpop.f32.mrf.mxu1 }
 0x109   : > { %v1276_v10 = vadd.f32 %v8896_v2, %v1239_v59  ;;  %v1322_v23 = vsel %vm1290_vm13, %v1274_v57, %v1306_v9  ;;  %v1254_v24 = vadd.f32 %v7412_v47, %v7382_v46  ;;  %v1309_v33 = vmul.f32 0.01, %v1277_v22 }
 0x10a   : > { %v1248_v61 = vpop.f32.mrf.mxu1  ;;  %vm1293_vm5 = vcmp.ge.f32.partialorder %v1277_v22, 0.0 }
 0x10b   : > { %v1249_v7 = vadd.f32 %v1248_v61, %v1054_v60  ;;  %vm1292_vm15 = vcmp.ge.f32.partialorder %v1276_v10, 0.0  ;;  %v1279_v34 = vadd.f32 %v8896_v2, %v1254_v24  ;;  %v1325_v45 = vsel %vm1293_vm5, %v1277_v22, %v1309_v33 }
 0x10d   : > { %v1278_v20 = vadd.f32 %v8896_v2, %v1249_v7  ;;  %v1311_v43 = vmul.f32 0.01, %v1279_v34  ;;  %vm1295_vm6 = vcmp.ge.f32.partialorder %v1279_v34, 0.0 }
 0x10f   : > { %v1310_v31 = vmul.f32 0.01, %v1278_v20  ;;  %vm1294_vm2 = vcmp.ge.f32.partialorder %v1278_v20, 0.0  ;;  %v1327_v49 = vsel %vm1295_vm6, %v1279_v34, %v1311_v43 }
 0x111   : > { %v1326_v42 = vsel %vm1294_vm2, %v1278_v20, %v1310_v31 }
 0x118   : > { %v8911_v26 = vpop.permute.xlu0 %1344 }
 0x119   : > { %v1393_v27 = vsel %vm1392_vm3, %v1312_v19, %v8911_v26  ;;  %v1308_v19 = vmul.f32 0.01, %v1276_v10 }
 0x11a   : > { %7429 = vmatprep.mubr.msk.f32.mxu0 %vm1424_vm4, %v1393_v27 }
 0x11b   : > { %v1324_v32 = vsel %vm1292_vm15, %v1276_v10, %v1308_v19 }
 0x11c   : > { %v8918_v37 = vpop.permute.xlu1 %1346  ;;  %v8920_v39 = vpop.permute.xlu0 %1348 }
 0x11d   : > { %v1394_v40 = vsel %vm1392_vm3, %v1313_v38, %v8918_v37  ;;  %v1395_v41 = vsel %vm1392_vm3, %v1314_v30, %v8920_v39  ;;  %v1323_v38 = vsel %vm1291_vm1, %v1275_v12, %v1307_v21 }
 0x11e   : > { %7430 = vmatmul.mubr.msk.f32.vlgmr.msra.gmra.mxu0 %vm1424_vm4, %v1394_v40 }
 0x11f   : > { %7432 = vmatprep.mubr.msk.f32.mxu0 %vm1424_vm4, %v1395_v41 }
 0x120   : > { %v8930_v51 = vpop.permute.xlu1 %1350  ;;  %v8932_v52 = vpop.permute.xlu0 %1352 }
 0x121   : > { %v1396_v54 = vsel %vm1392_vm3, %v1315_v53, %v8930_v51  ;;  %v1397_v55 = vsel %vm1392_vm3, %v1316_v44, %v8932_v52  ;;  %v6609_v53 = vld [vmem:[%s11434_s9] ss:$0 sm:$0xff] }
 0x122   : > { %7433 = vmatmul.mubr.msk.f32.gmra.mxu0 %vm1424_vm4, %v1396_v54 }
 0x123   : > { %7435 = vmatprep.mubr.msk.f32.mxu0 %vm1424_vm4, %v1397_v55 }
 0x124   : > { %v8945_v1 = vpop.permute.xlu1 %1354  ;;  %v8947_v3 = vpop.permute.xlu0 %1356 }
 0x125   : > { %v1398_v5 = vsel %vm1392_vm3, %v1317_v4, %v8945_v1  ;;  %v1399_v6 = vsel %vm1392_vm3, %v1318_v58, %v8947_v3 }
 0x126   : > { %7436 = vmatmul.mubr.msk.f32.gmra.mxu0 %vm1424_vm4, %v1398_v5 }
 0x127   : > { %7438 = vmatprep.mubr.msk.f32.mxu0 %vm1424_vm4, %v1399_v6 }
 0x128   : > { %v8960_v14 = vpop.permute.xlu1 %1358  ;;  %v8962_v15 = vpop.permute.xlu0 %1360 }
 0x129   : > { %v1400_v17 = vsel %vm1392_vm3, %v1319_v16, %v8960_v14  ;;  %v1401_v18 = vsel %vm1392_vm3, %v1320_v11, %v8962_v15 }
 0x12a   : > { %7439 = vmatmul.mubr.msk.f32.gmra.mxu0 %vm1424_vm4, %v1400_v17 }
 0x12b   : > { %7441 = vmatprep.mubr.msk.f32.mxu0 %vm1424_vm4, %v1401_v18 }
 0x12c   : > { %v8972_v25 = vpop.permute.xlu1 %1362  ;;  %v8974_v27 = vpop.permute.xlu0 %1364 }
 0x12d   : > { %v1402_v29 = vsel %vm1392_vm3, %v1321_v28, %v8972_v25  ;;  %v1403_v30 = vsel %vm1392_vm3, %v1322_v23, %v8974_v27 }
 0x12e   : > { %7442 = vmatmul.mubr.msk.f32.gmra.mxu0 %vm1424_vm4, %v1402_v29 }
 0x12f   : > { %7444 = vmatprep.mubr.msk.f32.mxu0 %vm1424_vm4, %v1403_v30 }
 0x130   : > { %v8983_v35 = vpop.permute.xlu1 %1366  ;;  %v8985_v36 = vpop.permute.xlu0 %1368 }
 0x131   : > { %v1404_v40 = vsel %vm1392_vm3, %v1323_v38, %v8983_v35  ;;  %v1405_v41 = vsel %vm1392_vm3, %v1324_v32, %v8985_v36 }
 0x132   : > { %7445 = vmatmul.mubr.msk.f32.gmra.mxu0 %vm1424_vm4, %v1404_v40 }
 0x133   : > { %7447 = vmatprep.mubr.msk.f32.mxu0 %vm1424_vm4, %v1405_v41 }
 0x134   : > { %v8993_v44 = vpop.permute.xlu1 %1370  ;;  %v8995_v2 = vpop.permute.xlu0 %1372 }
 0x135   : > { %v1406_v46 = vsel %vm1392_vm3, %v1325_v45, %v8993_v44  ;;  %v1407_v47 = vsel %vm1392_vm3, %v1326_v42, %v8995_v2 }
 0x136   : > { %7448 = vmatmul.mubr.msk.f32.gmra.mxu0 %vm1424_vm4, %v1406_v46 }
 0x137   : > { %7450 = vmatprep.mubr.msk.f32.mxu0 %vm1424_vm4, %v1407_v47 }
 0x138   : > { %v9003_v48 = vpop.permute.xlu1 %1374 }
 0x139   : > { %v1408_v50 = vsel %vm1392_vm3, %v1327_v49, %v9003_v48 }
 0x13a   : > { %7451 = vmatmul.mubr.msk.f32.gmra.mxu0 %vm1424_vm4, %v1408_v50 }
 0x1de   : > { %v7431_v54 = vpop.f32.mrf.mxu0 }
 0x1df   : > { %v9011_v55 = vadd.f32 %v7431_v54, %v6609_v53 }
 0x1e0   : > { %v1539_v56 = vpop.f32.mrf.mxu0 }
 0x1e1   : > { %v9013_v57 = vadd.f32 %v6609_v53, %v1539_v56  ;;  %1732 = vrot.lane.b32.xlu1 %v9011_v55, %s11501_s28  ;;  %v6627_v30 = vmul.f32 -1.442695, %v9011_v55 }
 0x1e2   : > { %v7434_v58 = vpop.f32.mrf.mxu0 }
 0x1e3   : > { %v9017_v59 = vadd.f32 %v7434_v58, %v6609_v53  ;;  %1730 = vrot.lane.b32.xlu0 %v9013_v57, %s11501_s28  ;;  %v6626_v31 = vmul.f32 -1.442695, %v9013_v57  ;;  %8174 = vpow2.f32 %v6627_v30 }
 0x1e4   : > { %v1549_v60 = vpop.f32.mrf.mxu0 }
 0x1e5   : > { %v9021_v61 = vadd.f32 %v6609_v53, %v1549_v60  ;;  %1736 = vrot.lane.b32.xlu1 %v9017_v59, %s11501_s28  ;;  %v6629_v32 = vmul.f32 -1.442695, %v9017_v59  ;;  %8176 = vpow2.f32 %v6626_v31 }
 0x1e6   : > { %v7437_v62 = vpop.f32.mrf.mxu0 }
 0x1e7   : > { %v9025_v63 = vadd.f32 %v7437_v62, %v6609_v53  ;;  %1734 = vrot.lane.b32.xlu0 %v9021_v61, %s11501_s28  ;;  %v6628_v33 = vmul.f32 -1.442695, %v9021_v61  ;;  %8178 = vpow2.f32 %v6629_v32 }
 0x1e8   : > { %v1559_v0 = vpop.f32.mrf.mxu0 }
 0x1e9   : > { %v9029_v4 = vadd.f32 %v6609_v53, %v1559_v0  ;;  %1740 = vrot.lane.b32.xlu1 %v9025_v63, %s11501_s28  ;;  %v6631_v34 = vmul.f32 -1.442695, %v9025_v63  ;;  %8180 = vpow2.f32 %v6628_v33 }
 0x1ea   : > { %v7440_v5 = vpop.f32.mrf.mxu0 }
 0x1eb   : > { %v9033_v6 = vadd.f32 %v7440_v5, %v6609_v53  ;;  %1738 = vrot.lane.b32.xlu0 %v9029_v4, %s11501_s28  ;;  %v6630_v38 = vmul.f32 -1.442695, %v9029_v4  ;;  %8182 = vpow2.f32 %v6631_v34 }
 0x1ec   : > { %v1569_v9 = vpop.f32.mrf.mxu0 }
 0x1ed   : > { %v9037_v10 = vadd.f32 %v6609_v53, %v1569_v9  ;;  %1744 = vrot.lane.b32.xlu1 %v9033_v6, %s11501_s28  ;;  %v6633_v40 = vmul.f32 -1.442695, %v9033_v6  ;;  %8184 = vpow2.f32 %v6630_v38 }
 0x1ee   : > { %v7443_v11 = vpop.f32.mrf.mxu0 }
 0x1ef   : > { %v9041_v7 = vadd.f32 %v7443_v11, %v6609_v53  ;;  %1742 = vrot.lane.b32.xlu0 %v9037_v10, %s11501_s28  ;;  %v6632_v41 = vmul.f32 -1.442695, %v9037_v10  ;;  %8186 = vpow2.f32 %v6633_v40 }
 0x1f0   : > { %v1579_v8 = vpop.f32.mrf.mxu0  ;;  %v8175_v42 = vpop.eup %8174 }
 0x1f1   : > { %v9045_v12 = vadd.f32 %v6609_v53, %v1579_v8  ;;  %1748 = vrot.lane.b32.xlu1 %v9041_v7, %s11501_s28  ;;  %v6635_v43 = vmul.f32 -1.442695, %v9041_v7  ;;  %8188 = vpow2.f32 %v6632_v41  ;;  %v1667_v47 = vadd.f32 1.0, %v8175_v42 }
 0x1f2   : > { %v7446_v13 = vpop.f32.mrf.mxu0  ;;  %v8177_v45 = vpop.eup %8176 }
 0x1f3   : > { %v9049_v16 = vadd.f32 %v7446_v13, %v6609_v53  ;;  %1746 = vrot.lane.b32.xlu0 %v9045_v12, %s11501_s28  ;;  %v6634_v46 = vmul.f32 -1.442695, %v9045_v12  ;;  %8190 = vpow2.f32 %v6635_v43 }
 0x1f4   : > { %v1589_v17 = vpop.f32.mrf.mxu0  ;;  %v8179_v49 = vpop.eup %8178 }
 0x1f5   : > { %v9053_v18 = vadd.f32 %v6609_v53, %v1589_v17  ;;  %1752 = vrot.lane.b32.xlu1 %v9049_v16, %s11501_s28  ;;  %v6637_v50 = vmul.f32 -1.442695, %v9049_v16  ;;  %8192 = vpow2.f32 %v6634_v46  ;;  %v1669_v58 = vadd.f32 1.0, %v8179_v49 }
 0x1f6   : > { %v7449_v19 = vpop.f32.mrf.mxu0  ;;  %v8181_v54 = vpop.eup %8180  ;;  %8194 = vrcp.f32 %v1667_v47 }
 0x1f7   : > { %v9057_v20 = vadd.f32 %v7449_v19, %v6609_v53  ;;  %1750 = vrot.lane.b32.xlu0 %v9053_v18, %s11501_s28  ;;  %v6636_v56 = vmul.f32 -1.442695, %v9053_v18  ;;  %8196 = vpow2.f32 %v6637_v50  ;;  %v1668_v0 = vadd.f32 1.0, %v8181_v54 }
 0x1f8   : > { %v1599_v23 = vpop.f32.mrf.mxu0  ;;  %v8183_v60 = vpop.eup %8182 }
 0x1f9   : > { %v9061_v21 = vadd.f32 %v6609_v53, %v1599_v23  ;;  %1756 = vrot.lane.b32.xlu1 %v9057_v20, %s11501_s28  ;;  %v6639_v62 = vmul.f32 -1.442695, %v9057_v20  ;;  %v1671_v11 = vadd.f32 1.0, %v8183_v60 }
 0x1fa   : > { %v7452_v22 = vpop.f32.mrf.mxu0  ;;  %v8185_v5 = vpop.eup %8184 }
 0x1fb   : > { %v9065_v24 = vadd.f32 %v7452_v22, %v6609_v53  ;;  %1754 = vrot.lane.b32.xlu0 %v9061_v21, %s11501_s28  ;;  %v6638_v9 = vmul.f32 -1.442695, %v9061_v21  ;;  %v1670_v17 = vadd.f32 1.0, %v8185_v5 }
 0x1fc   : > { %v1609_v28 = vpop.f32.mrf.mxu0  ;;  %v8187_v13 = vpop.eup %8186 }
 0x1fd   : > { %v9069_v29 = vadd.f32 %v6609_v53, %v1609_v28  ;;  %1760 = vrot.lane.b32.xlu1 %v9065_v24, %s11501_s28  ;;  %v1666_v53 = vadd.f32 1.0, %v8177_v45  ;;  %v6641_v8 = vmul.f32 -1.442695, %v9065_v24  ;;  %v1673_v22 = vadd.f32 1.0, %v8187_v13 }
 0x1fe   : > { %v8189_v23 = vpop.eup %8188 }
 0x1ff   : > { %1758 = vrot.lane.b32.xlu0 %v9069_v29, %s11501_s28  ;;  %8198 = vrcp.f32 %v1666_v53  ;;  %v6640_v19 = vmul.f32 -1.442695, %v9069_v29  ;;  %v1672_v30 = vadd.f32 1.0, %v8189_v23 }
 0x200   : > { %8200 = vpow2.f32 %v6636_v56  ;;  %v8191_v28 = vpop.eup %8190 }
 0x201   : > { %8202 = vrcp.f32 %v1669_v58  ;;  %v1675_v33 = vadd.f32 1.0, %v8191_v28 }
 0x202   : > { %8204 = vpow2.f32 %v6639_v62  ;;  %v8193_v31 = vpop.eup %8192 }
 0x203   : > { %8206 = vrcp.f32 %v1668_v0  ;;  %v9091_v32 = vpop.eup %8194  ;;  %v1674_v41 = vadd.f32 1.0, %v8193_v31 }
 0x204   : > { %8208 = vpow2.f32 %v6638_v9  ;;  %v8197_v34 = vpop.eup %8196 }
 0x205   : > { %8210 = vrcp.f32 %v1671_v11  ;;  %v1677_v47 = vadd.f32 1.0, %v8197_v34 }
 0x206   : > { %8212 = vpow2.f32 %v6641_v8 }
 0x207   : > { %8214 = vrcp.f32 %v1670_v17 }
 0x208   : > { %8216 = vpow2.f32 %v6640_v19 }
 0x209   : > { %8218 = vrcp.f32 %v1673_v22 }
 0x20a   : > { %8220 = vrcp.f32 %v1672_v30 }
 0x20b   : > { %8222 = vrcp.f32 %v1675_v33 }
 0x20c   : > { %v9093_v40 = vpop.eup %8198  ;;  %8224 = vrcp.f32 %v1674_v41 }
 0x20d   : > { %v8201_v43 = vpop.eup %8200  ;;  %8226 = vrcp.f32 %v1677_v47 }
 0x20e   : > { %v9096_v46 = vpop.eup %8202  ;;  %v1676_v56 = vadd.f32 1.0, %v8201_v43 }
 0x20f   : > { %v8205_v50 = vpop.eup %8204 }
 0x210   : > { %v9100_v54 = vpop.eup %8206  ;;  %v1679_v5 = vadd.f32 1.0, %v8205_v50  ;;  %8228 = vrcp.f32 %v1676_v56 }
 0x211   : > { %v8209_v60 = vpop.eup %8208 }
 0x212   : > { %v9104_v0 = vpop.eup %8210  ;;  %v1678_v17 = vadd.f32 1.0, %v8209_v60  ;;  %8230 = vrcp.f32 %v1679_v5 }
 0x213   : > { %v8213_v11 = vpop.eup %8212 }
 0x214   : > { %v9108_v13 = vpop.eup %8214  ;;  %v1681_v28 = vadd.f32 1.0, %v8213_v11  ;;  %8232 = vrcp.f32 %v1678_v17 }
 0x215   : > { %v8217_v23 = vpop.eup %8216 }
 0x216   : > { %v9114_v31 = vpop.eup %8218  ;;  %v1680_v34 = vadd.f32 1.0, %v8217_v23  ;;  %8234 = vrcp.f32 %v1681_v28 }
 0x217   : > { %v9118_v41 = vpop.eup %8220 }
 0x218   : > { %8236 = vrcp.f32 %v1680_v34 }
 0x253   : > { %v1733_v38 = vpop.permute.xlu1 %1732 }
 0x254   : > { %v1779_v42 = vmul.f32 %v9091_v32, %v1733_v38 }
 0x255   : > { %v1731_v45 = vpop.permute.xlu0 %1730 }
 0x256   : > { %v1778_v49 = vmul.f32 %v9093_v40, %v1731_v45  ;;  %1812 = vrot.lane.b32.xlu1 %v1779_v42, %s8557_s1  ;;  %v9122_v45 = vpop.eup %8222 }
 0x257   : > { %v1737_v53 = vpop.permute.xlu1 %1736  ;;  %v9126_v50 = vpop.eup %8224 }
 0x258   : > { %v1781_v58 = vmul.f32 %v9096_v46, %v1737_v53  ;;  %1810 = vrot.lane.b32.xlu0 %v1778_v49, %s8557_s1 }
 0x259   : > { %v1735_v62 = vpop.permute.xlu0 %1734 }
 0x25a   : > { %v1780_v9 = vmul.f32 %v9100_v54, %v1735_v62  ;;  %1816 = vrot.lane.b32.xlu1 %v1781_v58, %s8557_s1  ;;  %v9130_v58 = vpop.eup %8226 }
 0x25b   : > { %v1741_v8 = vpop.permute.xlu1 %1740  ;;  %v9134_v5 = vpop.eup %8228 }
 0x25c   : > { %v1783_v19 = vmul.f32 %v9104_v0, %v1741_v8  ;;  %1814 = vrot.lane.b32.xlu0 %v1780_v9, %s8557_s1  ;;  %v9138_v8 = vpop.eup %8230 }
 0x25d   : > { %v1739_v22 = vpop.permute.xlu0 %1738  ;;  %v9142_v23 = vpop.eup %8232 }
 0x25e   : > { %v1782_v30 = vmul.f32 %v9108_v13, %v1739_v22  ;;  %1820 = vrot.lane.b32.xlu1 %v1783_v19, %s8557_s1 }
 0x25f   : > { %v1745_v33 = vpop.permute.xlu1 %1744 }
 0x260   : > { %v1785_v38 = vmul.f32 %v9114_v31, %v1745_v33  ;;  %1818 = vrot.lane.b32.xlu0 %v1782_v30, %s8557_s1  ;;  %v9146_v30 = vpop.eup %8234 }
 0x261   : > { %v1743_v42 = vpop.permute.xlu0 %1742 }
 0x262   : > { %v1784_v43 = vmul.f32 %v9118_v41, %v1743_v42  ;;  %1824 = vrot.lane.b32.xlu1 %v1785_v38, %s8557_s1  ;;  %v9150_v38 = vpop.eup %8236 }
 0x263   : > { %v1749_v47 = vpop.permute.xlu1 %1748 }
 0x264   : > { %v1787_v49 = vmul.f32 %v9122_v45, %v1749_v47  ;;  %1822 = vrot.lane.b32.xlu0 %v1784_v43, %s8557_s1 }
 0x265   : > { %v1747_v53 = vpop.permute.xlu0 %1746 }
 0x266   : > { %v1786_v56 = vmul.f32 %v9126_v50, %v1747_v53  ;;  %1828 = vrot.lane.b32.xlu1 %v1787_v49, %s8557_s1 }
 0x267   : > { %v1753_v60 = vpop.permute.xlu1 %1752 }
 0x268   : > { %v1789_v62 = vmul.f32 %v9130_v58, %v1753_v60  ;;  %1826 = vrot.lane.b32.xlu0 %v1786_v56, %s8557_s1 }
 0x269   : > { %v1751_v9 = vpop.permute.xlu0 %1750 }
 0x26a   : > { %v1788_v11 = vmul.f32 %v9134_v5, %v1751_v9  ;;  %1832 = vrot.lane.b32.xlu1 %v1789_v62, %s8557_s1 }
 0x26b   : > { %v1757_v17 = vpop.permute.xlu1 %1756 }
 0x26c   : > { %v1791_v19 = vmul.f32 %v9138_v8, %v1757_v17  ;;  %1830 = vrot.lane.b32.xlu0 %v1788_v11, %s8557_s1 }
 0x26d   : > { %v1755_v22 = vpop.permute.xlu0 %1754 }
 0x26e   : > { %v1790_v28 = vmul.f32 %v9142_v23, %v1755_v22  ;;  %1836 = vrot.lane.b32.xlu1 %v1791_v19, %s8557_s1 }
 0x26f   : > { %v1761_v33 = vpop.permute.xlu1 %1760 }
 0x270   : > { %v1793_v34 = vmul.f32 %v9146_v30, %v1761_v33  ;;  %1834 = vrot.lane.b32.xlu0 %v1790_v28, %s8557_s1 }
 0x271   : > { %v1759_v42 = vpop.permute.xlu0 %1758 }
 0x272   : > { %v1792_v43 = vmul.f32 %v9150_v38, %v1759_v42  ;;  %1840 = vrot.lane.b32.xlu1 %v1793_v34, %s8557_s1 }
 0x274   : > { %1838 = vrot.lane.b32.xlu0 %v1792_v43, %s8557_s1  ;;  %s8562_s1 = smov [#allocation3]  }
 0x2c8   : > { %v1813_v47 = vpop.permute.xlu1 %1812 }
 0x2c9   : > { %v1859_v49 = vadd.f32 %v1813_v47, %v9011_v55 }
 0x2ca   : > { %v1811_v53 = vpop.permute.xlu0 %1810 }
 0x2cb   : > { %8238 = vtanh.f32 %v1859_v49  ;;  %v1858_v56 = vadd.f32 %v1811_v53, %v9013_v57 }
 0x2cc   : > { %v1817_v60 = vpop.permute.xlu1 %1816 }
 0x2cd   : > { %8240 = vtanh.f32 %v1858_v56  ;;  %v1861_v62 = vadd.f32 %v1817_v60, %v9017_v59 }
 0x2ce   : > { %v1815_v9 = vpop.permute.xlu0 %1814 }
 0x2cf   : > { %8242 = vtanh.f32 %v1861_v62  ;;  %v1860_v11 = vadd.f32 %v1815_v9, %v9021_v61 }
 0x2d0   : > { %v1821_v17 = vpop.permute.xlu1 %1820 }
 0x2d1   : > { %8244 = vtanh.f32 %v1860_v11  ;;  %v1863_v19 = vadd.f32 %v1821_v17, %v9025_v63 }
 0x2d2   : > { %v1819_v22 = vpop.permute.xlu0 %1818 }
 0x2d3   : > { %8246 = vtanh.f32 %v1863_v19  ;;  %v1862_v55 = vadd.f32 %v1819_v22, %v9029_v4 }
 0x2d4   : > { %v1825_v28 = vpop.permute.xlu1 %1824 }
 0x2d5   : > { %8248 = vtanh.f32 %v1862_v55  ;;  %v1865_v57 = vadd.f32 %v1825_v28, %v9033_v6 }
 0x2d6   : > { %v1823_v33 = vpop.permute.xlu0 %1822 }
 0x2d7   : > { %8250 = vtanh.f32 %v1865_v57  ;;  %v1864_v59 = vadd.f32 %v1823_v33, %v9037_v10  ;;  %v2021_v57 = vld [vmem:[%s11435_s10 + $0x18] sm:$0xff] }
 0x2d8   : > { %v8239_v34 = vpop.eup %8238  ;;  %v1829_v42 = vpop.permute.xlu1 %1828  ;;  %7453 = vmatprep.subr.mxu1 %v2021_v57 }
 0x2d9   : > { %8252 = vtanh.f32 %v1864_v59  ;;  %v1867_v61 = vadd.f32 %v1829_v42, %v9041_v7  ;;  %1924 = vrot.lane.b32.xlu1 %v8239_v34, %s8558_s3  ;;  %7454 = vmatpush3.msra.mxu1 %v2021_v57  ;;  %v2019_v59 = vld [vmem:[%s11435_s10 + $0x8] sm:$0xff]  ;;  %v2018_v42 = vld [vmem:[%s11435_s10] sm:$0xff]  ;;  %v1896_v57 = vsub.f32 1.0, %v9118_v41 }
 0x2da   : > { %v8241_v63 = vpop.eup %8240  ;;  %v1827_v43 = vpop.permute.xlu0 %1826 }
 0x2db   : > { %8254 = vtanh.f32 %v1867_v61  ;;  %v1866_v4 = vadd.f32 %v1827_v43, %v9045_v12  ;;  %1922 = vrot.lane.b32.xlu0 %v8241_v63, %s8558_s3  ;;  %v1891_v43 = vsub.f32 1.0, %v9091_v32 }
 0x2dc   : > { %v8243_v6 = vpop.eup %8242  ;;  %v1833_v47 = vpop.permute.xlu1 %1832 }
 0x2dd   : > { %8256 = vtanh.f32 %v1866_v4  ;;  %v1869_v10 = vadd.f32 %v1833_v47, %v9049_v16  ;;  %1928 = vrot.lane.b32.xlu1 %v8243_v6, %s8558_s3  ;;  %v1987_v6 = vmul.f32 %v9091_v32, %v8918_v37  ;;  %v1892_v37 = vsub.f32 1.0, %v9100_v54 }
 0x2de   : > { %v8245_v49 = vpop.eup %8244  ;;  %v1831_v53 = vpop.permute.xlu0 %1830 }
 0x2df   : > { %8258 = vtanh.f32 %v1869_v10  ;;  %v1868_v7 = vadd.f32 %v1831_v53, %v9053_v18  ;;  %1926 = vrot.lane.b32.xlu0 %v8245_v49, %s8558_s3  ;;  %v1890_v10 = vsub.f32 1.0, %v9093_v40 }
 0x2e0   : > { %v8247_v56 = vpop.eup %8246  ;;  %v1837_v60 = vpop.permute.xlu1 %1836 }
 0x2e1   : > { %8260 = vtanh.f32 %v1868_v7  ;;  %v1871_v12 = vadd.f32 %v1837_v60, %v9057_v20  ;;  %1932 = vrot.lane.b32.xlu1 %v8247_v56, %s8558_s3  ;;  %v1986_v7 = vmul.f32 %v9093_v40, %v8911_v26  ;;  %v1893_v60 = vsub.f32 1.0, %v9096_v46 }
 0x2e2   : > { %v8249_v62 = vpop.eup %8248  ;;  %v1835_v9 = vpop.permute.xlu0 %1834  ;;  %v1895_v26 = vsub.f32 1.0, %v9104_v0 }
 0x2e3   : > { %8262 = vtanh.f32 %v1871_v12  ;;  %v1870_v16 = vadd.f32 %v1835_v9, %v9061_v21  ;;  %1930 = vrot.lane.b32.xlu0 %v8249_v62, %s8558_s3  ;;  %v1989_v9 = vmul.f32 %v9096_v46, %v8930_v51  ;;  %v1991_v51 = vmul.f32 %v9104_v0, %v8945_v1 }
 0x2e4   : > { %v8251_v11 = vpop.eup %8250  ;;  %v1841_v17 = vpop.permute.xlu1 %1840  ;;  %v1993_v1 = vmul.f32 %v9114_v31, %v8960_v14  ;;  %v1995_v14 = vmul.f32 %v9122_v45, %v8972_v25  ;;  %v1997_v25 = vmul.f32 %v9130_v58, %v8983_v35  ;;  %v1999_v35 = vmul.f32 %v9138_v8, %v8993_v44 }
 0x2e5   : > { %8264 = vtanh.f32 %v1870_v16  ;;  %v1873_v18 = vadd.f32 %v1841_v17, %v9065_v24  ;;  %1936 = vrot.lane.b32.xlu1 %v8251_v11, %s8558_s3  ;;  %v1988_v17 = vmul.f32 %v9100_v54, %v8920_v39  ;;  %v1990_v39 = vmul.f32 %v9108_v13, %v8932_v52 }
 0x2e6   : > { %v8253_v19 = vpop.eup %8252  ;;  %v1839_v22 = vpop.permute.xlu0 %1838  ;;  %v1992_v52 = vmul.f32 %v9118_v41, %v8947_v3  ;;  %v1994_v3 = vmul.f32 %v9126_v50, %v8962_v15  ;;  %v1996_v15 = vmul.f32 %v9134_v5, %v8974_v27  ;;  %v1998_v27 = vmul.f32 %v9142_v23, %v8985_v36 }
 0x2e7   : > { %8266 = vtanh.f32 %v1873_v18  ;;  %v1872_v20 = vadd.f32 %v1839_v22, %v9069_v29  ;;  %1934 = vrot.lane.b32.xlu0 %v8253_v19, %s8558_s3  ;;  %v2020_v29 = vld [vmem:[%s11435_s10 + $0x10] sm:$0xff]  ;;  %v1894_v22 = vsub.f32 1.0, %v9108_v13  ;;  %v2001_v44 = vmul.f32 %v9146_v30, %v9003_v48 }
 0x2e8   : > { %v8255_v55 = vpop.eup %8254  ;;  %7455 = vmatprep.subr.mxu1 %v2020_v29  ;;  %v2000_v36 = vmul.f32 %v9150_v38, %v8995_v2 }
 0x2e9   : > { %8268 = vtanh.f32 %v1872_v20  ;;  %1940 = vrot.lane.b32.xlu1 %v8255_v55, %s8558_s3  ;;  %7456 = vmatpush3.msra.mxu1 %v2020_v29 }
 0x2ea   : > { %v8257_v21 = vpop.eup %8256  ;;  %7457 = vmatprep.subr.mxu1 %v2019_v59 }
 0x2eb   : > { %1938 = vrot.lane.b32.xlu0 %v8257_v21, %s8558_s3  ;;  %7458 = vmatpush3.msra.mxu1 %v2019_v59  ;;  %v1897_v21 = vsub.f32 1.0, %v9114_v31  ;;  %v1899_v59 = vsub.f32 1.0, %v9122_v45 }
 0x2ec   : > { %v8259_v28 = vpop.eup %8258  ;;  %7459 = vmatprep.subr.mxu1 %v2018_v42 }
 0x2ed   : > { %1944 = vrot.lane.b32.xlu1 %v8259_v28, %s8558_s3  ;;  %7460 = vmatpush3.msra.mxu1 %v2018_v42 }
 0x2ee   : > { %v8261_v24 = vpop.eup %8260 }
 0x2ef   : > { %1942 = vrot.lane.b32.xlu0 %v8261_v24, %s8558_s3 }
 0x2f0   : > { %v8263_v33 = vpop.eup %8262 }
 0x2f1   : > { %1948 = vrot.lane.b32.xlu1 %v8263_v33, %s8558_s3 }
 0x2f2   : > { %v8265_v34 = vpop.eup %8264 }
 0x2f3   : > { %1946 = vrot.lane.b32.xlu0 %v8265_v34, %s8558_s3 }
 0x2f4   : > { %v8267_v61 = vpop.eup %8266 }
 0x2f5   : > { %1952 = vrot.lane.b32.xlu1 %v8267_v61, %s8558_s3  ;;  %v1898_v61 = vsub.f32 1.0, %v9126_v50 }
 0x2f6   : > { %v8269_v63 = vpop.eup %8268 }
 0x2f7   : > { %1950 = vrot.lane.b32.xlu0 %v8269_v63, %s8558_s3 }
 0x34b   : > { %v1925_v4 = vpop.permute.xlu1 %1924 }
 0x34c   : > { %v1971_v47 = vmul.f32 %v1925_v4, %v1891_v43  ;;  %v1901_v4 = vsub.f32 1.0, %v9130_v58 }
 0x34d   : > { %v1923_v49 = vpop.permute.xlu0 %1922 }
 0x34e   : > { %v2003_v53 = vadd.f32 %v1987_v6, %v1971_v47  ;;  %v1970_v56 = vmul.f32 %v1923_v49, %v1890_v10  ;;  %v1900_v10 = vsub.f32 1.0, %v9134_v5 }
 0x34f   : > { %v1929_v12 = vpop.permute.xlu1 %1928 }
 0x350   : > { %v2002_v62 = vadd.f32 %v1986_v7, %v1970_v56  ;;  %v1973_v16 = vmul.f32 %v1929_v12, %v1893_v60  ;;  %2047 = vrot.lane.b32.xlu1 %v2003_v53, %s8558_s3  ;;  %v1903_v7 = vsub.f32 1.0, %v9138_v8  ;;  %v1902_v12 = vsub.f32 1.0, %v9142_v23 }
 0x351   : > { %v1927_v32 = vpop.permute.xlu0 %1926 }
 0x352   : > { %v2005_v11 = vadd.f32 %v1989_v9, %v1973_v16  ;;  %v1972_v18 = vmul.f32 %v1927_v32, %v1892_v37  ;;  %2045 = vrot.lane.b32.xlu0 %v2002_v62, %s8558_s3  ;;  %v1905_v16 = vsub.f32 1.0, %v9146_v30 }
 0x353   : > { %v1933_v40 = vpop.permute.xlu1 %1932 }
 0x354   : > { %v2004_v19 = vadd.f32 %v1988_v17, %v1972_v18  ;;  %v1975_v46 = vmul.f32 %v1933_v40, %v1895_v26  ;;  %2051 = vrot.lane.b32.xlu1 %v2005_v11, %s8558_s3  ;;  %v1904_v11 = vsub.f32 1.0, %v9150_v38 }
 0x355   : > { %v1931_v20 = vpop.permute.xlu0 %1930 }
 0x356   : > { %v2007_v55 = vadd.f32 %v1991_v51, %v1975_v46  ;;  %v1974_v54 = vmul.f32 %v1931_v20, %v1894_v22  ;;  %2049 = vrot.lane.b32.xlu0 %v2004_v19, %s8558_s3 }
 0x357   : > { %v1937_v28 = vpop.permute.xlu1 %1936 }
 0x358   : > { %v2006_v24 = vadd.f32 %v1990_v39, %v1974_v54  ;;  %v1977_v0 = vmul.f32 %v1937_v28, %v1897_v21  ;;  %2055 = vrot.lane.b32.xlu1 %v2007_v55, %s8558_s3 }
 0x359   : > { %v1935_v29 = vpop.permute.xlu0 %1934 }
 0x35a   : > { %v2009_v33 = vadd.f32 %v1993_v1, %v1977_v0  ;;  %v1976_v13 = vmul.f32 %v1935_v29, %v1896_v57  ;;  %2053 = vrot.lane.b32.xlu0 %v2006_v24, %s8558_s3  ;;  %v6642_v0 = vld [vmem:[%s11436_s11] ss:$0 sm:$0xff] }
 0x35b   : > { %v1941_v34 = vpop.permute.xlu1 %1940 }
 0x35c   : > { %v2008_v42 = vadd.f32 %v1992_v52, %v1976_v13  ;;  %v1979_v31 = vmul.f32 %v1941_v34, %v1899_v59  ;;  %2059 = vrot.lane.b32.xlu1 %v2009_v33, %s8558_s3 }
 0x35d   : > { %v1939_v63 = vpop.permute.xlu0 %1938 }
 0x35e   : > { %v2011_v43 = vadd.f32 %v1995_v14, %v1979_v31  ;;  %v1978_v41 = vmul.f32 %v1939_v63, %v1898_v61  ;;  %2057 = vrot.lane.b32.xlu0 %v2008_v42, %s8558_s3 }
 0x35f   : > { %v1945_v6 = vpop.permute.xlu1 %1944 }
 0x360   : > { %v2010_v47 = vadd.f32 %v1994_v3, %v1978_v41  ;;  %v1981_v45 = vmul.f32 %v1945_v6, %v1901_v4  ;;  %2063 = vrot.lane.b32.xlu1 %v2011_v43, %s8558_s3 }
 0x361   : > { %v1943_v49 = vpop.permute.xlu0 %1942 }
 0x362   : > { %v2013_v53 = vadd.f32 %v1997_v25, %v1981_v45  ;;  %v1980_v50 = vmul.f32 %v1943_v49, %v1900_v10  ;;  %2061 = vrot.lane.b32.xlu0 %v2010_v47, %s8558_s3 }
 0x363   : > { %v1949_v56 = vpop.permute.xlu1 %1948 }
 0x364   : > { %v2012_v60 = vadd.f32 %v1996_v15, %v1980_v50  ;;  %v1983_v58 = vmul.f32 %v1949_v56, %v1903_v7  ;;  %2067 = vrot.lane.b32.xlu1 %v2013_v53, %s8558_s3 }
 0x365   : > { %v1947_v62 = vpop.permute.xlu0 %1946 }
 0x366   : > { %v2015_v9 = vadd.f32 %v1999_v35, %v1983_v58  ;;  %v1982_v5 = vmul.f32 %v1947_v62, %v1902_v12  ;;  %2065 = vrot.lane.b32.xlu0 %v2012_v60, %s8558_s3 }
 0x367   : > { %v1953_v37 = vpop.permute.xlu1 %1952 }
 0x368   : > { %v2014_v32 = vadd.f32 %v1998_v27, %v1982_v5  ;;  %v1985_v8 = vmul.f32 %v1953_v37, %v1905_v16  ;;  %2071 = vrot.lane.b32.xlu1 %v2015_v9, %s8558_s3 }
 0x369   : > { %v1951_v17 = vpop.permute.xlu0 %1950 }
 0x36a   : > { %v2017_v18 = vadd.f32 %v2001_v44, %v1985_v8  ;;  %v1984_v23 = vmul.f32 %v1951_v17, %v1904_v11  ;;  %2069 = vrot.lane.b32.xlu0 %v2014_v32, %s8558_s3 }
 0x36c   : > { %v2016_v26 = vadd.f32 %v2000_v36, %v1984_v23  ;;  %2075 = vrot.lane.b32.xlu1 %v2017_v18, %s8558_s3 }
 0x36e   : > { %2073 = vrot.lane.b32.xlu0 %v2016_v26, %s8558_s3 }
 0x3c2   : > { %v9263_v40 = vpop.permute.xlu1 %2047 }
 0x3c3   : > { %11518 = vst [vmem:[#allocation8_spill] sm:$0xff] %v9263_v40 }
 0x3c4   : > { %v9265_v48 = vpop.permute.xlu0 %2045 }
 0x3c5   : > { %11519 = vst [vmem:[#allocation9_spill] sm:$0xff] %v9265_v48  ;;  %7461 = vmatprep.mubr.msk.f32.mxu1 %vm1392_vm3, %v9265_v48 }
 0x3c6   : > { %v9269_v30 = vpop.permute.xlu1 %2051  ;;  %7462 = vmatmul.mubr.msk.f32.vlgmr.msra.gmra.mxu1 %vm1392_vm3, %v9263_v40 }
 0x3c7   : > { %11520 = vst [vmem:[#allocation10_spill] sm:$0xff] %v9269_v30 }
 0x3c8   : > { %v9273_v2 = vpop.permute.xlu0 %2049 }
 0x3c9   : > { %11521 = vst [vmem:[#allocation11_spill] sm:$0xff] %v9273_v2  ;;  %7464 = vmatprep.mubr.msk.f32.mxu1 %vm1392_vm3, %v9273_v2 }
 0x3ca   : > { %v9277_v38 = vpop.permute.xlu1 %2055  ;;  %7465 = vmatmul.mubr.msk.f32.gmra.mxu1 %vm1392_vm3, %v9269_v30 }
 0x3cb   : > { %11522 = vst [vmem:[#allocation12_spill] sm:$0xff] %v9277_v38 }
 0x3cc   : > { %v9281_v19 = vpop.permute.xlu0 %2053 }
 0x3cd   : > { %11523 = vst [vmem:[#allocation13_spill] sm:$0xff] %v9281_v19  ;;  %7467 = vmatprep.mubr.msk.f32.mxu1 %vm1392_vm3, %v9281_v19 }
 0x3ce   : > { %v9285_v51 = vpop.permute.xlu1 %2059  ;;  %7468 = vmatmul.mubr.msk.f32.gmra.mxu1 %vm1392_vm3, %v9277_v38 }
 0x3cf   : > { %11524 = vst [vmem:[#allocation14_spill] sm:$0xff] %v9285_v51 }
 0x3d0   : > { %v9289_v46 = vpop.permute.xlu0 %2057 }
 0x3d1   : > { %11525 = vst [vmem:[#allocation15_spill] sm:$0xff] %v9289_v46  ;;  %7470 = vmatprep.mubr.msk.f32.mxu1 %vm1392_vm3, %v9289_v46 }
 0x3d2   : > { %v9293_v22 = vpop.permute.xlu1 %2063  ;;  %7471 = vmatmul.mubr.msk.f32.gmra.mxu1 %vm1392_vm3, %v9285_v51 }
 0x3d3   : > { %11526 = vst [vmem:[#allocation16_spill] sm:$0xff] %v9293_v22 }
 0x3d4   : > { %v9297_v20 = vpop.permute.xlu0 %2061 }
 0x3d5   : > { %11527 = vst [vmem:[#allocation17_spill] sm:$0xff] %v9297_v20  ;;  %7473 = vmatprep.mubr.msk.f32.mxu1 %vm1392_vm3, %v9297_v20 }
 0x3d6   : > { %v9301_v55 = vpop.permute.xlu1 %2067  ;;  %7474 = vmatmul.mubr.msk.f32.gmra.mxu1 %vm1392_vm3, %v9293_v22 }
 0x3d7   : > { %11528 = vst [vmem:[#allocation18_spill] sm:$0xff] %v9301_v55 }
 0x3d8   : > { %v9305_v39 = vpop.permute.xlu0 %2065 }
 0x3d9   : > { %11529 = vst [vmem:[#allocation19_spill] sm:$0xff] %v9305_v39  ;;  %7476 = vmatprep.mubr.msk.f32.mxu1 %vm1392_vm3, %v9305_v39 }
 0x3da   : > { %7477 = vmatmul.mubr.msk.f32.gmra.mxu1 %vm1392_vm3, %v9301_v55  ;;  %v9311_v54 = vpop.permute.xlu1 %2071 }
 0x3db   : > { %11530 = vst [vmem:[#allocation20_spill] sm:$0xff] %v9311_v54 }
 0x3dc   : > { %v9313_v21 = vpop.permute.xlu0 %2069 }
 0x3dd   : > { %11531 = vst [vmem:[#allocation21_spill] sm:$0xff] %v9313_v21  ;;  %7479 = vmatprep.mubr.msk.f32.mxu1 %vm1392_vm3, %v9313_v21 }
 0x3de   : > { %7480 = vmatmul.mubr.msk.f32.gmra.mxu1 %vm1392_vm3, %v9311_v54  ;;  %v9321_v24 = vpop.permute.xlu1 %2075 }
 0x3df   : > { %11533 = vst [vmem:[#allocation23_spill] sm:$0xff] %v9321_v24 }
 0x3e0   : > { %v9319_v28 = vpop.permute.xlu0 %2073 }
 0x3e1   : > { %11532 = vst [vmem:[#allocation22_spill] sm:$0xff] %v9319_v28  ;;  %7482 = vmatprep.mubr.msk.f32.mxu1 %vm1392_vm3, %v9319_v28 }
 0x3e2   : > { %7483 = vmatmul.mubr.msk.f32.gmra.mxu1 %vm1392_vm3, %v9321_v24 }
 0x486   : > { %v7463_v1 = vpop.f32.mrf.mxu1 }
 0x487   : > { %v9388_v12 = vadd.f32 %v7463_v1, %v6642_v0 }
 0x488   : > { %v2175_v57 = vpop.f32.mrf.mxu1 }
 0x489   : > { %v9330_v29 = vadd.f32 %v6642_v0, %v2175_v57 }
 0x48a   : > { %v7466_v33 = vpop.f32.mrf.mxu1 }
 0x48b   : > { %7517 = vmatprep.mubr.msk.f32.mxu0 %vm869_vm0, %v9330_v29  ;;  %v9380_v35 = vadd.f32 %v7466_v33, %v6642_v0 }
 0x48c   : > { %v2185_v52 = vpop.f32.mrf.mxu1 }
 0x48d   : > { %v9384_v58 = vadd.f32 %v6642_v0, %v2185_v52 }
 0x48e   : > { %v7469_v13 = vpop.f32.mrf.mxu1 }
 0x48f   : > { %v9372_v56 = vadd.f32 %v7469_v13, %v6642_v0 }
 0x490   : > { %v2195_v59 = vpop.f32.mrf.mxu1 }
 0x491   : > { %v9376_v60 = vadd.f32 %v6642_v0, %v2195_v59 }
 0x492   : > { %v7472_v34 = vpop.f32.mrf.mxu1 }
 0x493   : > { %v9364_v50 = vadd.f32 %v7472_v34, %v6642_v0 }
 0x494   : > { %v2205_v42 = vpop.f32.mrf.mxu1 }
 0x495   : > { %v9368_v7 = vadd.f32 %v6642_v0, %v2205_v42 }
 0x496   : > { %v7475_v14 = vpop.f32.mrf.mxu1 }
 0x497   : > { %v9356_v53 = vadd.f32 %v7475_v14, %v6642_v0  ;;  %v9479_v14 = vld [vmem:[%s11429_s4 + $0x8] sm:$0xff] }
 0x498   : > { %v2215_v31 = vpop.f32.mrf.mxu1  ;;  %vm849_vm4 = vcmp.gt.f32.partialorder %v9479_v14, 0.5 }
 0x499   : > { %v9360_v15 = vadd.f32 %v6642_v0, %v2215_v31  ;;  %v9484_v31 = vld [vmem:[%s11429_s4] sm:$0xff] }
 0x49a   : > { %v7478_v61 = vpop.f32.mrf.mxu1  ;;  %vm848_vm7 = vcmp.gt.f32.partialorder %v9484_v31, 0.5 }
 0x49b   : > { %v9348_v10 = vadd.f32 %v7478_v61, %v6642_v0 }
 0x49c   : > { %v2225_v63 = vpop.f32.mrf.mxu1 }
 0x49d   : > { %v9352_v49 = vadd.f32 %v6642_v0, %v2225_v63 }
 0x49e   : > { %v7481_v43 = vpop.f32.mrf.mxu1 }
 0x49f   : > { %v9340_v25 = vadd.f32 %v7481_v43, %v6642_v0 }
 0x4a0   : > { %v2235_v3 = vpop.f32.mrf.mxu1 }
 0x4a1   : > { %v9344_v45 = vadd.f32 %v6642_v0, %v2235_v3 }
 0x4a2   : > { %v7484_v41 = vpop.f32.mrf.mxu1 }
 0x4a3   : > { %v9334_v4 = vadd.f32 %v7484_v41, %v6642_v0 }
 0x4a4   : > { %v2245_v6 = vpop.f32.mrf.mxu1 }
 0x4a5   : > { %v9336_v47 = vadd.f32 %v6642_v0, %v2245_v6  ;;  %2300 = vrot.lane.b32.xlu0 %v9334_v4, %s8559_s24 }
 0x4a7   : > { %2298 = vrot.lane.b32.xlu1 %v9336_v47, %s8559_s24 }
 0x4a9   : > { %2296 = vrot.lane.b32.xlu0 %v9340_v25, %s8559_s24 }
 0x4ab   : > { %2294 = vrot.lane.b32.xlu1 %v9344_v45, %s8559_s24 }
 0x4ad   : > { %2292 = vrot.lane.b32.xlu0 %v9348_v10, %s8559_s24 }
 0x4af   : > { %2290 = vrot.lane.b32.xlu1 %v9352_v49, %s8559_s24 }
 0x4b1   : > { %2288 = vrot.lane.b32.xlu0 %v9356_v53, %s8559_s24 }
 0x4b3   : > { %2286 = vrot.lane.b32.xlu1 %v9360_v15, %s8559_s24 }
 0x4b5   : > { %2284 = vrot.lane.b32.xlu0 %v9364_v50, %s8559_s24 }
 0x4b7   : > { %2282 = vrot.lane.b32.xlu1 %v9368_v7, %s8559_s24 }
 0x4b9   : > { %2280 = vrot.lane.b32.xlu0 %v9372_v56, %s8559_s24 }
 0x4bb   : > { %2278 = vrot.lane.b32.xlu1 %v9376_v60, %s8559_s24 }
 0x4bd   : > { %2276 = vrot.lane.b32.xlu0 %v9380_v35, %s8559_s24 }
 0x4bf   : > { %2274 = vrot.lane.b32.xlu1 %v9384_v58, %s8559_s24 }
 0x4c1   : > { %2272 = vrot.lane.b32.xlu0 %v9388_v12, %s8559_s24 }
 0x4c3   : > { %2270 = vrot.lane.b32.xlu1 %v9330_v29, %s8559_s24 }
 0x4c5   : > { %2711 = vrot.lane.b32.xlu0 %v9344_v45, %s8558_s3 }
 0x4c7   : > { %2717 = vrot.lane.b32.xlu1 %v9334_v4, %s8558_s3 }
 0x4c9   : > { %2707 = vrot.lane.b32.xlu0 %v9352_v49, %s8558_s3 }
 0x4cb   : > { %2713 = vrot.lane.b32.xlu1 %v9340_v25, %s8558_s3 }
 0x4cd   : > { %2703 = vrot.lane.b32.xlu0 %v9360_v15, %s8558_s3 }
 0x4cf   : > { %2709 = vrot.lane.b32.xlu1 %v9348_v10, %s8558_s3 }
 0x4d1   : > { %2715 = vrot.lane.b32.xlu0 %v9336_v47, %s8558_s3 }
 0x4d3   : > { %2705 = vrot.lane.b32.xlu1 %v9356_v53, %s8558_s3 }
 0x4d5   : > { %2699 = vrot.lane.b32.xlu0 %v9368_v7, %s8558_s3 }
 0x517   : > { %v2301_v62 = vpop.permute.xlu0 %2300 }
 0x518   : > { %7485 = vmatprep.subr.msk.mxu0 %vm869_vm0, %v2301_v62 }
 0x519   : > { %7486 = vmatpush3.xpose.msk.msra.mxu0 %vm869_vm0, %v2301_v62  ;;  %v2299_v9 = vpop.permute.xlu1 %2298  ;;  %v9518_v62 = vld [vmem:[%s11429_s4 + $0x28] sm:$0xff] }
 0x51a   : > { %7487 = vmatprep.subr.msk.mxu0 %vm869_vm0, %v2299_v9  ;;  %vm853_vm10 = vcmp.gt.f32.partialorder %v9518_v62, 0.5 }
 0x51b   : > { %v2297_v27 = vpop.permute.xlu0 %2296 }
 0x51d   : > { %7488 = vmatpush3.xpose.msk.msra.mxu0 %vm869_vm0, %v2299_v9  ;;  %v2295_v5 = vpop.permute.xlu1 %2294 }
 0x51e   : > { %7489 = vmatprep.subr.msk.mxu0 %vm869_vm0, %v2297_v27 }
 0x51f   : > { %v2293_v16 = vpop.permute.xlu0 %2292 }
 0x521   : > { %7490 = vmatpush3.xpose.msk.msra.mxu0 %vm869_vm0, %v2297_v27  ;;  %v2291_v37 = vpop.permute.xlu1 %2290 }
 0x522   : > { %7491 = vmatprep.subr.msk.mxu0 %vm869_vm0, %v2295_v5 }
 0x523   : > { %v2289_v32 = vpop.permute.xlu0 %2288 }
 0x525   : > { %7492 = vmatpush3.xpose.msk.msra.mxu0 %vm869_vm0, %v2295_v5  ;;  %v2287_v44 = vpop.permute.xlu1 %2286 }
 0x526   : > { %7493 = vmatprep.subr.msk.mxu0 %vm869_vm0, %v2293_v16 }
 0x527   : > { %v2285_v8 = vpop.permute.xlu0 %2284 }
 0x529   : > { %7494 = vmatpush3.xpose.msk.msra.mxu0 %vm869_vm0, %v2293_v16  ;;  %v2283_v11 = vpop.permute.xlu1 %2282 }
 0x52a   : > { %7495 = vmatprep.subr.msk.mxu0 %vm869_vm0, %v2291_v37 }
 0x52b   : > { %v2281_v17 = vpop.permute.xlu0 %2280 }
 0x52d   : > { %7496 = vmatpush3.xpose.msk.msra.mxu0 %vm869_vm0, %v2291_v37  ;;  %v2279_v18 = vpop.permute.xlu1 %2278  ;;  %v9529_v37 = vld [vmem:[%s11429_s4 + $0x38] sm:$0xff] }
 0x52e   : > { %7497 = vmatprep.subr.msk.mxu0 %vm869_vm0, %v2289_v32  ;;  %vm855_vm11 = vcmp.gt.f32.partialorder %v9529_v37, 0.5 }
 0x52f   : > { %v2277_v36 = vpop.permute.xlu0 %2276 }
 0x531   : > { %7498 = vmatpush3.xpose.msk.msra.mxu0 %vm869_vm0, %v2289_v32  ;;  %v2275_v23 = vpop.permute.xlu1 %2274 }
 0x532   : > { %7499 = vmatprep.subr.msk.mxu0 %vm869_vm0, %v2287_v44 }
 0x533   : > { %v2273_v26 = vpop.permute.xlu0 %2272 }
 0x535   : > { %7500 = vmatpush3.xpose.msk.msra.mxu0 %vm869_vm0, %v2287_v44  ;;  %v2271_v1 = vpop.permute.xlu1 %2270 }
 0x536   : > { %7501 = vmatprep.subr.msk.mxu0 %vm869_vm0, %v2285_v8 }
 0x537   : > { %v2712_v0 = vpop.permute.xlu0 %2711 }
 0x539   : > { %7502 = vmatpush3.xpose.msk.msra.mxu0 %vm869_vm0, %v2285_v8  ;;  %v2718_v57 = vpop.permute.xlu1 %2717 }
 0x53a   : > { %7503 = vmatprep.subr.msk.mxu0 %vm869_vm0, %v2283_v11  ;;  %7541 = vmatprep.subr.mxu1 %v2718_v57 }
 0x53b   : > { %v2708_v33 = vpop.permute.xlu0 %2707  ;;  %7542 = vmatpush3.msra.mxu1 %v2718_v57 }
 0x53d   : > { %7504 = vmatpush3.xpose.msk.msra.mxu0 %vm869_vm0, %v2283_v11  ;;  %v2714_v13 = vpop.permute.xlu1 %2713 }
 0x53e   : > { %7505 = vmatprep.subr.msk.mxu0 %vm869_vm0, %v2281_v17 }
 0x53f   : > { %v2704_v52 = vpop.permute.xlu0 %2703 }
 0x541   : > { %7506 = vmatpush3.xpose.msk.msra.mxu0 %vm869_vm0, %v2281_v17  ;;  %v2710_v34 = vpop.permute.xlu1 %2709  ;;  %v9540_v17 = vld [vmem:[%s11429_s4 + $0x48] sm:$0xff] }
 0x542   : > { %7507 = vmatprep.subr.msk.mxu0 %vm869_vm0, %v2279_v18  ;;  %vm857_vm12 = vcmp.gt.f32.partialorder %v9540_v17, 0.5 }
 0x543   : > { %v2716_v59 = vpop.permute.xlu0 %2715 }
 0x544   : > { %7543 = vmatprep.subr.mxu1 %v2716_v59 }
 0x545   : > { %7508 = vmatpush3.xpose.msk.msra.mxu0 %vm869_vm0, %v2279_v18  ;;  %7544 = vmatpush3.msra.mxu1 %v2716_v59  ;;  %v2706_v42 = vpop.permute.xlu1 %2705 }
 0x546   : > { %7509 = vmatprep.subr.msk.mxu0 %vm869_vm0, %v2277_v36  ;;  %7545 = vmatprep.subr.mxu1 %v2714_v13 }
 0x547   : > { %7546 = vmatpush3.msra.mxu1 %v2714_v13 }
 0x548   : > { %7547 = vmatprep.subr.mxu1 %v2712_v0 }
 0x549   : > { %7510 = vmatpush3.xpose.msk.msra.mxu0 %vm869_vm0, %v2277_v36  ;;  %7548 = vmatpush3.msra.mxu1 %v2712_v0 }
 0x54a   : > { %7511 = vmatprep.subr.msk.mxu0 %vm869_vm0, %v2275_v23  ;;  %7549 = vmatprep.subr.mxu1 %v2710_v34 }
 0x54b   : > { %7550 = vmatpush3.msra.mxu1 %v2710_v34 }
 0x54c   : > { %7551 = vmatprep.subr.mxu1 %v2708_v33 }
 0x54d   : > { %7512 = vmatpush3.xpose.msk.msra.mxu0 %vm869_vm0, %v2275_v23  ;;  %7552 = vmatpush3.msra.mxu1 %v2708_v33 }
 0x54e   : > { %7513 = vmatprep.subr.msk.mxu0 %vm869_vm0, %v2273_v26  ;;  %7553 = vmatprep.subr.mxu1 %v2706_v42 }
 0x54f   : > { %7554 = vmatpush3.msra.mxu1 %v2706_v42  ;;  %v9575_v42 = vld [vmem:[%s11429_s4 + $0x78] sm:$0xff] }
 0x550   : > { %7555 = vmatprep.subr.mxu1 %v2704_v52  ;;  %vm11500_vm15 = vcmp.gt.f32.partialorder %v9575_v42, 0.5 }
 0x551   : > { %7514 = vmatpush3.xpose.msk.msra.mxu0 %vm869_vm0, %v2273_v26  ;;  %7556 = vmatpush3.msra.mxu1 %v2704_v52  ;;  %v9564_v52 = vld [vmem:[%s11429_s4 + $0x68] sm:$0xff] }
 0x552   : > { %7515 = vmatprep.subr.msk.mxu0 %vm869_vm0, %v2271_v1  ;;  %vm861_vm14 = vcmp.gt.f32.partialorder %v9564_v52, 0.5 }
 0x555   : > { %7516 = vmatpush3.xpose.msk.msra.mxu0 %vm869_vm0, %v2271_v1  ;;  %v9553_v1 = vld [vmem:[%s11429_s4 + $0x58] sm:$0xff] }
 0x556   : > { %vm859_vm13 = vcmp.gt.f32.partialorder %v9553_v1, 0.5 }
 0x558   : > { %7518 = vmatmul.mubr.msk.f32.vlgmr.msra.gmra.mxu0 %vm869_vm0, %v9388_v12 }
 0x559   : > { %7520 = vmatprep.mubr.msk.f32.mxu0 %vm869_vm0, %v9384_v58 }
 0x55c   : > { %7521 = vmatmul.mubr.msk.f32.gmra.mxu0 %vm869_vm0, %v9380_v35 }
 0x55d   : > { %7523 = vmatprep.mubr.msk.f32.mxu0 %vm869_vm0, %v9376_v60 }
 0x560   : > { %7524 = vmatmul.mubr.msk.f32.gmra.mxu0 %vm869_vm0, %v9372_v56 }
 0x561   : > { %7526 = vmatprep.mubr.msk.f32.mxu0 %vm869_vm0, %v9368_v7 }
 0x564   : > { %7527 = vmatmul.mubr.msk.f32.gmra.mxu0 %vm869_vm0, %v9364_v50 }
 0x565   : > { %7529 = vmatprep.mubr.msk.f32.mxu0 %vm869_vm0, %v9360_v15 }
 0x568   : > { %7530 = vmatmul.mubr.msk.f32.gmra.mxu0 %vm869_vm0, %v9356_v53 }
 0x569   : > { %7532 = vmatprep.mubr.msk.f32.mxu0 %vm869_vm0, %v9352_v49 }
 0x56c   : > { %7533 = vmatmul.mubr.msk.f32.gmra.mxu0 %vm869_vm0, %v9348_v10  ;;  %v9507_v10 = vld [vmem:[%s11429_s4 + $0x10] sm:$0xff] }
 0x56d   : > { %7535 = vmatprep.mubr.msk.f32.mxu0 %vm869_vm0, %v9344_v45  ;;  %vm850_vm9 = vcmp.gt.f32.partialorder %v9507_v10, 0.5 }
 0x570   : > { %7536 = vmatmul.mubr.msk.f32.gmra.mxu0 %vm869_vm0, %v9340_v25 }
 0x571   : > { %7538 = vmatprep.mubr.msk.f32.mxu0 %vm869_vm0, %v9336_v47 }
 0x574   : > { %7539 = vmatmul.mubr.msk.f32.gmra.mxu0 %vm869_vm0, %v9334_v4  ;;  %v9495_v4 = vld [vmem:[%s11429_s4 + $0x18] sm:$0xff] }
 0x575   : > { %vm851_vm8 = vcmp.gt.f32.partialorder %v9495_v4, 0.5 }
 0x618   : > { %v7519_v61 = vpop.f32.mrf.mxu0 }
 0x619   : > { %v2512_v63 = vmul.f32 0.25, %v7519_v61 }
 0x61a   : > { %v2432_v43 = vpop.f32.mrf.mxu0 }
 0x61b   : > { %v2511_v3 = vmul.f32 0.25, %v2432_v43  ;;  %v9490_v41 = vsel %vm849_vm4, %v2512_v63, -1e+09 }
 0x61c   : > { %2545 = vmax.xlane.f32.xlu1 %v9490_v41  ;;  %v7522_v6 = vpop.f32.mrf.mxu0 }
 0x61d   : > { %v2514_v47 = vmul.f32 0.25, %v7522_v6  ;;  %v9500_v25 = vsel %vm848_vm7, %v2511_v3, -1e+09  ;;  %v9591_v3 = vld [vmem:[%s11429_s4 + $0x20] sm:$0xff] }
 0x61e   : > { %2543 = vmax.xlane.f32.xlu0 %v9500_v25  ;;  %v2442_v45 = vpop.f32.mrf.mxu0  ;;  %vm11479_vm1 = vcmp.gt.f32.partialorder %v9591_v3, 0.5 }
 0x61f   : > { %v2513_v53 = vmul.f32 0.25, %v2442_v45  ;;  %v9511_v15 = vsel %vm851_vm8, %v2514_v47, -1e+09  ;;  %v9597_v47 = vld [vmem:[%s11429_s4 + $0x30] sm:$0xff] }
 0x620   : > { %v7525_v49 = vpop.f32.mrf.mxu0  ;;  %vm11456_vm2 = vcmp.gt.f32.partialorder %v9597_v47, 0.5 }
 0x621   : > { %v2516_v27 = vmul.f32 0.25, %v7525_v49  ;;  %v9522_v5 = vsel %vm850_vm9, %v2513_v53, -1e+09  ;;  %v9608_v53 = vld [vmem:[%s11429_s4 + $0x40] sm:$0xff] }
 0x622   : > { %2549 = vmax.xlane.f32.xlu0 %v9511_v15  ;;  %v2452_v7 = vpop.f32.mrf.mxu0  ;;  %vm11446_vm5 = vcmp.gt.f32.partialorder %v9608_v53, 0.5 }
 0x623   : > { %v9533_v8 = vsel %vm853_vm10, %v2516_v27, -1e+09  ;;  %v2515_v6 = vmul.f32 0.25, %v2452_v7  ;;  %v9621_v27 = vld [vmem:[%s11429_s4 + $0x50] sm:$0xff] }
 0x624   : > { %v7528_v9 = vpop.f32.mrf.mxu0  ;;  %vm11447_vm6 = vcmp.gt.f32.partialorder %v9621_v27, 0.5 }
 0x625   : > { %v2518_v44 = vmul.f32 0.25, %v7528_v9  ;;  %v9601_v49 = vsel %vm11479_vm1, %v2515_v6, -1e+09 }
 0x626   : > { %2547 = vmax.xlane.f32.xlu0 %v9522_v5  ;;  %v2462_v16 = vpop.f32.mrf.mxu0 }
 0x627   : > { %v9546_v23 = vsel %vm855_vm11, %v2518_v44, -1e+09  ;;  %v2517_v45 = vmul.f32 0.25, %v2462_v16 }
 0x628   : > { %v7531_v32 = vpop.f32.mrf.mxu0 }
 0x629   : > { %v2520_v36 = vmul.f32 0.25, %v7531_v32  ;;  %v9614_v9 = vsel %vm11456_vm2, %v2517_v45, -1e+09  ;;  %v9634_v32 = vld [vmem:[%s11429_s4 + $0x60] sm:$0xff] }
 0x62a   : > { %2553 = vmax.xlane.f32.xlu0 %v9533_v8  ;;  %v2472_v11 = vpop.f32.mrf.mxu0 }
 0x62b   : > { %v9557_v33 = vsel %vm857_vm12, %v2520_v36, -1e+09  ;;  %v2519_v7 = vmul.f32 0.25, %v2472_v11 }
 0x62c   : > { %v7534_v18 = vpop.f32.mrf.mxu0 }
 0x62d   : > { %2701 = vrot.lane.b32.xlu1 %v9364_v50, %s8558_s3  ;;  %v2522_v57 = vmul.f32 0.25, %v7534_v18  ;;  %v9647_v18 = vld [vmem:[%s11429_s4 + $0x70] sm:$0xff] }
 0x62e   : > { %2557 = vmax.xlane.f32.xlu0 %v9546_v23  ;;  %v2482_v26 = vpop.f32.mrf.mxu0 }
 0x62f   : > { %v9568_v59 = vsel %vm859_vm13, %v2522_v57, -1e+09  ;;  %v2521_v16 = vmul.f32 0.25, %v2482_v26 }
 0x630   : > { %v7537_v0 = vpop.f32.mrf.mxu0 }
 0x631   : > { %v2524_v13 = vmul.f32 0.25, %v7537_v0  ;;  %v2700_v0 = vpop.permute.xlu0 %2699 }
 0x632   : > { %2561 = vmax.xlane.f32.xlu0 %v9557_v33  ;;  %v2492_v50 = vpop.f32.mrf.mxu0 }
 0x633   : > { %v9579_v63 = vsel %vm861_vm14, %v2524_v13, -1e+09  ;;  %v2523_v44 = vmul.f32 0.25, %v2492_v50 }
 0x634   : > { %v7540_v34 = vpop.f32.mrf.mxu0 }
 0x635   : > { %v2526_v61 = vmul.f32 0.25, %v7540_v34 }
 0x636   : > { %2565 = vmax.xlane.f32.xlu0 %v9568_v59  ;;  %v2502_v11 = vpop.f32.mrf.mxu0 }
 0x637   : > { %v9585_v43 = vsel %vm11500_vm15, %v2526_v61, -1e+09  ;;  %v2525_v36 = vmul.f32 0.25, %v2502_v11 }
 0x63a   : > { %2569 = vmax.xlane.f32.xlu0 %v9579_v63 }
 0x63e   : > { %2573 = vmax.xlane.f32.xlu0 %v9585_v43 }
 0x651   : > { %2551 = vmax.xlane.f32.xlu1 %v9601_v49 }
 0x654   : > { %2695 = vrot.lane.b32.xlu0 %v9376_v60, %s8558_s3  ;;  %v9627_v60 = vsel %vm11446_vm5, %v2519_v7, -1e+09  ;;  %vm11449_vm5 = vcmp.gt.f32.partialorder %v9634_v32, 0.5 }
 0x655   : > { %2555 = vmax.xlane.f32.xlu1 %v9614_v9  ;;  %v9651_v26 = vsel %vm11449_vm5, %v2523_v44, -1e+09 }
 0x658   : > { %2691 = vrot.lane.b32.xlu0 %v9384_v58, %s8558_s3  ;;  %v9640_v58 = vsel %vm11447_vm6, %v2521_v16, -1e+09  ;;  %vm11448_vm6 = vcmp.gt.f32.partialorder %v9647_v18, 0.5 }
 0x659   : > { %2559 = vmax.xlane.f32.xlu1 %v9627_v60 }
 0x65c   : > { %2687 = vrot.lane.b32.xlu0 %v9330_v29, %s8558_s3  ;;  %v9657_v29 = vsel %vm11448_vm6, %v2525_v36, -1e+09 }
 0x65d   : > { %2563 = vmax.xlane.f32.xlu1 %v9640_v58 }
 0x661   : > { %2567 = vmax.xlane.f32.xlu1 %v9651_v26 }
 0x665   : > { %2571 = vmax.xlane.f32.xlu1 %v9657_v29 }
 0x676   : > { %2697 = vrot.lane.b32.xlu1 %v9372_v56, %s8558_s3 }
 0x67a   : > { %2693 = vrot.lane.b32.xlu1 %v9380_v35, %s8558_s3 }
 0x67e   : > { %2689 = vrot.lane.b32.xlu1 %v9388_v12, %s8558_s3 }
 0x6a5   : > { %v2546_v57 = vpop.xlane.xlu1 %2545 }
 0x6a6   : > { %v2576_v50 = vsub.f32 %v9490_v41, %v2546_v57 }
 0x6a7   : > { %v2544_v13 = vpop.xlane.xlu0 %2543 }
 0x6a8   : > { %v2593_v34 = vmul.f32 1.442695, %v2576_v50  ;;  %v2575_v61 = vsub.f32 %v9500_v25, %v2544_v13 }
 0x6a9   : > { %v2702_v6 = vpop.permute.xlu1 %2701 }
 0x6aa   : > { %8270 = vpow2.f32 %v2593_v34  ;;  %v2591_v45 = vmul.f32 1.442695, %v2575_v61  ;;  %7557 = vmatprep.subr.mxu1 %v2702_v6 }
 0x6ab   : > { %v2550_v7 = vpop.xlane.xlu0 %2549  ;;  %7558 = vmatpush3.msra.mxu1 %v2702_v6 }
 0x6ac   : > { %8272 = vpow2.f32 %v2591_v45  ;;  %v2578_v56 = vsub.f32 %v9511_v15, %v2550_v7  ;;  %7559 = vmatprep.subr.mxu1 %v2700_v0 }
 0x6ad   : > { %7560 = vmatpush3.msra.mxu1 %v2700_v0 }
 0x6ae   : > { %v2597_v35 = vmul.f32 1.442695, %v2578_v56 }
 0x6af   : > { %v2548_v12 = vpop.xlane.xlu0 %2547 }
 0x6b0   : > { %8274 = vpow2.f32 %v2597_v35  ;;  %v2577_v41 = vsub.f32 %v9522_v5, %v2548_v12 }
 0x6b2   : > { %v2595_v16 = vmul.f32 1.442695, %v2577_v41 }
 0x6b3   : > { %v2554_v44 = vpop.xlane.xlu0 %2553 }
 0x6b4   : > { %8276 = vpow2.f32 %v2595_v16  ;;  %v2580_v25 = vsub.f32 %v9533_v8, %v2554_v44 }
 0x6b6   : > { %v2601_v11 = vmul.f32 1.442695, %v2580_v25 }
 0x6b7   : > { %v9671_v36 = vpop.eup %8270  ;;  %v2558_v57 = vpop.xlane.xlu0 %2557 }
 0x6b8   : > { %8278 = vpow2.f32 %v2601_v11  ;;  %v2582_v50 = vsub.f32 %v9546_v23, %v2558_v57  ;;  %2625 = vadd.xlane.f32.xlu0 %v9671_v36 }
 0x6b9   : > { %v9675_v15 = vpop.eup %8272 }
 0x6ba   : > { %v2605_v0 = vmul.f32 1.442695, %v2582_v50  ;;  %2623 = vadd.xlane.f32.xlu1 %v9675_v15 }
 0x6bb   : > { %v2562_v5 = vpop.xlane.xlu0 %2561 }
 0x6bc   : > { %8280 = vpow2.f32 %v2605_v0  ;;  %v2584_v13 = vsub.f32 %v9557_v33, %v2562_v5 }
 0x6bd   : > { %v9679_v34 = vpop.eup %8274 }
 0x6be   : > { %v2609_v8 = vmul.f32 1.442695, %v2584_v13  ;;  %2629 = vadd.xlane.f32.xlu0 %v9679_v34 }
 0x6bf   : > { %v2566_v61 = vpop.xlane.xlu0 %2565 }
 0x6c0   : > { %8282 = vpow2.f32 %v2609_v8  ;;  %v2586_v23 = vsub.f32 %v9568_v59, %v2566_v61 }
 0x6c1   : > { %v9683_v6 = vpop.eup %8276 }
 0x6c2   : > { %v2613_v45 = vmul.f32 1.442695, %v2586_v23  ;;  %2627 = vadd.xlane.f32.xlu1 %v9683_v6 }
 0x6c3   : > { %v2570_v7 = vpop.xlane.xlu0 %2569 }
 0x6c4   : > { %8284 = vpow2.f32 %v2613_v45  ;;  %v2588_v56 = vsub.f32 %v9579_v63, %v2570_v7 }
 0x6c5   : > { %v9687_v35 = vpop.eup %8278 }
 0x6c6   : > { %v2617_v33 = vmul.f32 1.442695, %v2588_v56  ;;  %2633 = vadd.xlane.f32.xlu0 %v9687_v35 }
 0x6c7   : > { %v2574_v12 = vpop.xlane.xlu0 %2573 }
 0x6c8   : > { %8286 = vpow2.f32 %v2617_v33  ;;  %v2590_v41 = vsub.f32 %v9585_v43, %v2574_v12 }
 0x6c9   : > { %v9691_v16 = vpop.eup %8280 }
 0x6ca   : > { %v2621_v59 = vmul.f32 1.442695, %v2590_v41  ;;  %2637 = vadd.xlane.f32.xlu0 %v9691_v16 }
 0x6cc   : > { %8288 = vpow2.f32 %v2621_v59 }
 0x6cd   : > { %v9694_v44 = vpop.eup %8282 }
 0x6ce   : > { %2641 = vadd.xlane.f32.xlu0 %v9694_v44 }
 0x6d1   : > { %v9697_v63 = vpop.eup %8284 }
 0x6d2   : > { %2645 = vadd.xlane.f32.xlu0 %v9697_v63 }
 0x6d5   : > { %v9700_v25 = vpop.eup %8286 }
 0x6d6   : > { %2649 = vadd.xlane.f32.xlu0 %v9700_v25 }
 0x6d9   : > { %v9703_v11 = vpop.eup %8288 }
 0x6da   : > { %2653 = vadd.xlane.f32.xlu0 %v9703_v11  ;;  %v2552_v43 = vpop.xlane.xlu1 %2551 }
 0x6db   : > { %v2579_v57 = vsub.f32 %v9601_v49, %v2552_v43  ;;  %v2696_v43 = vpop.permute.xlu0 %2695 }
 0x6dd   : > { %v2599_v50 = vmul.f32 1.442695, %v2579_v57 }
 0x6de   : > { %v2556_v0 = vpop.xlane.xlu1 %2555 }
 0x6df   : > { %8290 = vpow2.f32 %v2599_v50  ;;  %v2581_v5 = vsub.f32 %v9614_v9, %v2556_v0 }
 0x6e1   : > { %v2603_v13 = vmul.f32 1.442695, %v2581_v5 }
 0x6e2   : > { %v2560_v8 = vpop.xlane.xlu1 %2559 }
 0x6e3   : > { %8292 = vpow2.f32 %v2603_v13  ;;  %v2583_v61 = vsub.f32 %v9627_v60, %v2560_v8 }
 0x6e5   : > { %v2607_v23 = vmul.f32 1.442695, %v2583_v61 }
 0x6e6   : > { %v2564_v45 = vpop.xlane.xlu1 %2563 }
 0x6e7   : > { %8294 = vpow2.f32 %v2607_v23  ;;  %v2585_v7 = vsub.f32 %v9640_v58, %v2564_v45  ;;  %v2885_v23 = vld [vmem:[%s11438_s13 + $0x18] sm:$0xff] }
 0x6e9   : > { %v2611_v56 = vmul.f32 1.442695, %v2585_v7 }
 0x6ea   : > { %v2568_v33 = vpop.xlane.xlu1 %2567 }
 0x6eb   : > { %8296 = vpow2.f32 %v2611_v56  ;;  %v2587_v49 = vsub.f32 %v9651_v26, %v2568_v33  ;;  %v2692_v26 = vpop.permute.xlu0 %2691 }
 0x6ec   : > { %v9711_v12 = vpop.eup %8290 }
 0x6ed   : > { %v2615_v41 = vmul.f32 1.442695, %v2587_v49  ;;  %2631 = vadd.xlane.f32.xlu1 %v9711_v12 }
 0x6ee   : > { %v2572_v9 = vpop.xlane.xlu1 %2571 }
 0x6ef   : > { %8298 = vpow2.f32 %v2615_v41  ;;  %v2589_v59 = vsub.f32 %v9657_v29, %v2572_v9  ;;  %v2688_v8 = vpop.permute.xlu0 %2687 }
 0x6f0   : > { %v9715_v60 = vpop.eup %8292 }
 0x6f1   : > { %v2619_v57 = vmul.f32 1.442695, %v2589_v59  ;;  %2635 = vadd.xlane.f32.xlu1 %v9715_v60 }
 0x6f2   : > { %v2698_v58 = vpop.permute.xlu1 %2697 }
 0x6f3   : > { %8300 = vpow2.f32 %v2619_v57  ;;  %7561 = vmatprep.subr.mxu1 %v2698_v58  ;;  %v2883_v57 = vld [vmem:[%s11438_s13 + $0x8] sm:$0xff] }
 0x6f4   : > { %v9718_v50 = vpop.eup %8294  ;;  %7562 = vmatpush3.msra.mxu1 %v2698_v58 }
 0x6f5   : > { %2639 = vadd.xlane.f32.xlu1 %v9718_v50  ;;  %7563 = vmatprep.subr.mxu1 %v2696_v43 }
 0x6f6   : > { %7564 = vmatpush3.msra.mxu1 %v2696_v43  ;;  %v2694_v0 = vpop.permute.xlu1 %2693  ;;  %v2884_v43 = vld [vmem:[%s11438_s13 + $0x10] sm:$0xff] }
 0x6f7   : > { %7565 = vmatprep.subr.mxu1 %v2694_v0 }
 0x6f8   : > { %v9721_v29 = vpop.eup %8296  ;;  %7566 = vmatpush3.msra.mxu1 %v2694_v0 }
 0x6f9   : > { %2643 = vadd.xlane.f32.xlu1 %v9721_v29  ;;  %7567 = vmatprep.subr.mxu1 %v2692_v26 }
 0x6fa   : > { %7568 = vmatpush3.msra.mxu1 %v2692_v26  ;;  %v2690_v5 = vpop.permute.xlu1 %2689 }
 0x6fb   : > { %7569 = vmatprep.subr.mxu1 %v2690_v5 }
 0x6fc   : > { %v9724_v13 = vpop.eup %8298  ;;  %7570 = vmatpush3.msra.mxu1 %v2690_v5  ;;  %v9761_v5 = vld [vmem:[%s11435_s10 + $0x18] sm:$0xff] }
 0x6fd   : > { %2647 = vadd.xlane.f32.xlu1 %v9724_v13  ;;  %7571 = vmatprep.subr.mxu1 %v2688_v8 }
 0x6fe   : > { %7572 = vmatpush3.msra.mxu1 %v2688_v8 }
 0x6ff   : > { %7597 = vmatprep.subr.mxu1 %v2885_v23 }
 0x700   : > { %v9727_v61 = vpop.eup %8300 }
 0x701   : > { %2651 = vadd.xlane.f32.xlu1 %v9727_v61 }
 0x741   : > { %v2626_v45 = vpop.xlane.xlu0 %2625 }
 0x742   : > { %8302 = vrcp.f32 %v2626_v45 }
 0x743   : > { %v2624_v7 = vpop.xlane.xlu1 %2623 }
 0x744   : > { %8304 = vrcp.f32 %v2624_v7 }
 0x747   : > { %v2630_v56 = vpop.xlane.xlu0 %2629 }
 0x748   : > { %8306 = vrcp.f32 %v2630_v56 }
 0x74b   : > { %v2628_v33 = vpop.xlane.xlu1 %2627 }
 0x74c   : > { %8308 = vrcp.f32 %v2628_v33 }
 0x74f   : > { %v8303_v49 = vpop.eup %8302  ;;  %v2634_v8 = vpop.xlane.xlu0 %2633 }
 0x750   : > { %v9737_v59 = vmul.f32 %v8303_v49, %v9671_v36  ;;  %v2882_v36 = vld [vmem:[%s11438_s13] sm:$0xff]  ;;  %8310 = vrcp.f32 %v2634_v8 }
 0x751   : > { %v8305_v41 = vpop.eup %8304 }
 0x752   : > { %v9734_v9 = vmul.f32 %v8305_v41, %v9675_v15  ;;  %11535 = vst [vmem:[#allocation25_spill] sm:$0xff] %v9737_v59 }
 0x754   : > { %11534 = vst [vmem:[#allocation24_spill] sm:$0xff] %v9734_v9  ;;  %7573 = vmatprep.mubr.f32.mxu1 %v9734_v9 }
 0x755   : > { %7574 = vmatmul.mubr.f32.vlgmr.msra.gmra.mxu1 %v9737_v59  ;;  %v8307_v58 = vpop.eup %8306 }
 0x756   : > { %7598 = vmatpush3.msra.mxu1 %v2885_v23  ;;  %v9754_v0 = vmul.f32 %v8307_v58, %v9679_v34 }
 0x757   : > { %7599 = vmatprep.subr.mxu1 %v2884_v43 }
 0x758   : > { %7600 = vmatpush3.msra.mxu1 %v2884_v43  ;;  %11537 = vst [vmem:[#allocation27_spill] sm:$0xff] %v9754_v0 }
 0x759   : > { %v8309_v15 = vpop.eup %8308  ;;  %7601 = vmatprep.subr.mxu1 %v2883_v57 }
 0x75a   : > { %v9751_v26 = vmul.f32 %v8309_v15, %v9683_v6  ;;  %7602 = vmatpush3.msra.mxu1 %v2883_v57  ;;  %v2638_v6 = vpop.xlane.xlu0 %2637 }
 0x75b   : > { %7603 = vmatprep.subr.mxu1 %v2882_v36 }
 0x75c   : > { %11536 = vst [vmem:[#allocation26_spill] sm:$0xff] %v9751_v26  ;;  %7576 = vmatprep.mubr.f32.mxu1 %v9751_v26  ;;  %7604 = vmatpush3.msra.mxu1 %v2882_v36 }
 0x75d   : > { %7577 = vmatmul.mubr.f32.gmra.mxu1 %v9754_v0  ;;  %7657 = vmatprep.subr.mxu1 %v9761_v5  ;;  %v8311_v41 = vpop.eup %8310 }
 0x75e   : > { %v2642_v23 = vpop.xlane.xlu0 %2641  ;;  %v9768_v36 = vmul.f32 %v8311_v41, %v9687_v35 }
 0x760   : > { %11539 = vst [vmem:[#allocation29_spill] sm:$0xff] %v9768_v36 }
 0x762   : > { %v2646_v7 = vpop.xlane.xlu0 %2645 }
 0x766   : > { %v2650_v33 = vpop.xlane.xlu0 %2649 }
 0x76a   : > { %v2654_v8 = vpop.xlane.xlu0 %2653 }
 0x776   : > { %v2632_v45 = vpop.xlane.xlu1 %2631 }
 0x777   : > { %8312 = vrcp.f32 %v2632_v45 }
 0x778   : > { %8314 = vrcp.f32 %v2638_v6 }
 0x77a   : > { %v2636_v34 = vpop.xlane.xlu1 %2635 }
 0x77b   : > { %8316 = vrcp.f32 %v2636_v34 }
 0x77c   : > { %8318 = vrcp.f32 %v2642_v23 }
 0x77e   : > { %v2640_v56 = vpop.xlane.xlu1 %2639 }
 0x77f   : > { %8320 = vrcp.f32 %v2640_v56 }
 0x780   : > { %8322 = vrcp.f32 %v2646_v7 }
 0x782   : > { %v2644_v49 = vpop.xlane.xlu1 %2643 }
 0x783   : > { %8324 = vrcp.f32 %v2644_v49 }
 0x784   : > { %v8313_v43 = vpop.eup %8312  ;;  %8326 = vrcp.f32 %v2650_v33 }
 0x785   : > { %v9765_v57 = vmul.f32 %v8313_v43, %v9711_v12  ;;  %v8315_v15 = vpop.eup %8314  ;;  %v9802_v43 = vld [vmem:[%s11437_s12 + $0x8] sm:$0xff] }
 0x786   : > { %v2648_v58 = vpop.xlane.xlu1 %2647  ;;  %v9776_v12 = vmul.f32 %v8315_v15, %v9691_v16  ;;  %7629 = vmatprep.subr.mxu0 %v9802_v43 }
 0x787   : > { %11538 = vst [vmem:[#allocation28_spill] sm:$0xff] %v9765_v57  ;;  %8328 = vrcp.f32 %v2648_v58  ;;  %7579 = vmatprep.mubr.f32.mxu1 %v9765_v57  ;;  %7630 = vmatpush3.msra.mxu0 %v9802_v43 }
 0x788   : > { %v8317_v6 = vpop.eup %8316  ;;  %7580 = vmatmul.mubr.f32.gmra.mxu1 %v9768_v36  ;;  %8330 = vrcp.f32 %v2654_v8  ;;  %11541 = vst [vmem:[#allocation31_spill] sm:$0xff] %v9776_v12 }
 0x789   : > { %v9773_v23 = vmul.f32 %v8317_v6, %v9715_v60  ;;  %v8319_v34 = vpop.eup %8318 }
 0x78a   : > { %v2652_v45 = vpop.xlane.xlu1 %2651  ;;  %v9784_v56 = vmul.f32 %v8319_v34, %v9694_v44 }
 0x78b   : > { %11540 = vst [vmem:[#allocation30_spill] sm:$0xff] %v9773_v23  ;;  %8332 = vrcp.f32 %v2652_v45  ;;  %7582 = vmatprep.mubr.f32.mxu1 %v9773_v23 }
 0x78c   : > { %v8321_v35 = vpop.eup %8320  ;;  %7583 = vmatmul.mubr.f32.gmra.mxu1 %v9776_v12  ;;  %11543 = vst [vmem:[#allocation33_spill] sm:$0xff] %v9784_v56 }
 0x78d   : > { %v9781_v7 = vmul.f32 %v8321_v35, %v9718_v50  ;;  %v8323_v60 = vpop.eup %8322 }
 0x78e   : > { %v9792_v49 = vmul.f32 %v8323_v60, %v9697_v63 }
 0x78f   : > { %11542 = vst [vmem:[#allocation32_spill] sm:$0xff] %v9781_v7  ;;  %7585 = vmatprep.mubr.f32.mxu1 %v9781_v7 }
 0x790   : > { %v8325_v33 = vpop.eup %8324  ;;  %7586 = vmatmul.mubr.f32.gmra.mxu1 %v9784_v56  ;;  %11545 = vst [vmem:[#allocation35_spill] sm:$0xff] %v9792_v49 }
 0x791   : > { %v9789_v16 = vmul.f32 %v8325_v33, %v9721_v29  ;;  %v8327_v41 = vpop.eup %8326 }
 0x792   : > { %v9805_v29 = vmul.f32 %v8327_v41, %v9700_v25 }
 0x793   : > { %11544 = vst [vmem:[#allocation34_spill] sm:$0xff] %v9789_v16  ;;  %7588 = vmatprep.mubr.f32.mxu1 %v9789_v16 }
 0x794   : > { %v8329_v50 = vpop.eup %8328  ;;  %7589 = vmatmul.mubr.f32.gmra.mxu1 %v9792_v49  ;;  %11547 = vst [vmem:[#allocation37_spill] sm:$0xff] %v9805_v29 }
 0x795   : > { %v9797_v44 = vmul.f32 %v8329_v50, %v9724_v13  ;;  %v8331_v63 = vpop.eup %8330  ;;  %v9813_v13 = vld [vmem:[%s11437_s12] sm:$0xff] }
 0x796   : > { %7631 = vmatprep.subr.mxu0 %v9813_v13  ;;  %v9822_v15 = vmul.f32 %v8331_v63, %v9703_v11  ;;  %v8463_v11 = vld [vmem:[%s11435_s10 + $0x10] sm:$0xff] }
 0x797   : > { %11546 = vst [vmem:[#allocation36_spill] sm:$0xff] %v9797_v44  ;;  %7591 = vmatprep.mubr.f32.mxu1 %v9797_v44  ;;  %7632 = vmatpush3.msra.mxu0 %v9813_v13 }
 0x798   : > { %v8333_v58 = vpop.eup %8332  ;;  %7592 = vmatmul.mubr.f32.gmra.mxu1 %v9805_v29  ;;  %11549 = vst [vmem:[#allocation39_spill] sm:$0xff] %v9822_v15 }
 0x799   : > { %v9818_v25 = vmul.f32 %v8333_v58, %v9727_v61  ;;  %v8464_v61 = vld [vmem:[%s11435_s10 + $0x8] sm:$0xff] }
 0x79b   : > { %11548 = vst [vmem:[#allocation38_spill] sm:$0xff] %v9818_v25  ;;  %7594 = vmatprep.mubr.f32.mxu1 %v9818_v25 }
 0x79c   : > { %7595 = vmatmul.mubr.f32.gmra.mxu1 %v9822_v15 }
 0x79d   : > { %7605 = vmatprep.mubr.msk.f32.mxu1 %vm1392_vm3, %v9265_v48 }
 0x7a0   : > { %7606 = vmatmul.mubr.msk.f32.vlgmr.msra.gmra.mxu1 %vm1392_vm3, %v9263_v40 }
 0x7a1   : > { %7608 = vmatprep.mubr.msk.f32.mxu1 %vm1392_vm3, %v9273_v2  ;;  %7658 = vmatpush3.msra.mxu1 %v9761_v5  ;;  %v8465_v5 = vld [vmem:[%s11435_s10] sm:$0xff] }
 0x7a2   : > { %7659 = vmatprep.subr.mxu1 %v8463_v11 }
 0x7a3   : > { %7660 = vmatpush3.msra.mxu1 %v8463_v11 }
 0x7a4   : > { %7609 = vmatmul.mubr.msk.f32.gmra.mxu1 %vm1392_vm3, %v9269_v30  ;;  %7661 = vmatprep.subr.mxu1 %v8464_v61 }
 0x7a5   : > { %7611 = vmatprep.mubr.msk.f32.mxu1 %vm1392_vm3, %v9281_v19  ;;  %7662 = vmatpush3.msra.mxu1 %v8464_v61 }
 0x7a6   : > { %7663 = vmatprep.subr.mxu1 %v8465_v5 }
 0x7a7   : > { %7664 = vmatpush3.msra.mxu1 %v8465_v5 }
 0x7a8   : > { %7612 = vmatmul.mubr.msk.f32.gmra.mxu1 %vm1392_vm3, %v9277_v38 }
 0x7a9   : > { %7614 = vmatprep.mubr.msk.f32.mxu1 %vm1392_vm3, %v9289_v46 }
 0x7ac   : > { %7615 = vmatmul.mubr.msk.f32.gmra.mxu1 %vm1392_vm3, %v9285_v51 }
 0x7ad   : > { %7617 = vmatprep.mubr.msk.f32.mxu1 %vm1392_vm3, %v9297_v20 }
 0x7b0   : > { %7618 = vmatmul.mubr.msk.f32.gmra.mxu1 %vm1392_vm3, %v9293_v22 }
 0x7b1   : > { %7620 = vmatprep.mubr.msk.f32.mxu1 %vm1392_vm3, %v9305_v39 }
 0x7b4   : > { %7621 = vmatmul.mubr.msk.f32.gmra.mxu1 %vm1392_vm3, %v9301_v55 }
 0x7b5   : > { %7623 = vmatprep.mubr.msk.f32.mxu1 %vm1392_vm3, %v9313_v21 }
 0x7b8   : > { %7624 = vmatmul.mubr.msk.f32.gmra.mxu1 %vm1392_vm3, %v9311_v54 }
 0x7b9   : > { %7626 = vmatprep.mubr.msk.f32.mxu1 %vm1392_vm3, %v9319_v28 }
 0x7bc   : > { %7627 = vmatmul.mubr.msk.f32.gmra.mxu1 %vm1392_vm3, %v9321_v24 }
 0x815   : > { %v7575_v8 = vpop.f32.mrf.mxu1 }
 0x817   : > { %v2801_v6 = vpop.f32.mrf.mxu1 }
 0x818   : > { %7633 = vmatprep.mubr.msk.f32.mxu0 %vm869_vm0, %v2801_v6 }
 0x819   : > { %7634 = vmatmul.mubr.msk.f32.vlgmr.msra.gmra.mxu0 %vm869_vm0, %v7575_v8 }
 0x81d   : > { %v7578_v45 = vpop.f32.mrf.mxu1 }
 0x81f   : > { %v2811_v34 = vpop.f32.mrf.mxu1 }
 0x820   : > { %7636 = vmatprep.mubr.msk.f32.mxu0 %vm869_vm0, %v2811_v34 }
 0x821   : > { %7637 = vmatmul.mubr.msk.f32.gmra.mxu0 %vm869_vm0, %v7578_v45 }
 0x848   : > { %v7581_v35 = vpop.f32.mrf.mxu1 }
 0x84a   : > { %v2821_v60 = vpop.f32.mrf.mxu1 }
 0x84b   : > { %7639 = vmatprep.mubr.msk.f32.mxu0 %vm869_vm0, %v2821_v60 }
 0x84c   : > { %v7584_v33 = vpop.f32.mrf.mxu1  ;;  %7640 = vmatmul.mubr.msk.f32.gmra.mxu0 %vm869_vm0, %v7581_v35  ;;  %v9887_v35 = vld [vmem:[%s11439_s14] ss:$0 sm:$0xff] }
 0x84e   : > { %v2831_v41 = vpop.f32.mrf.mxu1 }
 0x84f   : > { %7642 = vmatprep.mubr.msk.f32.mxu0 %vm869_vm0, %v2831_v41 }
 0x850   : > { %v7587_v50 = vpop.f32.mrf.mxu1  ;;  %7643 = vmatmul.mubr.msk.f32.gmra.mxu0 %vm869_vm0, %v7584_v33 }
 0x852   : > { %v2841_v63 = vpop.f32.mrf.mxu1 }
 0x853   : > { %7645 = vmatprep.mubr.msk.f32.mxu0 %vm869_vm0, %v2841_v63 }
 0x854   : > { %v7590_v58 = vpop.f32.mrf.mxu1  ;;  %7646 = vmatmul.mubr.msk.f32.gmra.mxu0 %vm869_vm0, %v7587_v50 }
 0x856   : > { %v2851_v11 = vpop.f32.mrf.mxu1 }
 0x857   : > { %7648 = vmatprep.mubr.msk.f32.mxu0 %vm869_vm0, %v2851_v11 }
 0x858   : > { %v7593_v61 = vpop.f32.mrf.mxu1  ;;  %7649 = vmatmul.mubr.msk.f32.gmra.mxu0 %vm869_vm0, %v7590_v58 }
 0x85a   : > { %v2861_v5 = vpop.f32.mrf.mxu1 }
 0x85b   : > { %7651 = vmatprep.mubr.msk.f32.mxu0 %vm869_vm0, %v2861_v5 }
 0x85c   : > { %v7596_v8 = vpop.f32.mrf.mxu1  ;;  %7652 = vmatmul.mubr.msk.f32.gmra.mxu0 %vm869_vm0, %v7593_v61 }
 0x85e   : > { %v2871_v6 = vpop.f32.mrf.mxu1 }
 0x85f   : > { %7654 = vmatprep.mubr.msk.f32.mxu0 %vm869_vm0, %v2871_v6 }
 0x860   : > { %7655 = vmatmul.mubr.msk.f32.gmra.mxu0 %vm869_vm0, %v7596_v8  ;;  %v7607_v45 = vpop.f32.mrf.mxu1 }
 0x862   : > { %v2952_v33 = vpop.f32.mrf.mxu1 }
 0x864   : > { %v7610_v11 = vpop.f32.mrf.mxu1 }
 0x866   : > { %v2962_v40 = vpop.f32.mrf.mxu1 }
 0x8d9   : > { %v7635_v34 = vpop.f32.mrf.mxu0 }
 0x8da   : > { %v3151_v60 = vadd.f32 %v7635_v34, %v7607_v45 }
 0x8db   : > { %v3145_v41 = vpop.f32.mrf.mxu0 }
 0x8dc   : > { %v3232_v50 = vadd.f32 %v9887_v35, %v3151_v60  ;;  %v3146_v63 = vadd.f32 %v3145_v41, %v2952_v33 }
 0x8de   : > { %v3231_v58 = vadd.f32 %v9887_v35, %v3146_v63  ;;  %v3264_v61 = vmul.f32 0.01, %v3232_v50  ;;  %vm3248_vm6 = vcmp.ge.f32.partialorder %v3232_v50, 0.0 }
 0x8e0   : > { %v3263_v5 = vmul.f32 0.01, %v3231_v58  ;;  %vm3247_vm5 = vcmp.ge.f32.partialorder %v3231_v58, 0.0  ;;  %v9893_v2 = vsel %vm3248_vm6, %v3232_v50, %v3264_v61 }
 0x8e1   : > { %v7638_v8 = vpop.f32.mrf.mxu0 }
 0x8e2   : > { %v3161_v6 = vadd.f32 %v7638_v8, %v7610_v11  ;;  %v9891_v48 = vsel %vm3247_vm5, %v3231_v58, %v3263_v5 }
 0x8e3   : > { %v3155_v45 = vpop.f32.mrf.mxu0  ;;  %7665 = vmatprep.mubr.msk.f32.mxu1 %vm1392_vm3, %v9891_v48 }
 0x8e4   : > { %v3234_v34 = vadd.f32 %v9887_v35, %v3161_v6  ;;  %v3156_v60 = vadd.f32 %v3155_v45, %v2962_v40  ;;  %7666 = vmatmul.mubr.msk.f32.vlgmr.msra.gmra.mxu1 %vm1392_vm3, %v9893_v2  ;;  %v7613_v40 = vpop.f32.mrf.mxu1 }
 0x8e6   : > { %v3233_v33 = vadd.f32 %v9887_v35, %v3156_v60  ;;  %v3266_v41 = vmul.f32 0.01, %v3234_v34  ;;  %vm3250_vm5 = vcmp.ge.f32.partialorder %v3234_v34, 0.0  ;;  %v2972_v11 = vpop.f32.mrf.mxu1 }
 0x8e8   : > { %v3265_v63 = vmul.f32 0.01, %v3233_v33  ;;  %vm3249_vm2 = vcmp.ge.f32.partialorder %v3233_v33, 0.0  ;;  %v9905_v50 = vsel %vm3250_vm5, %v3234_v34, %v3266_v41  ;;  %v7616_v61 = vpop.f32.mrf.mxu1 }
 0x8ea   : > { %v9901_v58 = vsel %vm3249_vm2, %v3233_v33, %v3265_v63  ;;  %v2982_v5 = vpop.f32.mrf.mxu1 }
 0x8eb   : > { %7668 = vmatprep.mubr.msk.f32.mxu1 %vm1392_vm3, %v9901_v58 }
 0x8ec   : > { %7669 = vmatmul.mubr.msk.f32.gmra.mxu1 %vm1392_vm3, %v9905_v50  ;;  %v7619_v8 = vpop.f32.mrf.mxu1 }
 0x8ee   : > { %v2992_v6 = vpop.f32.mrf.mxu1 }
 0x8f0   : > { %v7622_v30 = vpop.f32.mrf.mxu1 }
 0x8f2   : > { %v3002_v46 = vpop.f32.mrf.mxu1 }
 0x90c   : > { %v7641_v45 = vpop.f32.mrf.mxu0 }
 0x90d   : > { %v3171_v60 = vadd.f32 %v7641_v45, %v7613_v40 }
 0x90e   : > { %v3165_v19 = vpop.f32.mrf.mxu0 }
 0x90f   : > { %v3236_v33 = vadd.f32 %v9887_v35, %v3171_v60  ;;  %v3166_v63 = vadd.f32 %v3165_v19, %v2972_v11  ;;  %v7625_v19 = vpop.f32.mrf.mxu1 }
 0x910   : > { %v7644_v38 = vpop.f32.mrf.mxu0 }
 0x911   : > { %v3235_v34 = vadd.f32 %v9887_v35, %v3166_v63  ;;  %v3181_v41 = vadd.f32 %v7644_v38, %v7616_v61  ;;  %v3268_v51 = vmul.f32 0.01, %v3236_v33  ;;  %vm3252_vm2 = vcmp.ge.f32.partialorder %v3236_v33, 0.0 }
 0x912   : > { %v3175_v20 = vpop.f32.mrf.mxu0 }
 0x913   : > { %v3267_v22 = vmul.f32 0.01, %v3235_v34  ;;  %v3238_v39 = vadd.f32 %v9887_v35, %v3181_v41  ;;  %v3176_v55 = vadd.f32 %v3175_v20, %v2982_v5  ;;  %vm3251_vm6 = vcmp.ge.f32.partialorder %v3235_v34, 0.0 }
 0x914   : > { %v7647_v21 = vpop.f32.mrf.mxu0  ;;  %v9917_v38 = vsel %vm3252_vm2, %v3236_v33, %v3268_v51 }
 0x915   : > { %v3237_v40 = vadd.f32 %v9887_v35, %v3176_v55  ;;  %v3191_v45 = vadd.f32 %v7647_v21, %v7619_v8  ;;  %v9913_v54 = vsel %vm3251_vm6, %v3235_v34, %v3267_v22  ;;  %v3270_v11 = vmul.f32 0.01, %v3238_v39  ;;  %v3012_v8 = vpop.f32.mrf.mxu1 }
 0x916   : > { %v3185_v60 = vpop.f32.mrf.mxu0  ;;  %7671 = vmatprep.mubr.msk.f32.mxu1 %vm1392_vm3, %v9913_v54  ;;  %vm3254_vm5 = vcmp.ge.f32.partialorder %v3238_v39, 0.0 }
 0x917   : > { %v3269_v61 = vmul.f32 0.01, %v3237_v40  ;;  %v3240_v63 = vadd.f32 %v9887_v35, %v3191_v45  ;;  %v3186_v20 = vadd.f32 %v3185_v60, %v2992_v6  ;;  %7672 = vmatmul.mubr.msk.f32.gmra.mxu1 %vm1392_vm3, %v9917_v38  ;;  %vm3253_vm1 = vcmp.ge.f32.partialorder %v3237_v40, 0.0 }
 0x918   : > { %v7650_v55 = vpop.f32.mrf.mxu0  ;;  %v9927_v51 = vsel %vm3254_vm5, %v3238_v39, %v3270_v11 }
 0x919   : > { %v3239_v22 = vadd.f32 %v9887_v35, %v3186_v20  ;;  %v3201_v21 = vadd.f32 %v7650_v55, %v7622_v30  ;;  %v9923_v5 = vsel %vm3253_vm1, %v3237_v40, %v3269_v61  ;;  %v3272_v34 = vmul.f32 0.01, %v3240_v63  ;;  %v7628_v20 = vpop.f32.mrf.mxu1 }
 0x91a   : > { %v3195_v41 = vpop.f32.mrf.mxu0  ;;  %7674 = vmatprep.mubr.msk.f32.mxu1 %vm1392_vm3, %v9923_v5  ;;  %vm3256_vm2 = vcmp.ge.f32.partialorder %v3240_v63, 0.0 }
 0x91b   : > { %v3271_v6 = vmul.f32 0.01, %v3239_v22  ;;  %v3242_v33 = vadd.f32 %v9887_v35, %v3201_v21  ;;  %v3196_v45 = vadd.f32 %v3195_v41, %v3002_v46  ;;  %7675 = vmatmul.mubr.msk.f32.gmra.mxu1 %vm1392_vm3, %v9927_v51  ;;  %vm3255_vm6 = vcmp.ge.f32.partialorder %v3239_v22, 0.0 }
 0x91c   : > { %v7653_v30 = vpop.f32.mrf.mxu0  ;;  %v9937_v39 = vsel %vm3256_vm2, %v3240_v63, %v3272_v34 }
 0x91d   : > { %v3241_v40 = vadd.f32 %v9887_v35, %v3196_v45  ;;  %v3211_v60 = vadd.f32 %v7653_v30, %v7625_v19  ;;  %v9933_v61 = vsel %vm3255_vm6, %v3239_v22, %v3271_v6  ;;  %v3274_v55 = vmul.f32 0.01, %v3242_v33  ;;  %v3022_v45 = vpop.f32.mrf.mxu1 }
 0x91e   : > { %v3205_v28 = vpop.f32.mrf.mxu0  ;;  %7677 = vmatprep.mubr.msk.f32.mxu1 %vm1392_vm3, %v9933_v61  ;;  %vm3258_vm1 = vcmp.ge.f32.partialorder %v3242_v33, 0.0 }
 0x91f   : > { %v3273_v46 = vmul.f32 0.01, %v3241_v40  ;;  %v3244_v11 = vadd.f32 %v9887_v35, %v3211_v60  ;;  %v3206_v21 = vadd.f32 %v3205_v28, %v3012_v8  ;;  %7678 = vmatmul.mubr.msk.f32.gmra.mxu1 %vm1392_vm3, %v9937_v39  ;;  %vm3257_vm5 = vcmp.ge.f32.partialorder %v3241_v40, 0.0 }
 0x920   : > { %v7656_v19 = vpop.f32.mrf.mxu0  ;;  %v9947_v63 = vsel %vm3258_vm1, %v3242_v33, %v3274_v55 }
 0x921   : > { %v3243_v22 = vadd.f32 %v9887_v35, %v3206_v21  ;;  %v3221_v41 = vadd.f32 %v7656_v19, %v7628_v20  ;;  %v9943_v6 = vsel %vm3257_vm5, %v3241_v40, %v3273_v46  ;;  %v3276_v30 = vmul.f32 0.01, %v3244_v11 }
 0x922   : > { %v3215_v15 = vpop.f32.mrf.mxu0  ;;  %7680 = vmatprep.mubr.msk.f32.mxu1 %vm1392_vm3, %v9943_v6  ;;  %vm3260_vm2 = vcmp.ge.f32.partialorder %v3244_v11, 0.0 }
 0x923   : > { %v3275_v28 = vmul.f32 0.01, %v3243_v22  ;;  %v3246_v8 = vadd.f32 %v9887_v35, %v3221_v41  ;;  %v3216_v34 = vadd.f32 %v3215_v15, %v3022_v45  ;;  %7681 = vmatmul.mubr.msk.f32.gmra.mxu1 %vm1392_vm3, %v9947_v63  ;;  %vm3259_vm6 = vcmp.ge.f32.partialorder %v3243_v22, 0.0 }
 0x924   : > { %v9957_v46 = vsel %vm3260_vm2, %v3244_v11, %v3276_v30  ;;  %v8466_v11 = vld [vmem:[%s11436_s11] ss:$0 sm:$0xff]  ;;  %vm11550_vm2 = vcmp.gt.f32.partialorder %v9591_v3, 0.5 }
 0x925   : > { %v3245_v40 = vadd.f32 %v9887_v35, %v3216_v34  ;;  %v9953_v60 = vsel %vm3259_vm6, %v3243_v22, %v3275_v28  ;;  %v3278_v20 = vmul.f32 0.01, %v3246_v8  ;;  %vm3262_vm5 = vcmp.ge.f32.partialorder %v3246_v8, 0.0 }
 0x926   : > { %7683 = vmatprep.mubr.msk.f32.mxu1 %vm1392_vm3, %v9953_v60  ;;  %vm11551_vm6 = vcmp.gt.f32.partialorder %v9597_v47, 0.5 }
 0x927   : > { %v3277_v33 = vmul.f32 0.01, %v3245_v40  ;;  %7684 = vmatmul.mubr.msk.f32.gmra.mxu1 %vm1392_vm3, %v9957_v46  ;;  %vm3261_vm1 = vcmp.ge.f32.partialorder %v3245_v40, 0.0  ;;  %v9965_v35 = vsel %vm3262_vm5, %v3246_v8, %v3278_v20  ;;  %vm11553_vm5 = vcmp.gt.f32.partialorder %v9621_v27, 0.5 }
 0x929   : > { %v9961_v15 = vsel %vm3261_vm1, %v3245_v40, %v3277_v33  ;;  %vm11552_vm1 = vcmp.gt.f32.partialorder %v9608_v53, 0.5 }
 0x92a   : > { %7686 = vmatprep.mubr.msk.f32.mxu1 %vm1392_vm3, %v9961_v15 }
 0x92b   : > { %7687 = vmatmul.mubr.msk.f32.gmra.mxu1 %vm1392_vm3, %v9965_v35 }
 0x9a4   : > { %v7667_v55 = vpop.f32.mrf.mxu1 }
 0x9a6   : > { %v3409_v21 = vpop.f32.mrf.mxu1 }
 0x9a7   : > { %v9972_v19 = vadd.f32 %v8466_v11, %v3409_v21 }
 0x9a9   : > { %7721 = vmatprep.mubr.msk.f32.mxu0 %vm869_vm0, %v9972_v19 }
 0x9ac   : > { %v7670_v22 = vpop.f32.mrf.mxu1 }
 0x9ae   : > { %v3419_v41 = vpop.f32.mrf.mxu1 }
 0x9d7   : > { %v7673_v45 = vpop.f32.mrf.mxu1 }
 0x9d9   : > { %v3429_v30 = vpop.f32.mrf.mxu1 }
 0x9db   : > { %v7676_v28 = vpop.f32.mrf.mxu1 }
 0x9dd   : > { %v3439_v8 = vpop.f32.mrf.mxu1 }
 0x9df   : > { %v7679_v34 = vpop.f32.mrf.mxu1 }
 0x9e1   : > { %v3449_v40 = vpop.f32.mrf.mxu1 }
 0x9e3   : > { %v7682_v20 = vpop.f32.mrf.mxu1 }
 0x9e4   : > { %v9986_v59 = vadd.f32 %v8466_v11, %v7682_v20  ;;  %v10002_v20 = vadd.f32 %v8466_v11, %v7676_v28  ;;  %v10018_v28 = vadd.f32 %v8466_v11, %v7670_v22 }
 0x9e5   : > { %v3459_v33 = vpop.f32.mrf.mxu1 }
 0x9e7   : > { %v7685_v29 = vpop.f32.mrf.mxu1 }
 0x9e8   : > { %v9982_v0 = vadd.f32 %v8466_v11, %v7685_v29  ;;  %v9998_v29 = vadd.f32 %v8466_v11, %v3459_v33  ;;  %v10014_v33 = vadd.f32 %v8466_v11, %v3439_v8  ;;  %v10030_v8 = vadd.f32 %v8466_v11, %v3419_v41 }
 0x9e9   : > { %v3469_v49 = vpop.f32.mrf.mxu1 }
 0x9ea   : > { %v9990_v25 = vadd.f32 %v8466_v11, %v3469_v49  ;;  %v10006_v49 = vadd.f32 %v8466_v11, %v3449_v40  ;;  %v10022_v40 = vadd.f32 %v8466_v11, %v3429_v30 }
 0x9eb   : > { %v7688_v56 = vpop.f32.mrf.mxu1 }
 0x9ec   : > { %v9976_v12 = vadd.f32 %v8466_v11, %v7688_v56  ;;  %v9994_v56 = vadd.f32 %v8466_v11, %v7679_v34  ;;  %v10010_v34 = vadd.f32 %v8466_v11, %v7673_v45  ;;  %v10026_v45 = vadd.f32 %v8466_v11, %v7667_v55 }
 0x9ed   : > { %v3479_v21 = vpop.f32.mrf.mxu1 }
 0x9ee   : > { %v9978_v36 = vadd.f32 %v8466_v11, %v3479_v21  ;;  %3534 = vrot.lane.b32.xlu1 %v9976_v12, %s8559_s24 }
 0x9f0   : > { %3532 = vrot.lane.b32.xlu0 %v9978_v36, %s8559_s24 }
 0x9f2   : > { %3530 = vrot.lane.b32.xlu1 %v9982_v0, %s8559_s24 }
 0x9f4   : > { %3526 = vrot.lane.b32.xlu0 %v9986_v59, %s8559_s24 }
 0x9f6   : > { %3528 = vrot.lane.b32.xlu1 %v9990_v25, %s8559_s24 }
 0x9f8   : > { %3522 = vrot.lane.b32.xlu0 %v9994_v56, %s8559_s24 }
 0x9fa   : > { %3524 = vrot.lane.b32.xlu1 %v9998_v29, %s8559_s24 }
 0x9fc   : > { %3518 = vrot.lane.b32.xlu0 %v10002_v20, %s8559_s24 }
 0x9fe   : > { %3520 = vrot.lane.b32.xlu1 %v10006_v49, %s8559_s24 }
 0xa00   : > { %3514 = vrot.lane.b32.xlu0 %v10010_v34, %s8559_s24 }
 0xa02   : > { %3516 = vrot.lane.b32.xlu1 %v10014_v33, %s8559_s24 }
 0xa04   : > { %3510 = vrot.lane.b32.xlu0 %v10018_v28, %s8559_s24 }
 0xa06   : > { %3512 = vrot.lane.b32.xlu1 %v10022_v40, %s8559_s24 }
 0xa08   : > { %3506 = vrot.lane.b32.xlu0 %v10026_v45, %s8559_s24 }
 0xa0a   : > { %3508 = vrot.lane.b32.xlu1 %v10030_v8, %s8559_s24 }
 0xa0c   : > { %3945 = vrot.lane.b32.xlu0 %v9990_v25, %s8558_s3 }
 0xa0e   : > { %3504 = vrot.lane.b32.xlu1 %v9972_v19, %s8559_s24 }
 0xa10   : > { %3941 = vrot.lane.b32.xlu0 %v9998_v29, %s8558_s3 }
 0xa12   : > { %3951 = vrot.lane.b32.xlu1 %v9976_v12, %s8558_s3 }
 0xa14   : > { %3937 = vrot.lane.b32.xlu0 %v10006_v49, %s8558_s3 }
 0xa16   : > { %3947 = vrot.lane.b32.xlu1 %v9982_v0, %s8558_s3 }
 0xa18   : > { %3949 = vrot.lane.b32.xlu0 %v9978_v36, %s8558_s3 }
 0xa1a   : > { %3943 = vrot.lane.b32.xlu1 %v9986_v59, %s8558_s3 }
 0xa1c   : > { %3933 = vrot.lane.b32.xlu0 %v10014_v33, %s8558_s3 }
 0xa1e   : > { %3939 = vrot.lane.b32.xlu1 %v9994_v56, %s8558_s3 }
 0xa60   : > { %v3535_v55 = vpop.permute.xlu1 %3534 }
 0xa61   : > { %7689 = vmatprep.subr.msk.mxu0 %vm869_vm0, %v3535_v55 }
 0xa62   : > { %7690 = vmatpush3.xpose.msk.msra.mxu0 %vm869_vm0, %v3535_v55  ;;  %v3533_v11 = vpop.permute.xlu0 %3532 }
 0xa63   : > { %7691 = vmatprep.subr.msk.mxu0 %vm869_vm0, %v3533_v11 }
 0xa64   : > { %v3531_v22 = vpop.permute.xlu1 %3530 }
 0xa66   : > { %7692 = vmatpush3.xpose.msk.msra.mxu0 %vm869_vm0, %v3533_v11  ;;  %v3527_v41 = vpop.permute.xlu0 %3526 }
 0xa67   : > { %7693 = vmatprep.subr.msk.mxu0 %vm869_vm0, %v3531_v22 }
 0xa68   : > { %v3529_v30 = vpop.permute.xlu1 %3528 }
 0xa6a   : > { %7694 = vmatpush3.xpose.msk.msra.mxu0 %vm869_vm0, %v3531_v22  ;;  %v3523_v21 = vpop.permute.xlu0 %3522 }
 0xa6b   : > { %7695 = vmatprep.subr.msk.mxu0 %vm869_vm0, %v3529_v30 }
 0xa6c   : > { %v3525_v44 = vpop.permute.xlu1 %3524 }
 0xa6e   : > { %7696 = vmatpush3.xpose.msk.msra.mxu0 %vm869_vm0, %v3529_v30  ;;  %v3519_v16 = vpop.permute.xlu0 %3518 }
 0xa6f   : > { %7697 = vmatprep.subr.msk.mxu0 %vm869_vm0, %v3527_v41 }
 0xa70   : > { %v3521_v55 = vpop.permute.xlu1 %3520 }
 0xa72   : > { %7698 = vmatpush3.xpose.msk.msra.mxu0 %vm869_vm0, %v3527_v41  ;;  %v3515_v7 = vpop.permute.xlu0 %3514 }
 0xa73   : > { %7699 = vmatprep.subr.msk.mxu0 %vm869_vm0, %v3525_v44 }
 0xa74   : > { %v3517_v11 = vpop.permute.xlu1 %3516 }
 0xa76   : > { %7700 = vmatpush3.xpose.msk.msra.mxu0 %vm869_vm0, %v3525_v44  ;;  %v3511_v24 = vpop.permute.xlu0 %3510 }
 0xa77   : > { %7701 = vmatprep.subr.msk.mxu0 %vm869_vm0, %v3523_v21 }
 0xa78   : > { %v3513_v22 = vpop.permute.xlu1 %3512 }
 0xa7a   : > { %7702 = vmatpush3.xpose.msk.msra.mxu0 %vm869_vm0, %v3523_v21  ;;  %v3507_v23 = vpop.permute.xlu0 %3506 }
 0xa7b   : > { %7703 = vmatprep.subr.msk.mxu0 %vm869_vm0, %v3521_v55 }
 0xa7c   : > { %v3509_v30 = vpop.permute.xlu1 %3508 }
 0xa7e   : > { %7704 = vmatpush3.xpose.msk.msra.mxu0 %vm869_vm0, %v3521_v55  ;;  %v3946_v57 = vpop.permute.xlu0 %3945 }
 0xa7f   : > { %7705 = vmatprep.subr.msk.mxu0 %vm869_vm0, %v3519_v16 }
 0xa80   : > { %v3505_v41 = vpop.permute.xlu1 %3504 }
 0xa82   : > { %7706 = vmatpush3.xpose.msk.msra.mxu0 %vm869_vm0, %v3519_v16  ;;  %v3942_v26 = vpop.permute.xlu0 %3941 }
 0xa83   : > { %7707 = vmatprep.subr.msk.mxu0 %vm869_vm0, %v3517_v11 }
 0xa84   : > { %v3952_v44 = vpop.permute.xlu1 %3951 }
 0xa85   : > { %7745 = vmatprep.subr.mxu1 %v3952_v44 }
 0xa86   : > { %7708 = vmatpush3.xpose.msk.msra.mxu0 %vm869_vm0, %v3517_v11  ;;  %7746 = vmatpush3.msra.mxu1 %v3952_v44  ;;  %v3938_v21 = vpop.permute.xlu0 %3937 }
 0xa87   : > { %7709 = vmatprep.subr.msk.mxu0 %vm869_vm0, %v3515_v7 }
 0xa88   : > { %v3948_v9 = vpop.permute.xlu1 %3947 }
 0xa8a   : > { %7710 = vmatpush3.xpose.msk.msra.mxu0 %vm869_vm0, %v3515_v7  ;;  %v3950_v55 = vpop.permute.xlu0 %3949 }
 0xa8b   : > { %7711 = vmatprep.subr.msk.mxu0 %vm869_vm0, %v3513_v22  ;;  %7747 = vmatprep.subr.mxu1 %v3950_v55 }
 0xa8c   : > { %7748 = vmatpush3.msra.mxu1 %v3950_v55  ;;  %v3944_v16 = vpop.permute.xlu1 %3943 }
 0xa8d   : > { %7749 = vmatprep.subr.mxu1 %v3948_v9 }
 0xa8e   : > { %7712 = vmatpush3.xpose.msk.msra.mxu0 %vm869_vm0, %v3513_v22  ;;  %7750 = vmatpush3.msra.mxu1 %v3948_v9 }
 0xa8f   : > { %7713 = vmatprep.subr.msk.mxu0 %vm869_vm0, %v3511_v24  ;;  %7751 = vmatprep.subr.mxu1 %v3946_v57 }
 0xa90   : > { %7752 = vmatpush3.msra.mxu1 %v3946_v57  ;;  %v3940_v7 = vpop.permute.xlu1 %3939 }
 0xa91   : > { %7753 = vmatprep.subr.mxu1 %v3944_v16 }
 0xa92   : > { %7714 = vmatpush3.xpose.msk.msra.mxu0 %vm869_vm0, %v3511_v24  ;;  %7754 = vmatpush3.msra.mxu1 %v3944_v16 }
 0xa93   : > { %7715 = vmatprep.subr.msk.mxu0 %vm869_vm0, %v3509_v30  ;;  %7755 = vmatprep.subr.mxu1 %v3942_v26 }
 0xa94   : > { %7756 = vmatpush3.msra.mxu1 %v3942_v26 }
 0xa95   : > { %7757 = vmatprep.subr.mxu1 %v3940_v7 }
 0xa96   : > { %7716 = vmatpush3.xpose.msk.msra.mxu0 %vm869_vm0, %v3509_v30  ;;  %7758 = vmatpush3.msra.mxu1 %v3940_v7 }
 0xa97   : > { %7717 = vmatprep.subr.msk.mxu0 %vm869_vm0, %v3507_v23  ;;  %7759 = vmatprep.subr.mxu1 %v3938_v21 }
 0xa98   : > { %7760 = vmatpush3.msra.mxu1 %v3938_v21 }
 0xa9a   : > { %7718 = vmatpush3.xpose.msk.msra.mxu0 %vm869_vm0, %v3507_v23 }
 0xa9b   : > { %7719 = vmatprep.subr.msk.mxu0 %vm869_vm0, %v3505_v41 }
 0xa9e   : > { %7720 = vmatpush3.xpose.msk.msra.mxu0 %vm869_vm0, %v3505_v41 }
 0xa9f   : > { %7833 = vmatprep.subr.mxu0 %v9802_v43 }
 0xaa1   : > { %7722 = vmatmul.mubr.msk.f32.vlgmr.msra.gmra.mxu0 %vm869_vm0, %v10026_v45 }
 0xaa2   : > { %7724 = vmatprep.mubr.msk.f32.mxu0 %vm869_vm0, %v10030_v8  ;;  %7834 = vmatpush3.msra.mxu0 %v9802_v43 }
 0xaa3   : > { %7835 = vmatprep.subr.mxu0 %v9813_v13 }
 0xaa4   : > { %7836 = vmatpush3.msra.mxu0 %v9813_v13 }
 0xaa5   : > { %7725 = vmatmul.mubr.msk.f32.gmra.mxu0 %vm869_vm0, %v10018_v28 }
 0xaa6   : > { %7727 = vmatprep.mubr.msk.f32.mxu0 %vm869_vm0, %v10022_v40 }
 0xaa9   : > { %7728 = vmatmul.mubr.msk.f32.gmra.mxu0 %vm869_vm0, %v10010_v34 }
 0xaaa   : > { %7730 = vmatprep.mubr.msk.f32.mxu0 %vm869_vm0, %v10014_v33 }
 0xaad   : > { %7731 = vmatmul.mubr.msk.f32.gmra.mxu0 %vm869_vm0, %v10002_v20 }
 0xaae   : > { %7733 = vmatprep.mubr.msk.f32.mxu0 %vm869_vm0, %v10006_v49 }
 0xab1   : > { %7734 = vmatmul.mubr.msk.f32.gmra.mxu0 %vm869_vm0, %v9994_v56 }
 0xab2   : > { %7736 = vmatprep.mubr.msk.f32.mxu0 %vm869_vm0, %v9998_v29 }
 0xab5   : > { %7737 = vmatmul.mubr.msk.f32.gmra.mxu0 %vm869_vm0, %v9986_v59 }
 0xab6   : > { %7739 = vmatprep.mubr.msk.f32.mxu0 %vm869_vm0, %v9990_v25 }
 0xab9   : > { %7740 = vmatmul.mubr.msk.f32.gmra.mxu0 %vm869_vm0, %v9982_v0 }
 0xaba   : > { %7742 = vmatprep.mubr.msk.f32.mxu0 %vm869_vm0, %v9978_v36 }
 0xabd   : > { %7743 = vmatmul.mubr.msk.f32.gmra.mxu0 %vm869_vm0, %v9976_v12 }
 0xb61   : > { %v7723_v24 = vpop.f32.mrf.mxu0 }
 0xb62   : > { %v3746_v9 = vmul.f32 0.25, %v7723_v24 }
 0xb63   : > { %v3666_v26 = vpop.f32.mrf.mxu0 }
 0xb64   : > { %v3745_v57 = vmul.f32 0.25, %v3666_v26  ;;  %v10124_v23 = vsel %vm849_vm4, %v3746_v9, -1e+09 }
 0xb65   : > { %3779 = vmax.xlane.f32.xlu1 %v10124_v23  ;;  %v7726_v59 = vpop.f32.mrf.mxu0 }
 0xb66   : > { %v3748_v43 = vmul.f32 0.25, %v7726_v59  ;;  %v10129_v0 = vsel %vm848_vm7, %v3745_v57, -1e+09 }
 0xb67   : > { %3777 = vmax.xlane.f32.xlu0 %v10129_v0  ;;  %v3676_v36 = vpop.f32.mrf.mxu0 }
 0xb68   : > { %v3747_v13 = vmul.f32 0.25, %v3676_v36  ;;  %v10134_v25 = vsel %vm851_vm8, %v3748_v43, -1e+09 }
 0xb69   : > { %v7729_v12 = vpop.f32.mrf.mxu0 }
 0xb6a   : > { %v3750_v49 = vmul.f32 0.25, %v7729_v12  ;;  %v10139_v33 = vsel %vm850_vm9, %v3747_v13, -1e+09 }
 0xb6b   : > { %3783 = vmax.xlane.f32.xlu0 %v10134_v25  ;;  %v3686_v56 = vpop.f32.mrf.mxu0 }
 0xb6c   : > { %v10144_v41 = vsel %vm853_vm10, %v3750_v49, -1e+09 }
 0xb6d   : > { %v7732_v29 = vpop.f32.mrf.mxu0 }
 0xb6e   : > { %v3752_v30 = vmul.f32 0.25, %v7732_v29  ;;  %v3749_v29 = vmul.f32 0.25, %v3686_v56 }
 0xb6f   : > { %3781 = vmax.xlane.f32.xlu0 %v10139_v33  ;;  %v3696_v11 = vpop.f32.mrf.mxu0 }
 0xb70   : > { %v10151_v16 = vsel %vm855_vm11, %v3752_v30, -1e+09  ;;  %v3751_v49 = vmul.f32 0.25, %v3696_v11 }
 0xb71   : > { %v7735_v22 = vpop.f32.mrf.mxu0 }
 0xb72   : > { %v3754_v55 = vmul.f32 0.25, %v7735_v22  ;;  %v10176_v22 = vsel %vm11550_vm2, %v3749_v29, -1e+09  ;;  %vm11554_vm2 = vcmp.gt.f32.partialorder %v9634_v32, 0.5 }
 0xb73   : > { %3787 = vmax.xlane.f32.xlu0 %v10144_v41  ;;  %v3706_v44 = vpop.f32.mrf.mxu0 }
 0xb74   : > { %v10156_v26 = vsel %vm857_vm12, %v3754_v55, -1e+09  ;;  %v3753_v30 = vmul.f32 0.25, %v3706_v44 }
 0xb75   : > { %v7738_v21 = vpop.f32.mrf.mxu0 }
 0xb76   : > { %3935 = vrot.lane.b32.xlu1 %v10002_v20, %s8558_s3  ;;  %v3756_v9 = vmul.f32 0.25, %v7738_v21  ;;  %v10183_v21 = vsel %vm11551_vm6, %v3751_v49, -1e+09  ;;  %v10190_v56 = vsel %vm11552_vm1, %v3753_v30, -1e+09  ;;  %vm11555_vm6 = vcmp.gt.f32.partialorder %v9647_v18, 0.5 }
 0xb77   : > { %3791 = vmax.xlane.f32.xlu0 %v10151_v16  ;;  %v3716_v7 = vpop.f32.mrf.mxu0 }
 0xb78   : > { %v10161_v20 = vsel %vm859_vm13, %v3756_v9, -1e+09  ;;  %v3755_v55 = vmul.f32 0.25, %v3716_v7 }
 0xb79   : > { %v7741_v24 = vpop.f32.mrf.mxu0 }
 0xb7a   : > { %v3758_v59 = vmul.f32 0.25, %v7741_v24 }
 0xb7b   : > { %3795 = vmax.xlane.f32.xlu0 %v10156_v26  ;;  %v3726_v57 = vpop.f32.mrf.mxu0 }
 0xb7c   : > { %v10166_v12 = vsel %vm861_vm14, %v3758_v59, -1e+09  ;;  %v3757_v11 = vmul.f32 0.25, %v3726_v57 }
 0xb7d   : > { %v7744_v43 = vpop.f32.mrf.mxu0 }
 0xb7e   : > { %v3760_v36 = vmul.f32 0.25, %v7744_v43 }
 0xb7f   : > { %3799 = vmax.xlane.f32.xlu0 %v10161_v20  ;;  %v3736_v44 = vpop.f32.mrf.mxu0 }
 0xb80   : > { %v10171_v13 = vsel %vm11500_vm15, %v3760_v36, -1e+09  ;;  %v3759_v7 = vmul.f32 0.25, %v3736_v44 }
 0xb82   : > { %v10207_v24 = vsel %vm11555_vm6, %v3759_v7, -1e+09 }
 0xb83   : > { %3803 = vmax.xlane.f32.xlu0 %v10166_v12 }
 0xb87   : > { %3807 = vmax.xlane.f32.xlu0 %v10171_v13 }
 0xb9a   : > { %3785 = vmax.xlane.f32.xlu1 %v10176_v22 }
 0xb9d   : > { %3929 = vrot.lane.b32.xlu0 %v10022_v40, %s8558_s3  ;;  %v10197_v40 = vsel %vm11553_vm5, %v3755_v55, -1e+09 }
 0xb9e   : > { %3789 = vmax.xlane.f32.xlu1 %v10183_v21 }
 0xba1   : > { %3925 = vrot.lane.b32.xlu0 %v10030_v8, %s8558_s3  ;;  %v10202_v8 = vsel %vm11554_vm2, %v3757_v11, -1e+09 }
 0xba2   : > { %3793 = vmax.xlane.f32.xlu1 %v10190_v56 }
 0xba5   : > { %3921 = vrot.lane.b32.xlu0 %v9972_v19, %s8558_s3  ;;  %v3934_v19 = vpop.permute.xlu0 %3933 }
 0xba6   : > { %3797 = vmax.xlane.f32.xlu1 %v10197_v40 }
 0xbaa   : > { %3801 = vmax.xlane.f32.xlu1 %v10202_v8 }
 0xbae   : > { %3805 = vmax.xlane.f32.xlu1 %v10207_v24 }
 0xbbf   : > { %3931 = vrot.lane.b32.xlu1 %v10010_v34, %s8558_s3 }
 0xbc3   : > { %3927 = vrot.lane.b32.xlu1 %v10018_v28, %s8558_s3 }
 0xbc7   : > { %3923 = vrot.lane.b32.xlu1 %v10026_v45, %s8558_s3 }
 0xbee   : > { %v3780_v9 = vpop.xlane.xlu1 %3779 }
 0xbef   : > { %v3810_v57 = vsub.f32 %v10124_v23, %v3780_v9 }
 0xbf0   : > { %v3778_v59 = vpop.xlane.xlu0 %3777 }
 0xbf1   : > { %v3827_v43 = vmul.f32 1.442695, %v3810_v57  ;;  %v3809_v36 = vsub.f32 %v10129_v0, %v3778_v59 }
 0xbf2   : > { %v3936_v29 = vpop.permute.xlu1 %3935 }
 0xbf3   : > { %8334 = vpow2.f32 %v3827_v43  ;;  %v3825_v49 = vmul.f32 1.442695, %v3809_v36  ;;  %7761 = vmatprep.subr.mxu1 %v3936_v29 }
 0xbf4   : > { %7762 = vmatpush3.msra.mxu1 %v3936_v29  ;;  %v3784_v34 = vpop.xlane.xlu0 %3783 }
 0xbf5   : > { %8336 = vpow2.f32 %v3825_v49  ;;  %v3812_v28 = vsub.f32 %v10134_v25, %v3784_v34  ;;  %7763 = vmatprep.subr.mxu1 %v3934_v19 }
 0xbf6   : > { %7764 = vmatpush3.msra.mxu1 %v3934_v19 }
 0xbf7   : > { %v3831_v45 = vmul.f32 1.442695, %v3812_v28 }
 0xbf8   : > { %v3782_v30 = vpop.xlane.xlu0 %3781 }
 0xbf9   : > { %8338 = vpow2.f32 %v3831_v45  ;;  %v3811_v23 = vsub.f32 %v10139_v33, %v3782_v30 }
 0xbfb   : > { %v3829_v55 = vmul.f32 1.442695, %v3811_v23 }
 0xbfc   : > { %v3788_v11 = vpop.xlane.xlu0 %3787 }
 0xbfd   : > { %8340 = vpow2.f32 %v3829_v55  ;;  %v3814_v0 = vsub.f32 %v10144_v41, %v3788_v11 }
 0xbff   : > { %v3835_v44 = vmul.f32 1.442695, %v3814_v0 }
 0xc00   : > { %v10221_v7 = vpop.eup %8334  ;;  %v3792_v9 = vpop.xlane.xlu0 %3791 }
 0xc01   : > { %8342 = vpow2.f32 %v3835_v44  ;;  %v3816_v57 = vsub.f32 %v10151_v16, %v3792_v9  ;;  %3859 = vadd.xlane.f32.xlu0 %v10221_v7 }
 0xc02   : > { %v10225_v25 = vpop.eup %8336 }
 0xc03   : > { %v3839_v19 = vmul.f32 1.442695, %v3816_v57  ;;  %3857 = vadd.xlane.f32.xlu1 %v10225_v25 }
 0xc04   : > { %v3796_v33 = vpop.xlane.xlu0 %3795 }
 0xc05   : > { %8344 = vpow2.f32 %v3839_v19  ;;  %v3818_v59 = vsub.f32 %v10156_v26, %v3796_v33 }
 0xc06   : > { %v10229_v43 = vpop.eup %8338 }
 0xc07   : > { %v3843_v41 = vmul.f32 1.442695, %v3818_v59  ;;  %3863 = vadd.xlane.f32.xlu0 %v10229_v43 }
 0xc08   : > { %v3800_v36 = vpop.xlane.xlu0 %3799 }
 0xc09   : > { %8346 = vpow2.f32 %v3843_v41  ;;  %v3820_v16 = vsub.f32 %v10161_v20, %v3800_v36 }
 0xc0a   : > { %v10233_v29 = vpop.eup %8340 }
 0xc0b   : > { %v3847_v49 = vmul.f32 1.442695, %v3820_v16  ;;  %3861 = vadd.xlane.f32.xlu1 %v10233_v29 }
 0xc0c   : > { %v3804_v34 = vpop.xlane.xlu0 %3803 }
 0xc0d   : > { %8348 = vpow2.f32 %v3847_v49  ;;  %v3822_v28 = vsub.f32 %v10166_v12, %v3804_v34 }
 0xc0e   : > { %v10237_v45 = vpop.eup %8342 }
 0xc0f   : > { %v3851_v26 = vmul.f32 1.442695, %v3822_v28  ;;  %3867 = vadd.xlane.f32.xlu0 %v10237_v45 }
 0xc10   : > { %v3808_v30 = vpop.xlane.xlu0 %3807 }
 0xc11   : > { %8350 = vpow2.f32 %v3851_v26  ;;  %v3824_v23 = vsub.f32 %v10171_v13, %v3808_v30 }
 0xc12   : > { %v10241_v55 = vpop.eup %8344 }
 0xc13   : > { %v3855_v20 = vmul.f32 1.442695, %v3824_v23  ;;  %3871 = vadd.xlane.f32.xlu0 %v10241_v55 }
 0xc15   : > { %8352 = vpow2.f32 %v3855_v20 }
 0xc16   : > { %v10244_v11 = vpop.eup %8346 }
 0xc17   : > { %3875 = vadd.xlane.f32.xlu0 %v10244_v11 }
 0xc1a   : > { %v10247_v12 = vpop.eup %8348 }
 0xc1b   : > { %3879 = vadd.xlane.f32.xlu0 %v10247_v12 }
 0xc1e   : > { %v10250_v0 = vpop.eup %8350 }
 0xc1f   : > { %3883 = vadd.xlane.f32.xlu0 %v10250_v0 }
 0xc22   : > { %v10253_v44 = vpop.eup %8352 }
 0xc23   : > { %v3786_v13 = vpop.xlane.xlu1 %3785  ;;  %3887 = vadd.xlane.f32.xlu0 %v10253_v44 }
 0xc24   : > { %v3813_v9 = vsub.f32 %v10176_v22, %v3786_v13  ;;  %v3930_v13 = vpop.permute.xlu0 %3929 }
 0xc26   : > { %v3833_v57 = vmul.f32 1.442695, %v3813_v9 }
 0xc27   : > { %v3790_v19 = vpop.xlane.xlu1 %3789 }
 0xc28   : > { %8354 = vpow2.f32 %v3833_v57  ;;  %v3815_v33 = vsub.f32 %v10183_v21, %v3790_v19 }
 0xc2a   : > { %v3837_v59 = vmul.f32 1.442695, %v3815_v33 }
 0xc2b   : > { %v3794_v41 = vpop.xlane.xlu1 %3793 }
 0xc2c   : > { %8356 = vpow2.f32 %v3837_v59  ;;  %v3817_v36 = vsub.f32 %v10190_v56, %v3794_v41 }
 0xc2e   : > { %v3841_v16 = vmul.f32 1.442695, %v3817_v36  ;;  %v8467_v36 = vld [vmem:[%s11438_s13 + $0x18] sm:$0xff] }
 0xc2f   : > { %v3798_v49 = vpop.xlane.xlu1 %3797 }
 0xc30   : > { %8358 = vpow2.f32 %v3841_v16  ;;  %v3819_v34 = vsub.f32 %v10197_v40, %v3798_v49 }
 0xc32   : > { %v3845_v28 = vmul.f32 1.442695, %v3819_v34 }
 0xc33   : > { %v3802_v26 = vpop.xlane.xlu1 %3801 }
 0xc34   : > { %8360 = vpow2.f32 %v3845_v28  ;;  %v3821_v22 = vsub.f32 %v10202_v8, %v3802_v26  ;;  %v3926_v8 = vpop.permute.xlu0 %3925 }
 0xc35   : > { %v10261_v30 = vpop.eup %8354 }
 0xc36   : > { %v3849_v23 = vmul.f32 1.442695, %v3821_v22  ;;  %3865 = vadd.xlane.f32.xlu1 %v10261_v30 }
 0xc37   : > { %v3806_v21 = vpop.xlane.xlu1 %3805 }
 0xc38   : > { %8362 = vpow2.f32 %v3849_v23  ;;  %v3823_v20 = vsub.f32 %v10207_v24, %v3806_v21  ;;  %v3922_v41 = vpop.permute.xlu0 %3921 }
 0xc39   : > { %v10265_v56 = vpop.eup %8356 }
 0xc3a   : > { %v3853_v9 = vmul.f32 1.442695, %v3823_v20  ;;  %3869 = vadd.xlane.f32.xlu1 %v10265_v56 }
 0xc3b   : > { %v3932_v40 = vpop.permute.xlu1 %3931 }
 0xc3c   : > { %8364 = vpow2.f32 %v3853_v9  ;;  %7765 = vmatprep.subr.mxu1 %v3932_v40 }
 0xc3d   : > { %v10268_v57 = vpop.eup %8358  ;;  %7766 = vmatpush3.msra.mxu1 %v3932_v40 }
 0xc3e   : > { %3873 = vadd.xlane.f32.xlu1 %v10268_v57  ;;  %7767 = vmatprep.subr.mxu1 %v3930_v13 }
 0xc3f   : > { %v3928_v19 = vpop.permute.xlu1 %3927  ;;  %7768 = vmatpush3.msra.mxu1 %v3930_v13  ;;  %v8468_v13 = vld [vmem:[%s11438_s13 + $0x10] sm:$0xff] }
 0xc40   : > { %7769 = vmatprep.subr.mxu1 %v3928_v19 }
 0xc41   : > { %v10271_v24 = vpop.eup %8360  ;;  %7770 = vmatpush3.msra.mxu1 %v3928_v19  ;;  %v8470_v19 = vld [vmem:[%s11438_s13] sm:$0xff] }
 0xc42   : > { %3877 = vadd.xlane.f32.xlu1 %v10271_v24  ;;  %7771 = vmatprep.subr.mxu1 %v3926_v8 }
 0xc43   : > { %v3924_v33 = vpop.permute.xlu1 %3923  ;;  %7772 = vmatpush3.msra.mxu1 %v3926_v8 }
 0xc44   : > { %7773 = vmatprep.subr.mxu1 %v3924_v33 }
 0xc45   : > { %v10274_v59 = vpop.eup %8362  ;;  %7774 = vmatpush3.msra.mxu1 %v3924_v33  ;;  %v10311_v33 = vld [vmem:[%s11435_s10 + $0x18] sm:$0xff] }
 0xc46   : > { %3881 = vadd.xlane.f32.xlu1 %v10274_v59  ;;  %7775 = vmatprep.subr.mxu1 %v3922_v41 }
 0xc47   : > { %7776 = vmatpush3.msra.mxu1 %v3922_v41 }
 0xc48   : > { %7801 = vmatprep.subr.mxu1 %v8467_v36 }
 0xc49   : > { %v10280_v16 = vpop.eup %8364 }
 0xc4a   : > { %3885 = vadd.xlane.f32.xlu1 %v10280_v16 }
 0xc8a   : > { %v3860_v49 = vpop.xlane.xlu0 %3859 }
 0xc8b   : > { %8366 = vrcp.f32 %v3860_v49 }
 0xc8c   : > { %v3858_v34 = vpop.xlane.xlu1 %3857 }
 0xc8d   : > { %8368 = vrcp.f32 %v3858_v34 }
 0xc90   : > { %v3864_v28 = vpop.xlane.xlu0 %3863 }
 0xc91   : > { %8370 = vrcp.f32 %v3864_v28 }
 0xc94   : > { %v3862_v26 = vpop.xlane.xlu1 %3861 }
 0xc95   : > { %8372 = vrcp.f32 %v3862_v26 }
 0xc98   : > { %v8367_v22 = vpop.eup %8366 }
 0xc99   : > { %v10287_v20 = vmul.f32 %v8367_v22, %v10221_v7 }
 0xc9a   : > { %v8369_v23 = vpop.eup %8368 }
 0xc9b   : > { %v10284_v21 = vmul.f32 %v8369_v23, %v10225_v25  ;;  %v8469_v25 = vld [vmem:[%s11438_s13 + $0x8] sm:$0xff] }
 0xc9d   : > { %7777 = vmatprep.mubr.f32.mxu1 %v10284_v21 }
 0xc9e   : > { %7778 = vmatmul.mubr.f32.vlgmr.msra.gmra.mxu1 %v10287_v20  ;;  %v8371_v9 = vpop.eup %8370 }
 0xc9f   : > { %7802 = vmatpush3.msra.mxu1 %v8467_v36  ;;  %v10301_v8 = vmul.f32 %v8371_v9, %v10229_v43 }
 0xca0   : > { %7803 = vmatprep.subr.mxu1 %v8468_v13 }
 0xca1   : > { %7804 = vmatpush3.msra.mxu1 %v8468_v13 }
 0xca2   : > { %v8373_v40 = vpop.eup %8372  ;;  %7805 = vmatprep.subr.mxu1 %v8469_v25 }
 0xca3   : > { %v10298_v7 = vmul.f32 %v8373_v40, %v10233_v29  ;;  %7806 = vmatpush3.msra.mxu1 %v8469_v25  ;;  %v3868_v29 = vpop.xlane.xlu0 %3867 }
 0xca4   : > { %7807 = vmatprep.subr.mxu1 %v8470_v19  ;;  %8374 = vrcp.f32 %v3868_v29 }
 0xca5   : > { %7780 = vmatprep.mubr.f32.mxu1 %v10298_v7  ;;  %7808 = vmatpush3.msra.mxu1 %v8470_v19 }
 0xca6   : > { %7781 = vmatmul.mubr.f32.gmra.mxu1 %v10301_v8  ;;  %7861 = vmatprep.subr.mxu1 %v10311_v33 }
 0xca7   : > { %v3872_v43 = vpop.xlane.xlu0 %3871 }
 0xcab   : > { %v3876_v41 = vpop.xlane.xlu0 %3875 }
 0xcaf   : > { %v3880_v34 = vpop.xlane.xlu0 %3879 }
 0xcb1   : > { %v8375_v23 = vpop.eup %8374 }
 0xcb2   : > { %v10318_v25 = vmul.f32 %v8375_v23, %v10237_v45 }
 0xcb3   : > { %v3884_v26 = vpop.xlane.xlu0 %3883 }
 0xcb7   : > { %v3888_v29 = vpop.xlane.xlu0 %3887 }
 0xcbf   : > { %v3866_v36 = vpop.xlane.xlu1 %3865 }
 0xcc0   : > { %8376 = vrcp.f32 %v3866_v36 }
 0xcc1   : > { %8378 = vrcp.f32 %v3872_v43 }
 0xcc3   : > { %v3870_v49 = vpop.xlane.xlu1 %3869 }
 0xcc4   : > { %8380 = vrcp.f32 %v3870_v49 }
 0xcc5   : > { %8382 = vrcp.f32 %v3876_v41 }
 0xcc7   : > { %v3874_v28 = vpop.xlane.xlu1 %3873 }
 0xcc8   : > { %8384 = vrcp.f32 %v3874_v28 }
 0xcc9   : > { %8386 = vrcp.f32 %v3880_v34 }
 0xccb   : > { %v3878_v22 = vpop.xlane.xlu1 %3877 }
 0xccc   : > { %8388 = vrcp.f32 %v3878_v22 }
 0xccd   : > { %v8377_v13 = vpop.eup %8376  ;;  %8390 = vrcp.f32 %v3884_v26 }
 0xcce   : > { %v10315_v9 = vmul.f32 %v8377_v13, %v10261_v30  ;;  %v8379_v19 = vpop.eup %8378 }
 0xccf   : > { %v3882_v40 = vpop.xlane.xlu1 %3881  ;;  %v10326_v30 = vmul.f32 %v8379_v19, %v10241_v55 }
 0xcd0   : > { %8392 = vrcp.f32 %v3882_v40  ;;  %7783 = vmatprep.mubr.f32.mxu1 %v10315_v9 }
 0xcd1   : > { %v8381_v43 = vpop.eup %8380  ;;  %7784 = vmatmul.mubr.f32.gmra.mxu1 %v10318_v25  ;;  %8394 = vrcp.f32 %v3888_v29 }
 0xcd2   : > { %v10323_v41 = vmul.f32 %v8381_v43, %v10265_v56  ;;  %v8383_v49 = vpop.eup %8382 }
 0xcd3   : > { %v3886_v36 = vpop.xlane.xlu1 %3885  ;;  %v10334_v28 = vmul.f32 %v8383_v49, %v10244_v11  ;;  %v10423_v49 = vld [vmem:[%s11439_s14] ss:$0 sm:$0xff] }
 0xcd4   : > { %8396 = vrcp.f32 %v3886_v36  ;;  %7786 = vmatprep.mubr.f32.mxu1 %v10323_v41 }
 0xcd5   : > { %v8385_v45 = vpop.eup %8384  ;;  %7787 = vmatmul.mubr.f32.gmra.mxu1 %v10326_v30 }
 0xcd6   : > { %v10331_v34 = vmul.f32 %v8385_v45, %v10268_v57  ;;  %v8387_v56 = vpop.eup %8386 }
 0xcd7   : > { %v10342_v22 = vmul.f32 %v8387_v56, %v10247_v12 }
 0xcd8   : > { %7789 = vmatprep.mubr.f32.mxu1 %v10331_v34 }
 0xcd9   : > { %v8389_v26 = vpop.eup %8388  ;;  %7790 = vmatmul.mubr.f32.gmra.mxu1 %v10334_v28 }
 0xcda   : > { %v10339_v55 = vmul.f32 %v8389_v26, %v10271_v24  ;;  %v8391_v23 = vpop.eup %8390 }
 0xcdb   : > { %v10350_v13 = vmul.f32 %v8391_v23, %v10250_v0  ;;  %v8472_v0 = vld [vmem:[%s11435_s10 + $0x10] sm:$0xff] }
 0xcdc   : > { %7792 = vmatprep.mubr.f32.mxu1 %v10339_v55 }
 0xcdd   : > { %v8393_v57 = vpop.eup %8392  ;;  %7793 = vmatmul.mubr.f32.gmra.mxu1 %v10342_v22 }
 0xcde   : > { %v10347_v11 = vmul.f32 %v8393_v57, %v10274_v59  ;;  %v8395_v40 = vpop.eup %8394 }
 0xcdf   : > { %v10358_v19 = vmul.f32 %v8395_v40, %v10253_v44 }
 0xce0   : > { %7795 = vmatprep.mubr.f32.mxu1 %v10347_v11 }
 0xce1   : > { %v8397_v24 = vpop.eup %8396  ;;  %7796 = vmatmul.mubr.f32.gmra.mxu1 %v10350_v13 }
 0xce2   : > { %v10355_v12 = vmul.f32 %v8397_v24, %v10280_v16 }
 0xce4   : > { %7798 = vmatprep.mubr.f32.mxu1 %v10355_v12 }
 0xce5   : > { %7799 = vmatmul.mubr.f32.gmra.mxu1 %v10358_v19 }
 0xce6   : > { %7809 = vmatprep.mubr.msk.f32.mxu1 %vm1392_vm3, %v9891_v48  ;;  %v8473_v48 = vld [vmem:[%s11435_s10 + $0x8] sm:$0xff] }
 0xce9   : > { %7810 = vmatmul.mubr.msk.f32.vlgmr.msra.gmra.mxu1 %vm1392_vm3, %v9893_v2  ;;  %v8474_v2 = vld [vmem:[%s11435_s10] sm:$0xff] }
 0xcea   : > { %7812 = vmatprep.mubr.msk.f32.mxu1 %vm1392_vm3, %v9901_v58  ;;  %7862 = vmatpush3.msra.mxu1 %v10311_v33 }
 0xceb   : > { %7863 = vmatprep.subr.mxu1 %v8472_v0 }
 0xcec   : > { %7864 = vmatpush3.msra.mxu1 %v8472_v0 }
 0xced   : > { %7813 = vmatmul.mubr.msk.f32.gmra.mxu1 %vm1392_vm3, %v9905_v50  ;;  %7865 = vmatprep.subr.mxu1 %v8473_v48 }
 0xcee   : > { %7815 = vmatprep.mubr.msk.f32.mxu1 %vm1392_vm3, %v9913_v54  ;;  %7866 = vmatpush3.msra.mxu1 %v8473_v48 }
 0xcef   : > { %7867 = vmatprep.subr.mxu1 %v8474_v2 }
 0xcf0   : > { %7868 = vmatpush3.msra.mxu1 %v8474_v2 }
 0xcf1   : > { %7816 = vmatmul.mubr.msk.f32.gmra.mxu1 %vm1392_vm3, %v9917_v38 }
 0xcf2   : > { %7818 = vmatprep.mubr.msk.f32.mxu1 %vm1392_vm3, %v9923_v5 }
 0xcf5   : > { %7819 = vmatmul.mubr.msk.f32.gmra.mxu1 %vm1392_vm3, %v9927_v51 }
 0xcf6   : > { %7821 = vmatprep.mubr.msk.f32.mxu1 %vm1392_vm3, %v9933_v61 }
 0xcf9   : > { %7822 = vmatmul.mubr.msk.f32.gmra.mxu1 %vm1392_vm3, %v9937_v39 }
 0xcfa   : > { %7824 = vmatprep.mubr.msk.f32.mxu1 %vm1392_vm3, %v9943_v6 }
 0xcfd   : > { %7825 = vmatmul.mubr.msk.f32.gmra.mxu1 %vm1392_vm3, %v9947_v63 }
 0xcfe   : > { %7827 = vmatprep.mubr.msk.f32.mxu1 %vm1392_vm3, %v9953_v60 }
 0xd01   : > { %7828 = vmatmul.mubr.msk.f32.gmra.mxu1 %vm1392_vm3, %v9957_v46 }
 0xd02   : > { %7830 = vmatprep.mubr.msk.f32.mxu1 %vm1392_vm3, %v9961_v15 }
 0xd05   : > { %7831 = vmatmul.mubr.msk.f32.gmra.mxu1 %vm1392_vm3, %v9965_v35 }
 0xd5e   : > { %v7779_v54 = vpop.f32.mrf.mxu1 }
 0xd60   : > { %v4035_v58 = vpop.f32.mrf.mxu1 }
 0xd61   : > { %7837 = vmatprep.mubr.msk.f32.mxu0 %vm869_vm0, %v4035_v58 }
 0xd62   : > { %7838 = vmatmul.mubr.msk.f32.vlgmr.msra.gmra.mxu0 %vm869_vm0, %v7779_v54 }
 0xd66   : > { %v7782_v50 = vpop.f32.mrf.mxu1 }
 0xd68   : > { %v4045_v38 = vpop.f32.mrf.mxu1 }
 0xd69   : > { %7840 = vmatprep.mubr.msk.f32.mxu0 %vm869_vm0, %v4045_v38 }
 0xd6a   : > { %7841 = vmatmul.mubr.msk.f32.gmra.mxu0 %vm869_vm0, %v7782_v50 }
 0xd91   : > { %v7785_v5 = vpop.f32.mrf.mxu1 }
 0xd93   : > { %v4055_v51 = vpop.f32.mrf.mxu1 }
 0xd94   : > { %7843 = vmatprep.mubr.msk.f32.mxu0 %vm869_vm0, %v4055_v51 }
 0xd95   : > { %v7788_v61 = vpop.f32.mrf.mxu1  ;;  %7844 = vmatmul.mubr.msk.f32.gmra.mxu0 %vm869_vm0, %v7785_v5 }
 0xd97   : > { %v4065_v39 = vpop.f32.mrf.mxu1 }
 0xd98   : > { %7846 = vmatprep.mubr.msk.f32.mxu0 %vm869_vm0, %v4065_v39 }
 0xd99   : > { %v7791_v6 = vpop.f32.mrf.mxu1  ;;  %7847 = vmatmul.mubr.msk.f32.gmra.mxu0 %vm869_vm0, %v7788_v61 }
 0xd9b   : > { %v4075_v63 = vpop.f32.mrf.mxu1 }
 0xd9c   : > { %7849 = vmatprep.mubr.msk.f32.mxu0 %vm869_vm0, %v4075_v63 }
 0xd9d   : > { %v7794_v60 = vpop.f32.mrf.mxu1  ;;  %7850 = vmatmul.mubr.msk.f32.gmra.mxu0 %vm869_vm0, %v7791_v6 }
 0xd9f   : > { %v4085_v46 = vpop.f32.mrf.mxu1 }
 0xda0   : > { %7852 = vmatprep.mubr.msk.f32.mxu0 %vm869_vm0, %v4085_v46 }
 0xda1   : > { %v7797_v15 = vpop.f32.mrf.mxu1  ;;  %7853 = vmatmul.mubr.msk.f32.gmra.mxu0 %vm869_vm0, %v7794_v60 }
 0xda3   : > { %v4095_v35 = vpop.f32.mrf.mxu1 }
 0xda4   : > { %7855 = vmatprep.mubr.msk.f32.mxu0 %vm869_vm0, %v4095_v35 }
 0xda5   : > { %v7800_v44 = vpop.f32.mrf.mxu1  ;;  %7856 = vmatmul.mubr.msk.f32.gmra.mxu0 %vm869_vm0, %v7797_v15 }
 0xda7   : > { %v4105_v59 = vpop.f32.mrf.mxu1 }
 0xda8   : > { %7858 = vmatprep.mubr.msk.f32.mxu0 %vm869_vm0, %v4105_v59 }
 0xda9   : > { %7859 = vmatmul.mubr.msk.f32.gmra.mxu0 %vm869_vm0, %v7800_v44  ;;  %v7811_v16 = vpop.f32.mrf.mxu1 }
 0xdab   : > { %v4180_v43 = vpop.f32.mrf.mxu1 }
 0xdad   : > { %v7814_v23 = vpop.f32.mrf.mxu1 }
 0xdaf   : > { %v4190_v2 = vpop.f32.mrf.mxu1 }
 0xdb1   : > { %v7817_v63 = vpop.f32.mrf.mxu1 }
 0xdb3   : > { %v4200_v60 = vpop.f32.mrf.mxu1 }
 0xdb5   : > { %v7820_v46 = vpop.f32.mrf.mxu1 }
 0xdb7   : > { %v4210_v15 = vpop.f32.mrf.mxu1 }
 0xdb9   : > { %v7823_v35 = vpop.f32.mrf.mxu1 }
 0xdbb   : > { %v4220_v44 = vpop.f32.mrf.mxu1 }
 0xe22   : > { %v7839_v33 = vpop.f32.mrf.mxu0 }
 0xe23   : > { %v4379_v29 = vadd.f32 %v7839_v33, %v7811_v16  ;;  %v7826_v33 = vpop.f32.mrf.mxu1 }
 0xe24   : > { %v4373_v36 = vpop.f32.mrf.mxu0 }
 0xe25   : > { %v4453_v45 = vadd.f32 %v10423_v49, %v4379_v29  ;;  %v4374_v56 = vadd.f32 %v4373_v36, %v4180_v43 }
 0xe27   : > { %v4452_v26 = vadd.f32 %v10423_v49, %v4374_v56  ;;  %v4485_v57 = vmul.f32 0.01, %v4453_v45  ;;  %vm4469_vm1 = vcmp.ge.f32.partialorder %v4453_v45, 0.0 }
 0xe29   : > { %v4484_v40 = vmul.f32 0.01, %v4452_v26  ;;  %vm4468_vm5 = vcmp.ge.f32.partialorder %v4452_v26, 0.0  ;;  %v4501_v54 = vsel %vm4469_vm1, %v4453_v45, %v4485_v57 }
 0xe2a   : > { %v7842_v24 = vpop.f32.mrf.mxu0 }
 0xe2b   : > { %v4389_v0 = vadd.f32 %v7842_v24, %v7814_v23  ;;  %v4500_v48 = vsel %vm4468_vm5, %v4452_v26, %v4484_v40  ;;  %v4230_v23 = vpop.f32.mrf.mxu1 }
 0xe2c   : > { %v4383_v58 = vpop.f32.mrf.mxu0  ;;  %7869 = vmatprep.mubr.msk.f32.mxu1 %vm1392_vm3, %v4500_v48 }
 0xe2d   : > { %v4455_v50 = vadd.f32 %v10423_v49, %v4389_v0  ;;  %v4384_v38 = vadd.f32 %v4383_v58, %v4190_v2  ;;  %7870 = vmatmul.mubr.msk.f32.vlgmr.msra.gmra.mxu1 %vm1392_vm3, %v4501_v54 }
 0xe2f   : > { %v4454_v5 = vadd.f32 %v10423_v49, %v4384_v38  ;;  %v4487_v51 = vmul.f32 0.01, %v4455_v50  ;;  %vm4471_vm2 = vcmp.ge.f32.partialorder %v4455_v50, 0.0 }
 0xe31   : > { %v4486_v61 = vmul.f32 0.01, %v4454_v5  ;;  %vm4470_vm6 = vcmp.ge.f32.partialorder %v4454_v5, 0.0  ;;  %v4503_v6 = vsel %vm4471_vm2, %v4455_v50, %v4487_v51  ;;  %v7829_v50 = vpop.f32.mrf.mxu1 }
 0xe33   : > { %v4502_v39 = vsel %vm4470_vm6, %v4454_v5, %v4486_v61 }
 0xe34   : > { %7872 = vmatprep.mubr.msk.f32.mxu1 %vm1392_vm3, %v4502_v39 }
 0xe35   : > { %7873 = vmatmul.mubr.msk.f32.gmra.mxu1 %vm1392_vm3, %v4503_v6 }
 0xe55   : > { %v7845_v59 = vpop.f32.mrf.mxu0 }
 0xe56   : > { %v4399_v16 = vadd.f32 %v7845_v59, %v7817_v63 }
 0xe57   : > { %v4393_v29 = vpop.f32.mrf.mxu0 }
 0xe58   : > { %v4457_v43 = vadd.f32 %v10423_v49, %v4399_v16  ;;  %v4394_v36 = vadd.f32 %v4393_v29, %v4200_v60 }
 0xe59   : > { %v7848_v45 = vpop.f32.mrf.mxu0 }
 0xe5a   : > { %v4456_v56 = vadd.f32 %v10423_v49, %v4394_v36  ;;  %v4409_v26 = vadd.f32 %v7848_v45, %v7820_v46  ;;  %vm4473_vm1 = vcmp.ge.f32.partialorder %v4457_v43, 0.0  ;;  %v4489_v57 = vmul.f32 0.01, %v4457_v43 }
 0xe5b   : > { %v4403_v40 = vpop.f32.mrf.mxu0 }
 0xe5c   : > { %v4488_v24 = vmul.f32 0.01, %v4456_v56  ;;  %v4459_v0 = vadd.f32 %v10423_v49, %v4409_v26  ;;  %v4404_v48 = vadd.f32 %v4403_v40, %v4210_v15  ;;  %vm4472_vm5 = vcmp.ge.f32.partialorder %v4456_v56, 0.0 }
 0xe5d   : > { %v7851_v2 = vpop.f32.mrf.mxu0  ;;  %v4505_v61 = vsel %vm4473_vm1, %v4457_v43, %v4489_v57 }
 0xe5e   : > { %v4458_v54 = vadd.f32 %v10423_v49, %v4404_v48  ;;  %v4419_v58 = vadd.f32 %v7851_v2, %v7823_v35  ;;  %vm4475_vm2 = vcmp.ge.f32.partialorder %v4459_v0, 0.0  ;;  %v4491_v38 = vmul.f32 0.01, %v4459_v0  ;;  %v4240_v35 = vpop.f32.mrf.mxu1 }
 0xe5f   : > { %v4413_v5 = vpop.f32.mrf.mxu0  ;;  %v4504_v51 = vsel %vm4472_vm5, %v4456_v56, %v4488_v24 }
 0xe60   : > { %v4490_v39 = vmul.f32 0.01, %v4458_v54  ;;  %v4461_v6 = vadd.f32 %v10423_v49, %v4419_v58  ;;  %v4414_v63 = vadd.f32 %v4413_v5, %v4220_v44  ;;  %7875 = vmatprep.mubr.msk.f32.mxu1 %vm1392_vm3, %v4504_v51  ;;  %vm4474_vm6 = vcmp.ge.f32.partialorder %v4458_v54, 0.0  ;;  %v7832_v57 = vpop.f32.mrf.mxu1 }
 0xe61   : > { %7876 = vmatmul.mubr.msk.f32.gmra.mxu1 %vm1392_vm3, %v4505_v61  ;;  %v7854_v60 = vpop.f32.mrf.mxu0  ;;  %v4507_v43 = vsel %vm4475_vm2, %v4459_v0, %v4491_v38 }
 0xe62   : > { %v4460_v46 = vadd.f32 %v10423_v49, %v4414_v63  ;;  %v4429_v15 = vadd.f32 %v7854_v60, %v7826_v33  ;;  %vm4477_vm15 = vcmp.ge.f32.partialorder %v4461_v6, 0.0  ;;  %v4493_v59 = vmul.f32 0.01, %v4461_v6  ;;  %v4250_v5 = vpop.f32.mrf.mxu1 }
 0xe63   : > { %v4423_v16 = vpop.f32.mrf.mxu0  ;;  %v4506_v29 = vsel %vm4474_vm6, %v4458_v54, %v4490_v39 }
 0xe64   : > { %v4492_v36 = vmul.f32 0.01, %v4460_v46  ;;  %v4463_v45 = vadd.f32 %v10423_v49, %v4429_v15  ;;  %v4424_v44 = vadd.f32 %v4423_v16, %v4230_v23  ;;  %7878 = vmatprep.mubr.msk.f32.mxu1 %vm1392_vm3, %v4506_v29  ;;  %vm4476_vm1 = vcmp.ge.f32.partialorder %v4460_v46, 0.0 }
 0xe65   : > { %7879 = vmatmul.mubr.msk.f32.gmra.mxu1 %vm1392_vm3, %v4507_v43  ;;  %v7857_v56 = vpop.f32.mrf.mxu0  ;;  %v4509_v0 = vsel %vm4477_vm15, %v4461_v6, %v4493_v59 }
 0xe66   : > { %v4462_v26 = vadd.f32 %v10423_v49, %v4424_v44  ;;  %v4439_v33 = vadd.f32 %v7857_v56, %v7829_v50  ;;  %vm4479_vm5 = vcmp.ge.f32.partialorder %v4463_v45, 0.0  ;;  %v4495_v40 = vmul.f32 0.01, %v4463_v45 }
 0xe67   : > { %v4433_v24 = vpop.f32.mrf.mxu0  ;;  %v4508_v48 = vsel %vm4476_vm1, %v4460_v46, %v4492_v36 }
 0xe68   : > { %v4494_v2 = vmul.f32 0.01, %v4462_v26  ;;  %v4465_v54 = vadd.f32 %v10423_v49, %v4439_v33  ;;  %v4434_v23 = vadd.f32 %v4433_v24, %v4240_v35  ;;  %7881 = vmatprep.mubr.msk.f32.mxu1 %vm1392_vm3, %v4508_v48  ;;  %vm4478_vm2 = vcmp.ge.f32.partialorder %v4462_v26, 0.0 }
 0xe69   : > { %7882 = vmatmul.mubr.msk.f32.gmra.mxu1 %vm1392_vm3, %v4509_v0  ;;  %v7860_v58 = vpop.f32.mrf.mxu0  ;;  %v4511_v63 = vsel %vm4479_vm5, %v4463_v45, %v4495_v40 }
 0xe6a   : > { %v4464_v38 = vadd.f32 %v10423_v49, %v4434_v23  ;;  %v4449_v50 = vadd.f32 %v7860_v58, %v7832_v57  ;;  %v4497_v51 = vmul.f32 0.01, %v4465_v54  ;;  %v4510_v39 = vsel %vm4478_vm2, %v4462_v26, %v4494_v2 }
 0xe6b   : > { %v4443_v61 = vpop.f32.mrf.mxu0  ;;  %7884 = vmatprep.mubr.msk.f32.mxu1 %vm1392_vm3, %v4510_v39  ;;  %vm4481_vm6 = vcmp.ge.f32.partialorder %v4465_v54, 0.0 }
 0xe6c   : > { %v4496_v6 = vmul.f32 0.01, %v4464_v38  ;;  %v4467_v60 = vadd.f32 %v10423_v49, %v4449_v50  ;;  %v4444_v46 = vadd.f32 %v4443_v61, %v4250_v5  ;;  %vm4480_vm15 = vcmp.ge.f32.partialorder %v4464_v38, 0.0 }
 0xe6d   : > { %7885 = vmatmul.mubr.msk.f32.gmra.mxu1 %vm1392_vm3, %v4511_v63  ;;  %v4513_v29 = vsel %vm4481_vm6, %v4465_v54, %v4497_v51 }
 0xe6e   : > { %v4466_v15 = vadd.f32 %v10423_v49, %v4444_v46  ;;  %v4512_v35 = vsel %vm4480_vm15, %v4464_v38, %v4496_v6  ;;  %v4499_v59 = vmul.f32 0.01, %v4467_v60  ;;  %vm4483_vm5 = vcmp.ge.f32.partialorder %v4467_v60, 0.0  ;;  %v8476_v49 = vld [vmem:[%s11436_s11] ss:$0 sm:$0xff] }
 0xe6f   : > { %7887 = vmatprep.mubr.msk.f32.mxu1 %vm1392_vm3, %v4512_v35 }
 0xe70   : > { %v4498_v16 = vmul.f32 0.01, %v4466_v15  ;;  %vm4482_vm1 = vcmp.ge.f32.partialorder %v4466_v15, 0.0  ;;  %v4515_v36 = vsel %vm4483_vm5, %v4467_v60, %v4499_v59 }
 0xe71   : > { %7888 = vmatmul.mubr.msk.f32.gmra.mxu1 %vm1392_vm3, %v4513_v29 }
 0xe72   : > { %v4514_v43 = vsel %vm4482_vm1, %v4466_v15, %v4498_v16 }
 0xe73   : > { %7890 = vmatprep.mubr.msk.f32.mxu1 %vm1392_vm3, %v4514_v43 }
 0xe75   : > { %7891 = vmatmul.mubr.msk.f32.gmra.mxu1 %vm1392_vm3, %v4515_v36 }
 0xeed   : > { %v7871_v45 = vpop.f32.mrf.mxu1 }
 0xeee   : > { %v10517_v36 = vadd.f32 %v8476_v49, %v7871_v45 }
 0xeef   : > { %v4630_v44 = vpop.f32.mrf.mxu1 }
 0xef0   : > { %v10463_v56 = vadd.f32 %v8476_v49, %v4630_v44 }
 0xef2   : > { %7925 = vmatprep.mubr.msk.f32.mxu0 %vm869_vm0, %v10463_v56 }
 0xef5   : > { %v7874_v26 = vpop.f32.mrf.mxu1 }
 0xef6   : > { %v10509_v29 = vadd.f32 %v8476_v49, %v7874_v26 }
 0xef7   : > { %v4640_v33 = vpop.f32.mrf.mxu1 }
 0xef8   : > { %v10521_v44 = vadd.f32 %v8476_v49, %v4640_v33 }
 0xf21   : > { %v7877_v57 = vpop.f32.mrf.mxu1 }
 0xf22   : > { %v10501_v59 = vadd.f32 %v8476_v49, %v7877_v57 }
 0xf23   : > { %v4650_v40 = vpop.f32.mrf.mxu1 }
 0xf24   : > { %v10513_v43 = vadd.f32 %v8476_v49, %v4650_v40 }
 0xf25   : > { %v7880_v24 = vpop.f32.mrf.mxu1 }
 0xf26   : > { %v10493_v15 = vadd.f32 %v8476_v49, %v7880_v24 }
 0xf27   : > { %v4660_v48 = vpop.f32.mrf.mxu1 }
 0xf28   : > { %v10505_v16 = vadd.f32 %v8476_v49, %v4660_v48 }
 0xf29   : > { %v7883_v0 = vpop.f32.mrf.mxu1 }
 0xf2a   : > { %v10485_v60 = vadd.f32 %v8476_v49, %v7883_v0 }
 0xf2b   : > { %v4670_v2 = vpop.f32.mrf.mxu1 }
 0xf2c   : > { %v10497_v35 = vadd.f32 %v8476_v49, %v4670_v2 }
 0xf2d   : > { %v7886_v54 = vpop.f32.mrf.mxu1 }
 0xf2e   : > { %v10477_v63 = vadd.f32 %v8476_v49, %v7886_v54 }
 0xf2f   : > { %v4680_v23 = vpop.f32.mrf.mxu1 }
 0xf30   : > { %v10489_v46 = vadd.f32 %v8476_v49, %v4680_v23 }
 0xf31   : > { %v7889_v58 = vpop.f32.mrf.mxu1 }
 0xf32   : > { %v10473_v39 = vadd.f32 %v8476_v49, %v7889_v58 }
 0xf33   : > { %v4690_v38 = vpop.f32.mrf.mxu1 }
 0xf34   : > { %v10481_v6 = vadd.f32 %v8476_v49, %v4690_v38 }
 0xf35   : > { %v7892_v50 = vpop.f32.mrf.mxu1 }
 0xf36   : > { %v10467_v5 = vadd.f32 %v8476_v49, %v7892_v50 }
 0xf37   : > { %v4700_v51 = vpop.f32.mrf.mxu1 }
 0xf38   : > { %v10469_v61 = vadd.f32 %v8476_v49, %v4700_v51  ;;  %4755 = vrot.lane.b32.xlu1 %v10467_v5, %s8559_s24 }
 0xf3a   : > { %4753 = vrot.lane.b32.xlu0 %v10469_v61, %s8559_s24 }
 0xf3c   : > { %4751 = vrot.lane.b32.xlu1 %v10473_v39, %s8559_s24 }
 0xf3e   : > { %4747 = vrot.lane.b32.xlu0 %v10477_v63, %s8559_s24 }
 0xf40   : > { %4749 = vrot.lane.b32.xlu1 %v10481_v6, %s8559_s24 }
 0xf42   : > { %4743 = vrot.lane.b32.xlu0 %v10485_v60, %s8559_s24 }
 0xf44   : > { %4745 = vrot.lane.b32.xlu1 %v10489_v46, %s8559_s24 }
 0xf46   : > { %4739 = vrot.lane.b32.xlu0 %v10493_v15, %s8559_s24 }
 0xf48   : > { %4741 = vrot.lane.b32.xlu1 %v10497_v35, %s8559_s24 }
 0xf4a   : > { %4735 = vrot.lane.b32.xlu0 %v10501_v59, %s8559_s24 }
 0xf4c   : > { %4737 = vrot.lane.b32.xlu1 %v10505_v16, %s8559_s24 }
 0xf4e   : > { %4731 = vrot.lane.b32.xlu0 %v10509_v29, %s8559_s24 }
 0xf50   : > { %4733 = vrot.lane.b32.xlu1 %v10513_v43, %s8559_s24 }
 0xf52   : > { %4727 = vrot.lane.b32.xlu0 %v10517_v36, %s8559_s24 }
 0xf54   : > { %4729 = vrot.lane.b32.xlu1 %v10521_v44, %s8559_s24 }
 0xf56   : > { %5166 = vrot.lane.b32.xlu0 %v10481_v6, %s8558_s3 }
 0xf58   : > { %4725 = vrot.lane.b32.xlu1 %v10463_v56, %s8559_s24  ;;  %s644_s24 = sand.u32 1, %s8545_s21  }
 0xf59   : > { %s6567_s25 = sshll.u32 %s644_s24, 9  ;;  %s11384_s30 = scalar_lea.sflag [#allocation4], %s644_s24 }
 0xf5a   : > { %5162 = vrot.lane.b32.xlu0 %v10489_v46, %s8558_s3  ;;  %s10923_s29 = scalar_lea.vmem [#allocation3], %s6567_s25 }
 0xf5b   : > { %s6465_s5 = sshll.u32 %s10923_s29, 4  ;;  %s11375_s5 = int_to_ptr.vmem [resolvable:$true] %s6465_s5 }
 0xf5c   : > { %5172 = vrot.lane.b32.xlu1 %v10467_v5, %s8558_s3  ;;  %s8493_s25 = scalar_lea.vmem %s11375_s5, 8192 }
 0xf5d   : > { %p8494_p11 = scmp.ne.s32.totalorder %s11375_s5, %s8493_s25 }
 0xf5e   : > { %5158 = vrot.lane.b32.xlu0 %v10497_v35, %s8558_s3 }
 0xf5f   : > { %p8495_p12 = pnand %p8494_p11, %p8705_p5 }
 0xf60   : > { %5168 = vrot.lane.b32.xlu1 %v10473_v39, %s8558_s3 }
 0xf61   : > { %p8496_p13 = pneg %p8495_p12 }
 0xf62   : > { %5170 = vrot.lane.b32.xlu0 %v10469_v61, %s8558_s3 }
 0xf64   : > { %5164 = vrot.lane.b32.xlu1 %v10477_v63, %s8558_s3 }
 0xf66   : > { %5154 = vrot.lane.b32.xlu0 %v10505_v16, %s8558_s3 }
 0xf68   : > { %5160 = vrot.lane.b32.xlu1 %v10485_v60, %s8558_s3 }
 0xfaa   : > { %v4756_v45 = vpop.permute.xlu1 %4755 }
 0xfab   : > { %7893 = vmatprep.subr.msk.mxu0 %vm869_vm0, %v4756_v45 }
 0xfac   : > { %7894 = vmatpush3.xpose.msk.msra.mxu0 %vm869_vm0, %v4756_v45  ;;  %v4754_v49 = vpop.permute.xlu0 %4753 }
 0xfad   : > { %7895 = vmatprep.subr.msk.mxu0 %vm869_vm0, %v4754_v49 }
 0xfae   : > { %v4752_v26 = vpop.permute.xlu1 %4751 }
 0xfb0   : > { %7896 = vmatpush3.xpose.msk.msra.mxu0 %vm869_vm0, %v4754_v49  ;;  %v4748_v33 = vpop.permute.xlu0 %4747 }
 0xfb1   : > { %7897 = vmatprep.subr.msk.mxu0 %vm869_vm0, %v4752_v26 }
 0xfb2   : > { %v4750_v57 = vpop.permute.xlu1 %4749 }
 0xfb4   : > { %7898 = vmatpush3.xpose.msk.msra.mxu0 %vm869_vm0, %v4752_v26  ;;  %v4744_v40 = vpop.permute.xlu0 %4743 }
 0xfb5   : > { %7899 = vmatprep.subr.msk.mxu0 %vm869_vm0, %v4750_v57 }
 0xfb6   : > { %v4746_v24 = vpop.permute.xlu1 %4745 }
 0xfb8   : > { %7900 = vmatpush3.xpose.msk.msra.mxu0 %vm869_vm0, %v4750_v57  ;;  %v4740_v48 = vpop.permute.xlu0 %4739 }
 0xfb9   : > { %7901 = vmatprep.subr.msk.mxu0 %vm869_vm0, %v4748_v33 }
 0xfba   : > { %v4742_v0 = vpop.permute.xlu1 %4741 }
 0xfbc   : > { %7902 = vmatpush3.xpose.msk.msra.mxu0 %vm869_vm0, %v4748_v33  ;;  %v4736_v2 = vpop.permute.xlu0 %4735 }
 0xfbd   : > { %7903 = vmatprep.subr.msk.mxu0 %vm869_vm0, %v4746_v24 }
 0xfbe   : > { %v4738_v54 = vpop.permute.xlu1 %4737 }
 0xfc0   : > { %7904 = vmatpush3.xpose.msk.msra.mxu0 %vm869_vm0, %v4746_v24  ;;  %v4732_v23 = vpop.permute.xlu0 %4731 }
 0xfc1   : > { %7905 = vmatprep.subr.msk.mxu0 %vm869_vm0, %v4744_v40 }
 0xfc2   : > { %v4734_v58 = vpop.permute.xlu1 %4733 }
 0xfc4   : > { %7906 = vmatpush3.xpose.msk.msra.mxu0 %vm869_vm0, %v4744_v40  ;;  %v4728_v38 = vpop.permute.xlu0 %4727 }
 0xfc5   : > { %7907 = vmatprep.subr.msk.mxu0 %vm869_vm0, %v4742_v0 }
 0xfc6   : > { %v4730_v50 = vpop.permute.xlu1 %4729 }
 0xfc8   : > { %7908 = vmatpush3.xpose.msk.msra.mxu0 %vm869_vm0, %v4742_v0  ;;  %v5167_v51 = vpop.permute.xlu0 %5166 }
 0xfc9   : > { %7909 = vmatprep.subr.msk.mxu0 %vm869_vm0, %v4740_v48 }
 0xfca   : > { %v4726_v45 = vpop.permute.xlu1 %4725 }
 0xfcc   : > { %7910 = vmatpush3.xpose.msk.msra.mxu0 %vm869_vm0, %v4740_v48  ;;  %v5163_v49 = vpop.permute.xlu0 %5162 }
 0xfcd   : > { %7911 = vmatprep.subr.msk.mxu0 %vm869_vm0, %v4738_v54 }
 0xfce   : > { %v5173_v26 = vpop.permute.xlu1 %5172 }
 0xfcf   : > { %7949 = vmatprep.subr.mxu1 %v5173_v26 }
 0xfd0   : > { %7912 = vmatpush3.xpose.msk.msra.mxu0 %vm869_vm0, %v4738_v54  ;;  %7950 = vmatpush3.msra.mxu1 %v5173_v26  ;;  %v5159_v33 = vpop.permute.xlu0 %5158 }
 0xfd1   : > { %7913 = vmatprep.subr.msk.mxu0 %vm869_vm0, %v4736_v2 }
 0xfd2   : > { %v5169_v57 = vpop.permute.xlu1 %5168 }
 0xfd4   : > { %7914 = vmatpush3.xpose.msk.msra.mxu0 %vm869_vm0, %v4736_v2  ;;  %v5171_v40 = vpop.permute.xlu0 %5170 }
 0xfd5   : > { %7915 = vmatprep.subr.msk.mxu0 %vm869_vm0, %v4734_v58  ;;  %7951 = vmatprep.subr.mxu1 %v5171_v40 }
 0xfd6   : > { %7952 = vmatpush3.msra.mxu1 %v5171_v40  ;;  %v5165_v24 = vpop.permute.xlu1 %5164 }
 0xfd7   : > { %7953 = vmatprep.subr.mxu1 %v5169_v57 }
 0xfd8   : > { %7916 = vmatpush3.xpose.msk.msra.mxu0 %vm869_vm0, %v4734_v58  ;;  %7954 = vmatpush3.msra.mxu1 %v5169_v57 }
 0xfd9   : > { %7917 = vmatprep.subr.msk.mxu0 %vm869_vm0, %v4732_v23  ;;  %7955 = vmatprep.subr.mxu1 %v5167_v51 }
 0xfda   : > { %7956 = vmatpush3.msra.mxu1 %v5167_v51  ;;  %v5161_v48 = vpop.permute.xlu1 %5160 }
 0xfdb   : > { %7957 = vmatprep.subr.mxu1 %v5165_v24 }
 0xfdc   : > { %7918 = vmatpush3.xpose.msk.msra.mxu0 %vm869_vm0, %v4732_v23  ;;  %7958 = vmatpush3.msra.mxu1 %v5165_v24 }
 0xfdd   : > { %7919 = vmatprep.subr.msk.mxu0 %vm869_vm0, %v4730_v50  ;;  %7959 = vmatprep.subr.mxu1 %v5163_v49 }
 0xfde   : > { %7960 = vmatpush3.msra.mxu1 %v5163_v49 }
 0xfdf   : > { %7961 = vmatprep.subr.mxu1 %v5161_v48 }
 0xfe0   : > { %7920 = vmatpush3.xpose.msk.msra.mxu0 %vm869_vm0, %v4730_v50  ;;  %7962 = vmatpush3.msra.mxu1 %v5161_v48 }
 0xfe1   : > { %7921 = vmatprep.subr.msk.mxu0 %vm869_vm0, %v4728_v38  ;;  %7963 = vmatprep.subr.mxu1 %v5159_v33 }
 0xfe2   : > { %7964 = vmatpush3.msra.mxu1 %v5159_v33 }
 0xfe4   : > { %7922 = vmatpush3.xpose.msk.msra.mxu0 %vm869_vm0, %v4728_v38 }
 0xfe5   : > { %7923 = vmatprep.subr.msk.mxu0 %vm869_vm0, %v4726_v45 }
 0xfe8   : > { %7924 = vmatpush3.xpose.msk.msra.mxu0 %vm869_vm0, %v4726_v45 }
 0xfeb   : > { %7926 = vmatmul.mubr.msk.f32.vlgmr.msra.gmra.mxu0 %vm869_vm0, %v10517_v36 }
 0xfec   : > { %7928 = vmatprep.mubr.msk.f32.mxu0 %vm869_vm0, %v10521_v44 }
 0xfef   : > { %7929 = vmatmul.mubr.msk.f32.gmra.mxu0 %vm869_vm0, %v10509_v29 }
 0xff0   : > { %7931 = vmatprep.mubr.msk.f32.mxu0 %vm869_vm0, %v10513_v43 }
 0xff3   : > { %7932 = vmatmul.mubr.msk.f32.gmra.mxu0 %vm869_vm0, %v10501_v59 }
 0xff4   : > { %7934 = vmatprep.mubr.msk.f32.mxu0 %vm869_vm0, %v10505_v16 }
 0xff7   : > { %7935 = vmatmul.mubr.msk.f32.gmra.mxu0 %vm869_vm0, %v10493_v15 }
 0xff8   : > { %7937 = vmatprep.mubr.msk.f32.mxu0 %vm869_vm0, %v10497_v35 }
 0xffb   : > { %7938 = vmatmul.mubr.msk.f32.gmra.mxu0 %vm869_vm0, %v10485_v60 }
 0xffc   : > { %7940 = vmatprep.mubr.msk.f32.mxu0 %vm869_vm0, %v10489_v46 }
 0xfff   : > { %7941 = vmatmul.mubr.msk.f32.gmra.mxu0 %vm869_vm0, %v10477_v63 }
0x1000   : > { %7943 = vmatprep.mubr.msk.f32.mxu0 %vm869_vm0, %v10481_v6 }
0x1003   : > { %7944 = vmatmul.mubr.msk.f32.gmra.mxu0 %vm869_vm0, %v10473_v39 }
0x1004   : > { %7946 = vmatprep.mubr.msk.f32.mxu0 %vm869_vm0, %v10469_v61 }
0x1007   : > { %7947 = vmatmul.mubr.msk.f32.gmra.mxu0 %vm869_vm0, %v10467_v5  ;;  %vm11556_vm0 = vcmp.gt.f32.partialorder %v9575_v42, 0.5 }
0x10ab   : > { %v7927_v35 = vpop.f32.mrf.mxu0 }
0x10ac   : > { %v4967_v60 = vmul.f32 0.25, %v7927_v35 }
0x10ad   : > { %v4887_v16 = vpop.f32.mrf.mxu0 }
0x10ae   : > { %v4966_v0 = vmul.f32 0.25, %v4887_v16  ;;  %v10611_v46 = vsel %vm849_vm4, %v4967_v60, -1e+09  ;;  %vm11557_vm4 = vcmp.gt.f32.partialorder %v9591_v3, 0.5 }
0x10af   : > { %5000 = vmax.xlane.f32.xlu1 %v10611_v46  ;;  %v7930_v63 = vpop.f32.mrf.mxu0 }
0x10b0   : > { %v4969_v6 = vmul.f32 0.25, %v7930_v63  ;;  %v10616_v39 = vsel %vm848_vm7, %v4966_v0, -1e+09  ;;  %vm11558_vm7 = vcmp.gt.f32.partialorder %v9597_v47, 0.5 }
0x10b1   : > { %4998 = vmax.xlane.f32.xlu0 %v10616_v39  ;;  %v4897_v61 = vpop.f32.mrf.mxu0 }
0x10b2   : > { %v4968_v2 = vmul.f32 0.25, %v4897_v61  ;;  %v10621_v54 = vsel %vm851_vm8, %v4969_v6, -1e+09  ;;  %vm11559_vm8 = vcmp.gt.f32.partialorder %v9608_v53, 0.5 }
0x10b3   : > { %v7933_v5 = vpop.f32.mrf.mxu0 }
0x10b4   : > { %v4971_v58 = vmul.f32 0.25, %v7933_v5  ;;  %v10626_v38 = vsel %vm850_vm9, %v4968_v2, -1e+09  ;;  %vm11560_vm9 = vcmp.gt.f32.partialorder %v9621_v27, 0.5  ;;  %v5155_v27 = vpop.permute.xlu0 %5154 }
0x10b5   : > { %5004 = vmax.xlane.f32.xlu0 %v10621_v54  ;;  %v4907_v14 = vpop.f32.mrf.mxu0 }
0x10b6   : > { %v10631_v45 = vsel %vm853_vm10, %v4971_v58, -1e+09  ;;  %v4970_v16 = vmul.f32 0.25, %v4907_v14  ;;  %vm11561_vm10 = vcmp.gt.f32.partialorder %v9634_v32, 0.5 }
0x10b7   : > { %v7936_v23 = vpop.f32.mrf.mxu0 }
0x10b8   : > { %v4973_v51 = vmul.f32 0.25, %v7936_v23  ;;  %v10663_v0 = vsel %vm11557_vm4, %v4970_v16, -1e+09 }
0x10b9   : > { %5002 = vmax.xlane.f32.xlu0 %v10626_v38  ;;  %v4917_v31 = vpop.f32.mrf.mxu0 }
0x10ba   : > { %v10638_v10 = vsel %vm855_vm11, %v4973_v51, -1e+09  ;;  %v4972_v1 = vmul.f32 0.25, %v4917_v31  ;;  %vm11562_vm11 = vcmp.gt.f32.partialorder %v9647_v18, 0.5 }
0x10bb   : > { %v7939_v50 = vpop.f32.mrf.mxu0 }
0x10bc   : > { %v4975_v26 = vmul.f32 0.25, %v7939_v50  ;;  %v10670_v52 = vsel %vm11558_vm7, %v4972_v1, -1e+09 }
0x10bd   : > { %5008 = vmax.xlane.f32.xlu0 %v10631_v45  ;;  %v4927_v4 = vpop.f32.mrf.mxu0 }
0x10be   : > { %v10643_v62 = vsel %vm857_vm12, %v4975_v26, -1e+09  ;;  %v4974_v63 = vmul.f32 0.25, %v4927_v4  ;;  %vm6321_vm12 = vcmask 400384  }
0x10bf   : > { %v7942_v49 = vpop.f32.mrf.mxu0 }
0x10c0   : > { %5156 = vrot.lane.b32.xlu1 %v10493_v15, %s8558_s3  ;;  %v4977_v40 = vmul.f32 0.25, %v7942_v49  ;;  %v10677_v3 = vsel %vm11559_vm8, %v4974_v63, -1e+09 }
0x10c1   : > { %5012 = vmax.xlane.f32.xlu0 %v10638_v10  ;;  %v4937_v33 = vpop.f32.mrf.mxu0 }
0x10c2   : > { %v10648_v15 = vsel %vm859_vm13, %v4977_v40, -1e+09  ;;  %v4976_v42 = vmul.f32 0.25, %v4937_v33 }
0x10c3   : > { %v7945_v57 = vpop.f32.mrf.mxu0 }
0x10c4   : > { %v4979_v48 = vmul.f32 0.25, %v7945_v57  ;;  %v10684_v47 = vsel %vm11560_vm9, %v4976_v42, -1e+09 }
0x10c5   : > { %5016 = vmax.xlane.f32.xlu0 %v10643_v62  ;;  %v4947_v24 = vpop.f32.mrf.mxu0 }
0x10c6   : > { %v10653_v60 = vsel %vm861_vm14, %v4979_v48, -1e+09  ;;  %v4978_v6 = vmul.f32 0.25, %v4947_v24 }
0x10c7   : > { %v7948_v37 = vpop.f32.mrf.mxu0 }
0x10c8   : > { %v4981_v35 = vmul.f32 0.25, %v7948_v37 }
0x10c9   : > { %5020 = vmax.xlane.f32.xlu0 %v10648_v15 }
0x10ca   : > { %v10658_v17 = vsel %vm11556_vm0, %v4981_v35, -1e+09 }
0x10cd   : > { %5024 = vmax.xlane.f32.xlu0 %v10653_v60 }
0x10d1   : > { %5028 = vmax.xlane.f32.xlu0 %v10658_v17 }
0x10e4   : > { %5006 = vmax.xlane.f32.xlu1 %v10663_v0 }
0x10e7   : > { %5150 = vrot.lane.b32.xlu0 %v10513_v43, %s8558_s3  ;;  %v4957_v43 = vpop.f32.mrf.mxu0 }
0x10e8   : > { %5010 = vmax.xlane.f32.xlu1 %v10670_v52  ;;  %v4980_v61 = vmul.f32 0.25, %v4957_v43 }
0x10ea   : > { %v10694_v53 = vsel %vm11562_vm11, %v4980_v61, -1e+09 }
0x10eb   : > { %5146 = vrot.lane.b32.xlu0 %v10521_v44, %s8558_s3  ;;  %v10689_v44 = vsel %vm11561_vm10, %v4978_v6, -1e+09 }
0x10ec   : > { %5014 = vmax.xlane.f32.xlu1 %v10677_v3 }
0x10ef   : > { %5142 = vrot.lane.b32.xlu0 %v10463_v56, %s8558_s3 }
0x10f0   : > { %5018 = vmax.xlane.f32.xlu1 %v10684_v47 }
0x10f4   : > { %5022 = vmax.xlane.f32.xlu1 %v10689_v44 }
0x10f8   : > { %5026 = vmax.xlane.f32.xlu1 %v10694_v53 }
0x1109   : > { %5152 = vrot.lane.b32.xlu1 %v10501_v59, %s8558_s3 }
0x110d   : > { %5148 = vrot.lane.b32.xlu1 %v10509_v29, %s8558_s3 }
0x1111   : > { %5144 = vrot.lane.b32.xlu1 %v10517_v36, %s8558_s3  ;;  %s8560_s3 = smov 49  }
0x1138   : > { %v5001_v32 = vpop.xlane.xlu1 %5000 }
0x1139   : > { %v5031_v56 = vsub.f32 %v10611_v46, %v5001_v32 }
0x113a   : > { %v4999_v5 = vpop.xlane.xlu0 %4998 }
0x113b   : > { %v5048_v2 = vmul.f32 1.442695, %v5031_v56  ;;  %v5030_v18 = vsub.f32 %v10616_v39, %v4999_v5 }
0x113c   : > { %v5157_v14 = vpop.permute.xlu1 %5156 }
0x113d   : > { %8398 = vpow2.f32 %v5048_v2  ;;  %v5046_v23 = vmul.f32 1.442695, %v5030_v18  ;;  %7965 = vmatprep.subr.mxu1 %v5157_v14 }
0x113e   : > { %7966 = vmatpush3.msra.mxu1 %v5157_v14  ;;  %v5005_v59 = vpop.xlane.xlu0 %5004 }
0x113f   : > { %8400 = vpow2.f32 %v5046_v23  ;;  %v5033_v29 = vsub.f32 %v10621_v54, %v5005_v59  ;;  %7967 = vmatprep.subr.mxu1 %v5155_v27 }
0x1140   : > { %7968 = vmatpush3.msra.mxu1 %v5155_v27 }
0x1141   : > { %v5052_v36 = vmul.f32 1.442695, %v5033_v29 }
0x1142   : > { %v5003_v58 = vpop.xlane.xlu0 %5002 }
0x1143   : > { %8402 = vpow2.f32 %v5052_v36  ;;  %v5032_v46 = vsub.f32 %v10626_v38, %v5003_v58 }
0x1145   : > { %v5050_v31 = vmul.f32 1.442695, %v5032_v46 }
0x1146   : > { %v5009_v50 = vpop.xlane.xlu0 %5008 }
0x1147   : > { %8404 = vpow2.f32 %v5050_v31  ;;  %v5035_v39 = vsub.f32 %v10631_v45, %v5009_v50 }
0x1149   : > { %v5056_v51 = vmul.f32 1.442695, %v5035_v39 }
0x114a   : > { %v10708_v4 = vpop.eup %8398  ;;  %v5013_v49 = vpop.xlane.xlu0 %5012 }
0x114b   : > { %8406 = vpow2.f32 %v5056_v51  ;;  %v5037_v26 = vsub.f32 %v10638_v10, %v5013_v49  ;;  %5080 = vadd.xlane.f32.xlu0 %v10708_v4 }
0x114c   : > { %v10712_v54 = vpop.eup %8400 }
0x114d   : > { %v5060_v33 = vmul.f32 1.442695, %v5037_v26  ;;  %5078 = vadd.xlane.f32.xlu1 %v10712_v54 }
0x114e   : > { %v5017_v38 = vpop.xlane.xlu0 %5016 }
0x114f   : > { %8408 = vpow2.f32 %v5060_v33  ;;  %v5039_v57 = vsub.f32 %v10643_v62, %v5017_v38  ;;  %v11564_v33 = vld [vmem:[#allocation26_spill] sm:$0xff] }
0x1150   : > { %v10716_v40 = vpop.eup %8402 }
0x1151   : > { %v5064_v45 = vmul.f32 1.442695, %v5039_v57  ;;  %5084 = vadd.xlane.f32.xlu0 %v10716_v40 }
0x1152   : > { %v5021_v24 = vpop.xlane.xlu0 %5020 }
0x1153   : > { %8410 = vpow2.f32 %v5064_v45  ;;  %v5041_v10 = vsub.f32 %v10648_v15, %v5021_v24  ;;  %v11565_v45 = vld [vmem:[#allocation28_spill] sm:$0xff] }
0x1154   : > { %v10720_v48 = vpop.eup %8404 }
0x1155   : > { %v5068_v37 = vmul.f32 1.442695, %v5041_v10  ;;  %5082 = vadd.xlane.f32.xlu1 %v10720_v48 }
0x1156   : > { %v5025_v35 = vpop.xlane.xlu0 %5024 }
0x1157   : > { %8412 = vpow2.f32 %v5068_v37  ;;  %v5043_v16 = vsub.f32 %v10653_v60, %v5025_v35  ;;  %v11566_v35 = vld [vmem:[#allocation30_spill] sm:$0xff] }
0x1158   : > { %v10724_v1 = vpop.eup %8406 }
0x1159   : > { %v5072_v62 = vmul.f32 1.442695, %v5043_v16  ;;  %5088 = vadd.xlane.f32.xlu0 %v10724_v1  ;;  %v11567_v16 = vld [vmem:[#allocation23_spill] sm:$0xff] }
0x115a   : > { %v5029_v63 = vpop.xlane.xlu0 %5028 }
0x115b   : > { %8414 = vpow2.f32 %v5072_v62  ;;  %v5045_v42 = vsub.f32 %v10658_v17, %v5029_v63  ;;  %v11568_v63 = vld [vmem:[#allocation32_spill] sm:$0xff] }
0x115c   : > { %v10728_v6 = vpop.eup %8408 }
0x115d   : > { %v5076_v15 = vmul.f32 1.442695, %v5045_v42  ;;  %5092 = vadd.xlane.f32.xlu0 %v10728_v6  ;;  %v11569_v42 = vld [vmem:[#allocation34_spill] sm:$0xff] }
0x115e   : > { %v5151_v51 = vpop.permute.xlu0 %5150 }
0x115f   : > { %8416 = vpow2.f32 %v5076_v15  ;;  %v11570_v15 = vld [vmem:[#allocation36_spill] sm:$0xff] }
0x1160   : > { %v10731_v43 = vpop.eup %8410 }
0x1161   : > { %5096 = vadd.xlane.f32.xlu0 %v10731_v43 }
0x1164   : > { %v10734_v60 = vpop.eup %8412 }
0x1165   : > { %5100 = vadd.xlane.f32.xlu0 %v10734_v60 }
0x1168   : > { %v10737_v61 = vpop.eup %8414 }
0x1169   : > { %5104 = vadd.xlane.f32.xlu0 %v10737_v61 }
0x116c   : > { %v10740_v27 = vpop.eup %8416 }
0x116d   : > { %v5007_v17 = vpop.xlane.xlu1 %5006  ;;  %5108 = vadd.xlane.f32.xlu0 %v10740_v27 }
0x116e   : > { %v5034_v32 = vsub.f32 %v10663_v0, %v5007_v17  ;;  %v11571_v17 = vld [vmem:[#allocation38_spill] sm:$0xff] }
0x1170   : > { %v5054_v56 = vmul.f32 1.442695, %v5034_v32  ;;  %v11572_v32 = vld [vmem:[#allocation25_spill] sm:$0xff] }
0x1171   : > { %v5011_v5 = vpop.xlane.xlu1 %5010 }
0x1172   : > { %8418 = vpow2.f32 %v5054_v56  ;;  %v5036_v2 = vsub.f32 %v10670_v52, %v5011_v5  ;;  %v11573_v56 = vld [vmem:[#allocation27_spill] sm:$0xff]  ;;  %v11574_v5 = vld [vmem:[#allocation29_spill] sm:$0xff] }
0x1174   : > { %v5058_v18 = vmul.f32 1.442695, %v5036_v2 }
0x1175   : > { %v5015_v14 = vpop.xlane.xlu1 %5014 }
0x1176   : > { %8420 = vpow2.f32 %v5058_v18  ;;  %v5038_v23 = vsub.f32 %v10677_v3, %v5015_v14  ;;  %v11580_v18 = vld [vmem:[#allocation22_spill] sm:$0xff] }
0x1178   : > { %v5062_v59 = vmul.f32 1.442695, %v5038_v23 }
0x1179   : > { %v5019_v29 = vpop.xlane.xlu1 %5018 }
0x117a   : > { %8422 = vpow2.f32 %v5062_v59  ;;  %v5040_v36 = vsub.f32 %v10684_v47, %v5019_v29  ;;  %v11563_v47 = vld [vmem:[#allocation24_spill] sm:$0xff]  ;;  %v11582_v59 = vld [vmem:[#allocation21_spill] sm:$0xff] }
0x117c   : > { %v5066_v58 = vmul.f32 1.442695, %v5040_v36  ;;  %v11583_v36 = vld [vmem:[#allocation18_spill] sm:$0xff] }
0x117d   : > { %v5023_v46 = vpop.xlane.xlu1 %5022 }
0x117e   : > { %8424 = vpow2.f32 %v5066_v58  ;;  %v5042_v0 = vsub.f32 %v10689_v44, %v5023_v46 }
0x117f   : > { %v10748_v31 = vpop.eup %8418 }
0x1180   : > { %v5070_v50 = vmul.f32 1.442695, %v5042_v0  ;;  %5086 = vadd.xlane.f32.xlu1 %v10748_v31 }
0x1181   : > { %v5027_v52 = vpop.xlane.xlu1 %5026 }
0x1182   : > { %8426 = vpow2.f32 %v5070_v50  ;;  %v5044_v39 = vsub.f32 %v10694_v53, %v5027_v52  ;;  %v5147_v53 = vpop.permute.xlu0 %5146  ;;  %v11585_v50 = vld [vmem:[#allocation16_spill] sm:$0xff] }
0x1183   : > { %v10752_v3 = vpop.eup %8420  ;;  %6112 = vrot.lane.b32.xlu0 %v11563_v47, %s8560_s3  ;;  %v11587_v47 = vld [vmem:[#allocation14_spill] sm:$0xff] }
0x1184   : > { %v5074_v49 = vmul.f32 1.442695, %v5044_v39  ;;  %5090 = vadd.xlane.f32.xlu1 %v10752_v3  ;;  %v11586_v39 = vld [vmem:[#allocation17_spill] sm:$0xff] }
0x1185   : > { %v5153_v44 = vpop.permute.xlu1 %5152 }
0x1186   : > { %8428 = vpow2.f32 %v5074_v49  ;;  %7969 = vmatprep.subr.mxu1 %v5153_v44  ;;  %v5143_v37 = vpop.permute.xlu0 %5142 }
0x1187   : > { %v10757_v26 = vpop.eup %8422  ;;  %7970 = vmatpush3.msra.mxu1 %v5153_v44  ;;  %6116 = vrot.lane.b32.xlu0 %v11564_v33, %s8560_s3  ;;  %v11588_v44 = vld [vmem:[#allocation15_spill] sm:$0xff] }
0x1188   : > { %5094 = vadd.xlane.f32.xlu1 %v10757_v26  ;;  %7971 = vmatprep.subr.mxu1 %v5151_v51 }
0x1189   : > { %v5149_v38 = vpop.permute.xlu1 %5148  ;;  %7972 = vmatpush3.msra.mxu1 %v5151_v51 }
0x118a   : > { %7973 = vmatprep.subr.mxu1 %v5149_v38 }
0x118b   : > { %v10762_v57 = vpop.eup %8424  ;;  %6120 = vrot.lane.b32.xlu0 %v11565_v45, %s8560_s3  ;;  %7974 = vmatpush3.msra.mxu1 %v5149_v38  ;;  %v11590_v45 = vld [vmem:[#allocation13_spill] sm:$0xff] }
0x118c   : > { %5098 = vadd.xlane.f32.xlu1 %v10762_v57  ;;  %7975 = vmatprep.subr.mxu1 %v5147_v53 }
0x118d   : > { %v5145_v24 = vpop.permute.xlu1 %5144  ;;  %7976 = vmatpush3.msra.mxu1 %v5147_v53  ;;  %v11589_v53 = vld [vmem:[#allocation12_spill] sm:$0xff] }
0x118e   : > { %7977 = vmatprep.subr.mxu1 %v5145_v24 }
0x118f   : > { %v10767_v10 = vpop.eup %8426  ;;  %6124 = vrot.lane.b32.xlu0 %v11566_v35, %s8560_s3  ;;  %7978 = vmatpush3.msra.mxu1 %v5145_v24 }
0x1190   : > { %5102 = vadd.xlane.f32.xlu1 %v10767_v10  ;;  %7979 = vmatprep.subr.mxu1 %v5143_v37 }
0x1191   : > { %7980 = vmatpush3.msra.mxu1 %v5143_v37  ;;  %v11591_v37 = vld [vmem:[#allocation10_spill] sm:$0xff] }
0x1192   : > { %8005 = vmatprep.subr.mxu1 %v11567_v16 }
0x1193   : > { %v10773_v62 = vpop.eup %8428  ;;  %6128 = vrot.lane.b32.xlu0 %v11568_v63, %s8560_s3  ;;  %v11592_v63 = vld [vmem:[#allocation11_spill] sm:$0xff] }
0x1194   : > { %5106 = vadd.xlane.f32.xlu1 %v10773_v62 }
0x1197   : > { %6132 = vrot.lane.b32.xlu0 %v11569_v42, %s8560_s3  ;;  %v11593_v42 = vld [vmem:[#allocation8_spill] sm:$0xff] }
0x119b   : > { %6136 = vrot.lane.b32.xlu0 %v11570_v15, %s8560_s3 }
0x119f   : > { %6140 = vrot.lane.b32.xlu0 %v11571_v17, %s8560_s3 }
0x11a3   : > { %6176 = vrot.lane.b32.xlu0 %v10284_v21, %s8560_s3  ;;  %v11575_v21 = vld [vmem:[#allocation31_spill] sm:$0xff] }
0x11a5   : > { %6114 = vrot.lane.b32.xlu1 %v11572_v32, %s8560_s3 }
0x11a7   : > { %6180 = vrot.lane.b32.xlu0 %v10298_v7, %s8560_s3  ;;  %v11576_v7 = vld [vmem:[#allocation33_spill] sm:$0xff] }
0x11a9   : > { %6118 = vrot.lane.b32.xlu1 %v11573_v56, %s8560_s3 }
0x11ab   : > { %6184 = vrot.lane.b32.xlu0 %v10315_v9, %s8560_s3  ;;  %v11577_v9 = vld [vmem:[#allocation35_spill] sm:$0xff] }
0x11ad   : > { %6122 = vrot.lane.b32.xlu1 %v11574_v5, %s8560_s3 }
0x11af   : > { %6188 = vrot.lane.b32.xlu0 %v10323_v41, %s8560_s3  ;;  %v11578_v41 = vld [vmem:[#allocation37_spill] sm:$0xff] }
0x11b1   : > { %6126 = vrot.lane.b32.xlu1 %v11575_v21, %s8560_s3 }
0x11b3   : > { %6192 = vrot.lane.b32.xlu0 %v10331_v34, %s8560_s3  ;;  %v11579_v34 = vld [vmem:[#allocation39_spill] sm:$0xff] }
0x11b5   : > { %6130 = vrot.lane.b32.xlu1 %v11576_v7, %s8560_s3 }
0x11b7   : > { %6196 = vrot.lane.b32.xlu0 %v10339_v55, %s8560_s3 }
0x11b9   : > { %6134 = vrot.lane.b32.xlu1 %v11577_v9, %s8560_s3 }
0x11bb   : > { %6200 = vrot.lane.b32.xlu0 %v10347_v11, %s8560_s3 }
0x11bd   : > { %6138 = vrot.lane.b32.xlu1 %v11578_v41, %s8560_s3 }
0x11bf   : > { %6204 = vrot.lane.b32.xlu0 %v10355_v12, %s8560_s3 }
0x11c1   : > { %6142 = vrot.lane.b32.xlu1 %v11579_v34, %s8560_s3 }
0x11c5   : > { %6178 = vrot.lane.b32.xlu1 %v10287_v20, %s8560_s3 }
0x11c9   : > { %6182 = vrot.lane.b32.xlu1 %v10301_v8, %s8560_s3 }
0x11cd   : > { %6186 = vrot.lane.b32.xlu1 %v10318_v25, %s8560_s3 }
0x11d1   : > { %6190 = vrot.lane.b32.xlu1 %v10326_v30, %s8560_s3 }
0x11d4   : > { %v5081_v55 = vpop.xlane.xlu0 %5080 }
0x11d5   : > { %8430 = vrcp.f32 %v5081_v55  ;;  %6194 = vrot.lane.b32.xlu1 %v10334_v28, %s8560_s3 }
0x11d6   : > { %v5079_v11 = vpop.xlane.xlu1 %5078 }
0x11d7   : > { %8432 = vrcp.f32 %v5079_v11 }
0x11d9   : > { %6198 = vrot.lane.b32.xlu1 %v10342_v22, %s8560_s3 }
0x11da   : > { %v5085_v20 = vpop.xlane.xlu0 %5084 }
0x11db   : > { %8434 = vrcp.f32 %v5085_v20 }
0x11dd   : > { %6202 = vrot.lane.b32.xlu1 %v10350_v13, %s8560_s3 }
0x11de   : > { %v5083_v8 = vpop.xlane.xlu1 %5082 }
0x11df   : > { %8436 = vrcp.f32 %v5083_v8 }
0x11e1   : > { %6206 = vrot.lane.b32.xlu1 %v10358_v19, %s8560_s3 }
0x11e2   : > { %v8431_v25 = vpop.eup %8430  ;;  %v5089_v30 = vpop.xlane.xlu0 %5088 }
0x11e3   : > { %8438 = vrcp.f32 %v5089_v30  ;;  %v5113_v28 = vmul.f32 %v8431_v25, %v10708_v4 }
0x11e4   : > { %v8433_v12 = vpop.eup %8432 }
0x11e5   : > { %6242 = vrot.lane.b32.xlu1 %v5113_v28, %s8560_s3  ;;  %v5111_v22 = vmul.f32 %v8433_v12, %v10712_v54  ;;  %v11581_v54 = vld [vmem:[#allocation20_spill] sm:$0xff] }
0x11e6   : > { %v5093_v2 = vpop.xlane.xlu0 %5092 }
0x11e7   : > { %8440 = vrcp.f32 %v5093_v2  ;;  %7981 = vmatprep.mubr.f32.mxu1 %v5111_v22  ;;  %6240 = vrot.lane.b32.xlu0 %v5111_v22, %s8560_s3 }
0x11e8   : > { %v8435_v13 = vpop.eup %8434  ;;  %7982 = vmatmul.mubr.f32.vlgmr.msra.gmra.mxu1 %v5113_v28 }
0x11e9   : > { %8006 = vmatpush3.msra.mxu1 %v11567_v16  ;;  %v5117_v19 = vmul.f32 %v8435_v13, %v10716_v40 }
0x11ea   : > { %8007 = vmatprep.subr.mxu1 %v11580_v18  ;;  %v5097_v14 = vpop.xlane.xlu0 %5096 }
0x11eb   : > { %8008 = vmatpush3.msra.mxu1 %v11580_v18  ;;  %8442 = vrcp.f32 %v5097_v14  ;;  %6246 = vrot.lane.b32.xlu1 %v5117_v19, %s8560_s3 }
0x11ec   : > { %v8437_v4 = vpop.eup %8436  ;;  %8009 = vmatprep.subr.mxu1 %v11581_v54 }
0x11ed   : > { %8010 = vmatpush3.msra.mxu1 %v11581_v54  ;;  %v5115_v23 = vmul.f32 %v8437_v4, %v10720_v48  ;;  %v11584_v48 = vld [vmem:[#allocation19_spill] sm:$0xff] }
0x11ee   : > { %8011 = vmatprep.subr.mxu1 %v11582_v59  ;;  %v5101_v29 = vpop.xlane.xlu0 %5100 }
0x11ef   : > { %8012 = vmatpush3.msra.mxu1 %v11582_v59  ;;  %8444 = vrcp.f32 %v5101_v29  ;;  %6244 = vrot.lane.b32.xlu0 %v5115_v23, %s8560_s3 }
0x11f0   : > { %v8439_v40 = vpop.eup %8438  ;;  %7984 = vmatprep.mubr.f32.mxu1 %v5115_v23  ;;  %8013 = vmatprep.subr.mxu1 %v11583_v36 }
0x11f1   : > { %7985 = vmatmul.mubr.f32.gmra.mxu1 %v5117_v19  ;;  %v10849_v58 = vmul.f32 %v8439_v40, %v10724_v1 }
0x11f2   : > { %8014 = vmatpush3.msra.mxu1 %v11583_v36  ;;  %v5105_v46 = vpop.xlane.xlu0 %5104 }
0x11f3   : > { %8015 = vmatprep.subr.mxu1 %v11584_v48  ;;  %8446 = vrcp.f32 %v5105_v46  ;;  %6250 = vrot.lane.b32.xlu1 %v10849_v58, %s8560_s3 }
0x11f4   : > { %v8441_v0 = vpop.eup %8440  ;;  %8016 = vmatpush3.msra.mxu1 %v11584_v48 }
0x11f5   : > { %8017 = vmatprep.subr.mxu1 %v11585_v50  ;;  %v10858_v52 = vmul.f32 %v8441_v0, %v10728_v6 }
0x11f6   : > { %8018 = vmatpush3.msra.mxu1 %v11585_v50  ;;  %v5109_v1 = vpop.xlane.xlu0 %5108 }
0x11f7   : > { %8019 = vmatprep.subr.mxu1 %v11586_v39  ;;  %6254 = vrot.lane.b32.xlu1 %v10858_v52, %s8560_s3 }
0x11f8   : > { %v8443_v51 = vpop.eup %8442  ;;  %8020 = vmatpush3.msra.mxu1 %v11586_v39 }
0x11f9   : > { %8021 = vmatprep.subr.mxu1 %v11587_v47  ;;  %v10867_v49 = vmul.f32 %v8443_v51, %v10731_v43 }
0x11fa   : > { %8022 = vmatpush3.msra.mxu1 %v11587_v47  ;;  %v10870_v6 = vpop.permute.xlu0 %6112 }
0x11fb   : > { %8023 = vmatprep.subr.mxu1 %v11588_v44  ;;  %6258 = vrot.lane.b32.xlu1 %v10867_v49, %s8560_s3 }
0x11fc   : > { %v8445_v33 = vpop.eup %8444  ;;  %8024 = vmatpush3.msra.mxu1 %v11588_v44 }
0x11fd   : > { %8025 = vmatprep.subr.mxu1 %v11589_v53  ;;  %v10878_v38 = vmul.f32 %v8445_v33, %v10734_v60 }
0x11fe   : > { %8026 = vmatpush3.msra.mxu1 %v11589_v53  ;;  %v10881_v43 = vpop.permute.xlu0 %6116 }
0x11ff   : > { %8027 = vmatprep.subr.mxu1 %v11590_v45  ;;  %6262 = vrot.lane.b32.xlu1 %v10878_v38, %s8560_s3 }
0x1200   : > { %v8447_v24 = vpop.eup %8446  ;;  %8028 = vmatpush3.msra.mxu1 %v11590_v45 }
0x1201   : > { %8029 = vmatprep.subr.mxu1 %v11591_v37  ;;  %v10889_v35 = vmul.f32 %v8447_v24, %v10737_v61  ;;  %v11594_v61 = vld [vmem:[#allocation9_spill] sm:$0xff] }
0x1202   : > { %8030 = vmatpush3.msra.mxu1 %v11591_v37  ;;  %v10892_v60 = vpop.permute.xlu0 %6120 }
0x1203   : > { %8031 = vmatprep.subr.mxu1 %v11592_v63  ;;  %6266 = vrot.lane.b32.xlu1 %v10889_v35, %s8560_s3 }
0x1204   : > { %8032 = vmatpush3.msra.mxu1 %v11592_v63 }
0x1205   : > { %8033 = vmatprep.subr.mxu1 %v11593_v42 }
0x1206   : > { %8034 = vmatpush3.msra.mxu1 %v11593_v42  ;;  %v10900_v15 = vpop.permute.xlu0 %6124 }
0x1207   : > { %8035 = vmatprep.subr.mxu1 %v11594_v61 }
0x1208   : > { %8036 = vmatpush3.msra.mxu1 %v11594_v61 }
0x1209   : > { %v5087_v17 = vpop.xlane.xlu1 %5086 }
0x120a   : > { %8448 = vrcp.f32 %v5087_v17  ;;  %v10904_v32 = vpop.permute.xlu0 %6128 }
0x120d   : > { %v5091_v56 = vpop.xlane.xlu1 %5090 }
0x120e   : > { %8450 = vrcp.f32 %v5091_v56  ;;  %v10906_v5 = vpop.permute.xlu0 %6132 }
0x1211   : > { %v5095_v21 = vpop.xlane.xlu1 %5094 }
0x1212   : > { %8452 = vrcp.f32 %v5095_v21  ;;  %v10908_v7 = vpop.permute.xlu0 %6136 }
0x1215   : > { %v5099_v9 = vpop.xlane.xlu1 %5098 }
0x1216   : > { %8454 = vrcp.f32 %v5099_v9  ;;  %v10911_v41 = vpop.permute.xlu0 %6140 }
0x1217   : > { %v8449_v34 = vpop.eup %8448 }
0x1218   : > { %v5119_v55 = vmul.f32 %v8449_v34, %v10748_v31  ;;  %v8480_v34 = vld [vmem:[%s11429_s4 + $0x18] sm:$0xff] }
0x1219   : > { %v5103_v11 = vpop.xlane.xlu1 %5102 }
0x121a   : > { %8456 = vrcp.f32 %v5103_v11  ;;  %6248 = vrot.lane.b32.xlu0 %v5119_v55, %s8560_s3  ;;  %7987 = vmatprep.mubr.f32.mxu1 %v5119_v55  ;;  %v10917_v20 = vpop.permute.xlu0 %6176  ;;  %v5338_v55 = vmul.f32 0.25, %v8480_v34 }
0x121b   : > { %v8451_v8 = vpop.eup %8450  ;;  %v6338_v25 = vsel %vm6321_vm12, %v10870_v6, %v10917_v20  ;;  %7988 = vmatmul.mubr.f32.gmra.mxu1 %v10849_v58  ;;  %8458 = vrcp.f32 %v5109_v1 }
0x121c   : > { %6387 = vst [vmem:[%s10923_s29 + $0x8] sm:$0xff] %v6338_v25  ;;  %v5123_v31 = vmul.f32 %v8451_v8, %v10752_v3  ;;  %v8481_v8 = vld [vmem:[%s11429_s4 + $0x20] sm:$0xff] }
0x121d   : > { %v5107_v30 = vpop.xlane.xlu1 %5106  ;;  %v5339_v25 = vmul.f32 0.25, %v8481_v8 }
0x121e   : > { %8460 = vrcp.f32 %v5107_v30  ;;  %6252 = vrot.lane.b32.xlu0 %v5123_v31, %s8560_s3  ;;  %7990 = vmatprep.mubr.f32.mxu1 %v5123_v31  ;;  %v10928_v28 = vpop.permute.xlu0 %6180 }
0x121f   : > { %v8453_v12 = vpop.eup %8452  ;;  %v6340_v22 = vsel %vm6321_vm12, %v10881_v43, %v10928_v28  ;;  %7991 = vmatmul.mubr.f32.gmra.mxu1 %v10858_v52 }
0x1220   : > { %6395 = vst [vmem:[%s10923_s29 + $0x48] sm:$0xff] %v6340_v22  ;;  %v5127_v2 = vmul.f32 %v8453_v12, %v10757_v26  ;;  %v5515_v12 = vld [vmem:[%s11440_s15 + $0x18] sm:$0xff]  ;;  %v8482_v22 = vld [vmem:[%s11429_s4 + $0x28] sm:$0xff] }
0x1221   : > { %v10936_v3 = vpop.permute.xlu1 %6114  ;;  %8061 = vmatprep.subr.mxu0 %v5515_v12 }
0x1222   : > { %6256 = vrot.lane.b32.xlu0 %v5127_v2, %s8560_s3  ;;  %7993 = vmatprep.mubr.f32.mxu1 %v5127_v2  ;;  %v10939_v13 = vpop.permute.xlu0 %6184  ;;  %v5340_v2 = vmul.f32 0.25, %v8482_v22 }
0x1223   : > { %v8455_v19 = vpop.eup %8454  ;;  %v6342_v14 = vsel %vm6321_vm12, %v10892_v60, %v10939_v13  ;;  %7994 = vmatmul.mubr.f32.gmra.mxu1 %v10867_v49  ;;  %8062 = vmatpush3.msra.mxu0 %v5515_v12  ;;  %v8490_v12 = vld [vmem:[%s11429_s4 + $0x68] sm:$0xff] }
0x1224   : > { %6403 = vst [vmem:[%s10923_s29 + $0x88] sm:$0xff] %v6342_v14  ;;  %v5131_v4 = vmul.f32 %v8455_v19, %v10762_v57  ;;  %v8483_v14 = vld [vmem:[%s11429_s4 + $0x30] sm:$0xff]  ;;  %v5348_v22 = vmul.f32 0.25, %v8490_v12 }
0x1225   : > { %v10947_v23 = vpop.permute.xlu1 %6118  ;;  %v5514_v12 = vld [vmem:[%s11440_s15 + $0x10] sm:$0xff] }
0x1226   : > { %6260 = vrot.lane.b32.xlu0 %v5131_v4, %s8560_s3  ;;  %7996 = vmatprep.mubr.f32.mxu1 %v5131_v4  ;;  %v10950_v26 = vpop.permute.xlu0 %6188  ;;  %v5341_v4 = vmul.f32 0.25, %v8483_v14 }
0x1227   : > { %v8457_v29 = vpop.eup %8456  ;;  %v6344_v40 = vsel %vm6321_vm12, %v10900_v15, %v10950_v26  ;;  %7997 = vmatmul.mubr.f32.gmra.mxu1 %v10878_v38  ;;  %8063 = vmatprep.subr.mxu0 %v5514_v12 }
0x1228   : > { %6411 = vst [vmem:[%s10923_s29 + $0xc8] sm:$0xff] %v6344_v40  ;;  %v5135_v58 = vmul.f32 %v8457_v29, %v10767_v10  ;;  %v8459_v57 = vpop.eup %8458  ;;  %v8477_v10 = vld [vmem:[%s11429_s4] sm:$0xff]  ;;  %v8484_v40 = vld [vmem:[%s11429_s4 + $0x38] sm:$0xff]  ;;  %8064 = vmatpush3.msra.mxu0 %v5514_v12 }
0x1229   : > { %v10958_v46 = vpop.permute.xlu1 %6122  ;;  %v5335_v49 = vmul.f32 0.25, %v8477_v10  ;;  %v10977_v38 = vmul.f32 %v8459_v57, %v10740_v27  ;;  %v8479_v27 = vld [vmem:[%s11429_s4 + $0x10] sm:$0xff]  ;;  %v8485_v57 = vld [vmem:[%s11429_s4 + $0x40] sm:$0xff]  ;;  %v8486_v10 = vld [vmem:[%s11429_s4 + $0x48] sm:$0xff] }
0x122a   : > { %6264 = vrot.lane.b32.xlu0 %v5135_v58, %s8560_s3  ;;  %7999 = vmatprep.mubr.f32.mxu1 %v5135_v58  ;;  %v10961_v0 = vpop.permute.xlu0 %6192  ;;  %v5337_v56 = vmul.f32 0.25, %v8479_v27  ;;  %v5342_v58 = vmul.f32 0.25, %v8484_v40  ;;  %v8492_v40 = vld [vmem:[%s11429_s4 + $0x78] sm:$0xff] }
0x122b   : > { %v8461_v52 = vpop.eup %8460  ;;  %v6346_v1 = vsel %vm6321_vm12, %v10904_v32, %v10961_v0  ;;  %8000 = vmatmul.mubr.f32.gmra.mxu1 %v10889_v35 }
0x122c   : > { %6419 = vst [vmem:[%s10923_s29 + $0x108] sm:$0xff] %v6346_v1  ;;  %v10969_v51 = vmul.f32 %v8461_v52, %v10773_v62  ;;  %v8478_v62 = vld [vmem:[%s11429_s4 + $0x8] sm:$0xff]  ;;  %v5343_v52 = vmul.f32 0.25, %v8485_v57 }
0x122d   : > { %v10974_v33 = vpop.permute.xlu1 %6126  ;;  %v5336_v35 = vmul.f32 0.25, %v8478_v62  ;;  %v8487_v62 = vld [vmem:[%s11429_s4 + $0x50] sm:$0xff] }
0x122e   : > { %8002 = vmatprep.mubr.f32.mxu1 %v10969_v51  ;;  %v10980_v24 = vpop.permute.xlu0 %6196 }
0x122f   : > { %v6348_v17 = vsel %vm6321_vm12, %v10906_v5, %v10980_v24  ;;  %8003 = vmatmul.mubr.f32.gmra.mxu1 %v10977_v38 }
0x1230   : > { %6427 = vst [vmem:[%s10923_s29 + $0x148] sm:$0xff] %v6348_v17  ;;  %8037 = vmatprep.mubr.f32.mxu1 %v5335_v49  ;;  %v5344_v49 = vmul.f32 0.25, %v8486_v10 }
0x1231   : > { %v10993_v21 = vpop.permute.xlu1 %6130 }
0x1232   : > { %v10995_v9 = vpop.permute.xlu0 %6200 }
0x1233   : > { %v6350_v11 = vsel %vm6321_vm12, %v10908_v7, %v10995_v9  ;;  %8038 = vmatmul.mubr.f32.vlgmr.msra.gmra.mxu1 %v5336_v35  ;;  %v5345_v35 = vmul.f32 0.25, %v8487_v62 }
0x1234   : > { %6435 = vst [vmem:[%s10923_s29 + $0x188] sm:$0xff] %v6350_v11  ;;  %8040 = vmatprep.mubr.f32.mxu1 %v5337_v56  ;;  %v8488_v56 = vld [vmem:[%s11429_s4 + $0x58] sm:$0xff] }
0x1235   : > { %v11007_v31 = vpop.permute.xlu1 %6134  ;;  %v5346_v34 = vmul.f32 0.25, %v8488_v56 }
0x1236   : > { %v11009_v30 = vpop.permute.xlu0 %6204 }
0x1237   : > { %v6352_v19 = vsel %vm6321_vm12, %v10911_v41, %v11009_v30  ;;  %8041 = vmatmul.mubr.f32.gmra.mxu1 %v5338_v55  ;;  %v8489_v55 = vld [vmem:[%s11429_s4 + $0x60] sm:$0xff] }
0x1238   : > { %6443 = vst [vmem:[%s10923_s29 + $0x1c8] sm:$0xff] %v6352_v19  ;;  %8043 = vmatprep.mubr.f32.mxu1 %v5339_v25  ;;  %v5347_v11 = vmul.f32 0.25, %v8489_v55 }
0x1239   : > { %v11024_v29 = vpop.permute.xlu1 %6138 }
0x123b   : > { %8044 = vmatmul.mubr.f32.gmra.mxu1 %v5340_v2  ;;  %v8491_v2 = vld [vmem:[%s11429_s4 + $0x70] sm:$0xff] }
0x123c   : > { %8046 = vmatprep.mubr.f32.mxu1 %v5341_v4  ;;  %v5349_v19 = vmul.f32 0.25, %v8491_v2 }
0x123d   : > { %v11032_v1 = vpop.permute.xlu1 %6142 }
0x123f   : > { %8047 = vmatmul.mubr.f32.gmra.mxu1 %v5342_v58  ;;  %v5350_v58 = vmul.f32 0.25, %v8492_v40 }
0x1240   : > { %8049 = vmatprep.mubr.f32.mxu1 %v5343_v52 }
0x1241   : > { %v6179_v17 = vpop.permute.xlu1 %6178 }
0x1242   : > { %v6339_v27 = vsel %vm6321_vm12, %v10936_v3, %v6179_v17 }
0x1243   : > { %6391 = vst [vmem:[%s10923_s29 + $0x28] sm:$0xff] %v6339_v27  ;;  %8050 = vmatmul.mubr.f32.gmra.mxu1 %v5344_v49 }
0x1244   : > { %8052 = vmatprep.mubr.f32.mxu1 %v5345_v35 }
0x1245   : > { %v6183_v8 = vpop.permute.xlu1 %6182 }
0x1246   : > { %v6341_v25 = vsel %vm6321_vm12, %v10947_v23, %v6183_v8 }
0x1247   : > { %6399 = vst [vmem:[%s10923_s29 + $0x68] sm:$0xff] %v6341_v25  ;;  %8053 = vmatmul.mubr.f32.gmra.mxu1 %v5346_v34 }
0x1248   : > { %8055 = vmatprep.mubr.f32.mxu1 %v5347_v11 }
0x1249   : > { %v6187_v14 = vpop.permute.xlu1 %6186 }
0x124a   : > { %v6343_v4 = vsel %vm6321_vm12, %v10958_v46, %v6187_v14 }
0x124b   : > { %6407 = vst [vmem:[%s10923_s29 + $0xa8] sm:$0xff] %v6343_v4  ;;  %8056 = vmatmul.mubr.f32.gmra.mxu1 %v5348_v22 }
0x124c   : > { %8058 = vmatprep.mubr.f32.mxu1 %v5349_v19 }
0x124d   : > { %v6191_v57 = vpop.permute.xlu1 %6190 }
0x124e   : > { %v6345_v52 = vsel %vm6321_vm12, %v10974_v33, %v6191_v57 }
0x124f   : > { %6415 = vst [vmem:[%s10923_s29 + $0xe8] sm:$0xff] %v6345_v52  ;;  %8059 = vmatmul.mubr.f32.gmra.mxu1 %v5350_v58 }
0x1251   : > { %v6195_v10 = vpop.permute.xlu1 %6194 }
0x1252   : > { %v6347_v49 = vsel %vm6321_vm12, %v10993_v21, %v6195_v10 }
0x1253   : > { %6423 = vst [vmem:[%s10923_s29 + $0x128] sm:$0xff] %v6347_v49  ;;  %v5513_v49 = vld [vmem:[%s11440_s15 + $0x8] sm:$0xff] }
0x1254   : > { %8065 = vmatprep.subr.mxu0 %v5513_v49 }
0x1255   : > { %v6199_v62 = vpop.permute.xlu1 %6198  ;;  %8066 = vmatpush3.msra.mxu0 %v5513_v49 }
0x1256   : > { %v6349_v35 = vsel %vm6321_vm12, %v11007_v31, %v6199_v62 }
0x1257   : > { %6431 = vst [vmem:[%s10923_s29 + $0x168] sm:$0xff] %v6349_v35 }
0x1259   : > { %v6203_v27 = vpop.permute.xlu1 %6202  ;;  %v6241_v56 = vpop.permute.xlu0 %6240 }
0x125a   : > { %v6351_v34 = vsel %vm6321_vm12, %v11024_v29, %v6203_v27  ;;  %v6354_v55 = vsel %vm6321_vm12, %v10917_v20, %v6241_v56  ;;  %v6370_v11 = vsel %vm6321_vm12, %v6241_v56, 0.0 }
0x125b   : > { %6439 = vst [vmem:[%s10923_s29 + $0x1a8] sm:$0xff] %v6351_v34  ;;  %6388 = vst [vmem:[%s10923_s29 + $0x10] sm:$0xff] %v6354_v55 }
0x125c   : > { %6389 = vst [vmem:[%s10923_s29 + $0x18] sm:$0xff] %v6370_v11 }
0x125d   : > { %v11081_v25 = vpop.permute.xlu1 %6206 }
0x125e   : > { %v6353_v22 = vsel %vm6321_vm12, %v11032_v1, %v11081_v25 }
0x125f   : > { %6447 = vst [vmem:[%s10923_s29 + $0x1e8] sm:$0xff] %v6353_v22 }
0x1261   : > { %v6243_v20 = vpop.permute.xlu1 %6242  ;;  %v6245_v2 = vpop.permute.xlu0 %6244 }
0x1262   : > { %v6355_v19 = vsel %vm6321_vm12, %v6179_v17, %v6243_v20  ;;  %v6371_v4 = vsel %vm6321_vm12, %v6243_v20, 0.0  ;;  %v6356_v40 = vsel %vm6321_vm12, %v10928_v28, %v6245_v2  ;;  %v6372_v58 = vsel %vm6321_vm12, %v6245_v2, 0.0 }
0x1263   : > { %6392 = vst [vmem:[%s10923_s29 + $0x30] sm:$0xff] %v6355_v19  ;;  %6393 = vst [vmem:[%s10923_s29 + $0x38] sm:$0xff] %v6371_v4 }
0x1264   : > { %6396 = vst [vmem:[%s10923_s29 + $0x50] sm:$0xff] %v6356_v40  ;;  %6397 = vst [vmem:[%s10923_s29 + $0x58] sm:$0xff] %v6372_v58 }
0x1265   : > { %v6247_v52 = vpop.permute.xlu1 %6246 }
0x1266   : > { %v6357_v17 = vsel %vm6321_vm12, %v6183_v8, %v6247_v52  ;;  %v6373_v35 = vsel %vm6321_vm12, %v6247_v52, 0.0  ;;  %v5512_v8 = vld [vmem:[%s11440_s15] sm:$0xff] }
0x1267   : > { %6400 = vst [vmem:[%s10923_s29 + $0x70] sm:$0xff] %v6357_v17  ;;  %6401 = vst [vmem:[%s10923_s29 + $0x78] sm:$0xff] %v6373_v35  ;;  %8067 = vmatprep.subr.mxu0 %v5512_v8 }
0x1268   : > { %8068 = vmatpush3.msra.mxu0 %v5512_v8 }
0x1269   : > { %v6251_v28 = vpop.permute.xlu1 %6250 }
0x126a   : > { %v6359_v56 = vsel %vm6321_vm12, %v6187_v14, %v6251_v28  ;;  %v6375_v34 = vsel %vm6321_vm12, %v6251_v28, 0.0 }
0x126b   : > { %6408 = vst [vmem:[%s10923_s29 + $0xb0] sm:$0xff] %v6359_v56  ;;  %6409 = vst [vmem:[%s10923_s29 + $0xb8] sm:$0xff] %v6375_v34 }
0x126d   : > { %v6255_v55 = vpop.permute.xlu1 %6254 }
0x126e   : > { %v6361_v11 = vsel %vm6321_vm12, %v6191_v57, %v6255_v55  ;;  %v6377_v12 = vsel %vm6321_vm12, %v6255_v55, 0.0 }
0x126f   : > { %6416 = vst [vmem:[%s10923_s29 + $0xf0] sm:$0xff] %v6361_v11  ;;  %6417 = vst [vmem:[%s10923_s29 + $0xf8] sm:$0xff] %v6377_v12 }
0x1271   : > { %v6259_v14 = vpop.permute.xlu1 %6258 }
0x1272   : > { %v6363_v22 = vsel %vm6321_vm12, %v6195_v10, %v6259_v14  ;;  %v6379_v20 = vsel %vm6321_vm12, %v6259_v14, 0.0 }
0x1273   : > { %6424 = vst [vmem:[%s10923_s29 + $0x130] sm:$0xff] %v6363_v22  ;;  %6425 = vst [vmem:[%s10923_s29 + $0x138] sm:$0xff] %v6379_v20 }
0x1275   : > { %v6263_v2 = vpop.permute.xlu1 %6262 }
0x1276   : > { %v6365_v57 = vsel %vm6321_vm12, %v6199_v62, %v6263_v2  ;;  %v6381_v19 = vsel %vm6321_vm12, %v6263_v2, 0.0 }
0x1277   : > { %6432 = vst [vmem:[%s10923_s29 + $0x170] sm:$0xff] %v6365_v57  ;;  %6433 = vst [vmem:[%s10923_s29 + $0x178] sm:$0xff] %v6381_v19 }
0x1279   : > { %v6267_v4 = vpop.permute.xlu1 %6266 }
0x127a   : > { %v6367_v40 = vsel %vm6321_vm12, %v6203_v27, %v6267_v4  ;;  %v6383_v10 = vsel %vm6321_vm12, %v6267_v4, 0.0  ;;  %v5767_v4 = vld [vmem:[%s11442_s17 + $0x18] sm:$0xff] }
0x127b   : > { %6440 = vst [vmem:[%s10923_s29 + $0x1b0] sm:$0xff] %v6367_v40  ;;  %6441 = vst [vmem:[%s10923_s29 + $0x1b8] sm:$0xff] %v6383_v10  ;;  %v5766_v40 = vld [vmem:[%s11442_s17 + $0x10] sm:$0xff]  ;;  %8093 = vmatprep.subr.mxu1 %v5767_v4 }
0x127c   : > { %8094 = vmatpush3.msra.mxu1 %v5767_v4 }
0x127d   : > { %8095 = vmatprep.subr.mxu1 %v5766_v40 }
0x127e   : > { %8096 = vmatpush3.msra.mxu1 %v5766_v40 }
0x128c   : > { %v6249_v58 = vpop.permute.xlu0 %6248 }
0x128d   : > { %v6358_v52 = vsel %vm6321_vm12, %v10939_v13, %v6249_v58  ;;  %v6374_v62 = vsel %vm6321_vm12, %v6249_v58, 0.0  ;;  %v5765_v58 = vld [vmem:[%s11442_s17 + $0x8] sm:$0xff] }
0x128e   : > { %6404 = vst [vmem:[%s10923_s29 + $0x90] sm:$0xff] %v6358_v52  ;;  %6405 = vst [vmem:[%s10923_s29 + $0x98] sm:$0xff] %v6374_v62  ;;  %8097 = vmatprep.subr.mxu1 %v5765_v58 }
0x128f   : > { %8098 = vmatpush3.msra.mxu1 %v5765_v58 }
0x1290   : > { %v6253_v49 = vpop.permute.xlu0 %6252 }
0x1291   : > { %v6360_v27 = vsel %vm6321_vm12, %v10950_v26, %v6253_v49  ;;  %v6376_v17 = vsel %vm6321_vm12, %v6253_v49, 0.0 }
0x1292   : > { %6412 = vst [vmem:[%s10923_s29 + $0xd0] sm:$0xff] %v6360_v27  ;;  %6413 = vst [vmem:[%s10923_s29 + $0xd8] sm:$0xff] %v6376_v17 }
0x1294   : > { %v6257_v35 = vpop.permute.xlu0 %6256 }
0x1295   : > { %v6362_v13 = vsel %vm6321_vm12, %v10961_v0, %v6257_v35  ;;  %v6378_v28 = vsel %vm6321_vm12, %v6257_v35, 0.0 }
0x1296   : > { %6420 = vst [vmem:[%s10923_s29 + $0x110] sm:$0xff] %v6362_v13  ;;  %6421 = vst [vmem:[%s10923_s29 + $0x118] sm:$0xff] %v6378_v28 }
0x1298   : > { %v6261_v56 = vpop.permute.xlu0 %6260 }
0x1299   : > { %v6364_v34 = vsel %vm6321_vm12, %v10980_v24, %v6261_v56  ;;  %v6380_v26 = vsel %vm6321_vm12, %v6261_v56, 0.0 }
0x129a   : > { %6428 = vst [vmem:[%s10923_s29 + $0x150] sm:$0xff] %v6364_v34  ;;  %6429 = vst [vmem:[%s10923_s29 + $0x158] sm:$0xff] %v6380_v26 }
0x129c   : > { %v6265_v55 = vpop.permute.xlu0 %6264 }
0x129d   : > { %v6366_v8 = vsel %vm6321_vm12, %v10995_v9, %v6265_v55  ;;  %v6382_v11 = vsel %vm6321_vm12, %v6265_v55, 0.0 }
0x129e   : > { %6436 = vst [vmem:[%s10923_s29 + $0x190] sm:$0xff] %v6366_v8  ;;  %6437 = vst [vmem:[%s10923_s29 + $0x198] sm:$0xff] %v6382_v11 }
0x12a8   : > { %v7983_v0 = vpop.f32.mrf.mxu1 }
0x12a9   : > { %5986 = vrot.lane.b32.xlu0 %v7983_v0, %s11501_s28 }
0x12aa   : > { %v5256_v12 = vpop.f32.mrf.mxu1 }
0x12ab   : > { %5984 = vrot.lane.b32.xlu1 %v5256_v12, %s11501_s28 }
0x12b1   : > { %v7986_v14 = vpop.f32.mrf.mxu1 }
0x12b2   : > { %5990 = vrot.lane.b32.xlu1 %v7986_v14, %s11501_s28 }
0x12b3   : > { %v5266_v24 = vpop.f32.mrf.mxu1 }
0x12b6   : > { %5988 = vrot.lane.b32.xlu1 %v5266_v24, %s11501_s28 }
0x12db   : > { %v7989_v22 = vpop.f32.mrf.mxu1 }
0x12dc   : > { %5994 = vrot.lane.b32.xlu1 %v7989_v22, %s11501_s28 }
0x12dd   : > { %v5276_v9 = vpop.f32.mrf.mxu1 }
0x12de   : > { %5992 = vrot.lane.b32.xlu0 %v5276_v9, %s11501_s28 }
0x12df   : > { %v7992_v20 = vpop.f32.mrf.mxu1 }
0x12e0   : > { %5998 = vrot.lane.b32.xlu1 %v7992_v20, %s11501_s28 }
0x12e1   : > { %v5286_v2 = vpop.f32.mrf.mxu1 }
0x12e2   : > { %5996 = vrot.lane.b32.xlu0 %v5286_v2, %s11501_s28  ;;  %v5764_v2 = vld [vmem:[%s11442_s17] sm:$0xff] }
0x12e3   : > { %v7995_v57 = vpop.f32.mrf.mxu1  ;;  %8099 = vmatprep.subr.mxu1 %v5764_v2 }
0x12e4   : > { %6002 = vrot.lane.b32.xlu1 %v7995_v57, %s11501_s28  ;;  %8100 = vmatpush3.msra.mxu1 %v5764_v2  ;;  %v11201_v57 = vld [vmem:[%s11441_s16] ss:$0 sm:$0xff] }
0x12e5   : > { %v5296_v19 = vpop.f32.mrf.mxu1 }
0x12e6   : > { %6000 = vrot.lane.b32.xlu0 %v5296_v19, %s11501_s28 }
0x12e7   : > { %v7998_v10 = vpop.f32.mrf.mxu1 }
0x12e8   : > { %6006 = vrot.lane.b32.xlu1 %v7998_v10, %s11501_s28 }
0x12e9   : > { %v5306_v52 = vpop.f32.mrf.mxu1 }
0x12ea   : > { %6004 = vrot.lane.b32.xlu0 %v5306_v52, %s11501_s28 }
0x12eb   : > { %v8001_v62 = vpop.f32.mrf.mxu1 }
0x12ec   : > { %6010 = vrot.lane.b32.xlu1 %v8001_v62, %s11501_s28 }
0x12ed   : > { %v5316_v49 = vpop.f32.mrf.mxu1 }
0x12ee   : > { %6008 = vrot.lane.b32.xlu0 %v5316_v49, %s11501_s28 }
0x12ef   : > { %v8004_v27 = vpop.f32.mrf.mxu1 }
0x12f0   : > { %6014 = vrot.lane.b32.xlu1 %v8004_v27, %s11501_s28 }
0x12f1   : > { %v5326_v17 = vpop.f32.mrf.mxu1 }
0x12f2   : > { %6012 = vrot.lane.b32.xlu0 %v5326_v17, %s11501_s28 }
0x12f3   : > { %v8039_v35 = vpop.f32.mrf.mxu1 }
0x12f5   : > { %v5433_v13 = vpop.f32.mrf.mxu1 }
0x12f6   : > { %8069 = vmatprep.mubr.msk.f32.mxu0 %vm1392_vm3, %v5433_v13 }
0x12f7   : > { %v8042_v28 = vpop.f32.mrf.mxu1  ;;  %8070 = vmatmul.mubr.msk.f32.vlgmr.msra.gmra.mxu0 %vm1392_vm3, %v8039_v35 }
0x12f9   : > { %v5443_v56 = vpop.f32.mrf.mxu1 }
0x12fa   : > { %8072 = vmatprep.mubr.msk.f32.mxu0 %vm1392_vm3, %v5443_v56 }
0x12fb   : > { %v8045_v34 = vpop.f32.mrf.mxu1  ;;  %8073 = vmatmul.mubr.msk.f32.gmra.mxu0 %vm1392_vm3, %v8042_v28 }
0x12fd   : > { %v5453_v26 = vpop.f32.mrf.mxu1 }
0x12fe   : > { %8075 = vmatprep.mubr.msk.f32.mxu0 %vm1392_vm3, %v5453_v26 }
0x12ff   : > { %v8048_v55 = vpop.f32.mrf.mxu1  ;;  %8076 = vmatmul.mubr.msk.f32.gmra.mxu0 %vm1392_vm3, %v8045_v34 }
0x1301   : > { %v5463_v8 = vpop.f32.mrf.mxu1 }
0x1302   : > { %8078 = vmatprep.mubr.msk.f32.mxu0 %vm1392_vm3, %v5463_v8 }
0x1303   : > { %v8051_v11 = vpop.f32.mrf.mxu1  ;;  %8079 = vmatmul.mubr.msk.f32.gmra.mxu0 %vm1392_vm3, %v8048_v55 }
0x1305   : > { %v5473_v0 = vpop.f32.mrf.mxu1 }
0x1306   : > { %8081 = vmatprep.mubr.msk.f32.mxu0 %vm1392_vm3, %v5473_v0 }
0x1307   : > { %v8054_v12 = vpop.f32.mrf.mxu1  ;;  %8082 = vmatmul.mubr.msk.f32.gmra.mxu0 %vm1392_vm3, %v8051_v11 }
0x1309   : > { %v5483_v14 = vpop.f32.mrf.mxu1 }
0x130a   : > { %8084 = vmatprep.mubr.msk.f32.mxu0 %vm1392_vm3, %v5483_v14 }
0x130b   : > { %v8057_v24 = vpop.f32.mrf.mxu1  ;;  %8085 = vmatmul.mubr.msk.f32.gmra.mxu0 %vm1392_vm3, %v8054_v12 }
0x130d   : > { %v5493_v22 = vpop.f32.mrf.mxu1 }
0x130e   : > { %8087 = vmatprep.mubr.msk.f32.mxu0 %vm1392_vm3, %v5493_v22 }
0x130f   : > { %v8060_v9 = vpop.f32.mrf.mxu1  ;;  %8088 = vmatmul.mubr.msk.f32.gmra.mxu0 %vm1392_vm3, %v8057_v24 }
0x1311   : > { %v5503_v20 = vpop.f32.mrf.mxu1 }
0x1312   : > { %8090 = vmatprep.mubr.msk.f32.mxu0 %vm1392_vm3, %v5503_v20 }
0x1313   : > { %8091 = vmatmul.mubr.msk.f32.gmra.mxu0 %vm1392_vm3, %v8060_v9 }
0x13b7   : > { %v8071_v19 = vpop.f32.mrf.mxu0 }
0x13b8   : > { %v5643_v4 = vadd.f32 %v8071_v19, %v11201_v57 }
0x13b9   : > { %v5637_v40 = vpop.f32.mrf.mxu0 }
0x13ba   : > { %v5638_v10 = vadd.f32 %v11201_v57, %v5637_v40  ;;  %v5733_v58 = vmul.f32 0.01, %v5643_v4  ;;  %vm5717_vm13 = vcmp.ge.f32.partialorder %v5643_v4, 0.0 }
0x13bb   : > { %v8074_v52 = vpop.f32.mrf.mxu0 }
0x13bc   : > { %vm5716_vm14 = vcmp.ge.f32.partialorder %v5638_v10, 0.0  ;;  %v5732_v62 = vmul.f32 0.01, %v5638_v10  ;;  %v5653_v49 = vadd.f32 %v8074_v52, %v11201_v57  ;;  %v5749_v13 = vsel %vm5717_vm13, %v5643_v4, %v5733_v58 }
0x13bd   : > { %v5647_v27 = vpop.f32.mrf.mxu0 }
0x13be   : > { %v5648_v17 = vadd.f32 %v11201_v57, %v5647_v27  ;;  %v5748_v35 = vsel %vm5716_vm14, %v5638_v10, %v5732_v62  ;;  %v5735_v28 = vmul.f32 0.01, %v5653_v49  ;;  %vm5719_vm2 = vcmp.ge.f32.partialorder %v5653_v49, 0.0 }
0x13bf   : > { %v8077_v56 = vpop.f32.mrf.mxu0  ;;  %8101 = vmatprep.mubr.msk.f32.mxu1 %vm1392_vm3, %v5748_v35 }
0x13c0   : > { %vm5718_vm15 = vcmp.ge.f32.partialorder %v5648_v17, 0.0  ;;  %v5734_v34 = vmul.f32 0.01, %v5648_v17  ;;  %v5663_v26 = vadd.f32 %v8077_v56, %v11201_v57  ;;  %8102 = vmatmul.mubr.msk.f32.vlgmr.msra.gmra.mxu1 %vm1392_vm3, %v5749_v13  ;;  %v5751_v0 = vsel %vm5719_vm2, %v5653_v49, %v5735_v28 }
0x13c1   : > { %v5657_v55 = vpop.f32.mrf.mxu0  ;;  %vm6304_vm2 = vcmask 392192  }
0x13c2   : > { %v5658_v8 = vadd.f32 %v11201_v57, %v5657_v55  ;;  %v5750_v11 = vsel %vm5718_vm15, %v5648_v17, %v5734_v34  ;;  %v5737_v12 = vmul.f32 0.01, %v5663_v26  ;;  %vm5721_vm6 = vcmp.ge.f32.partialorder %v5663_v26, 0.0 }
0x13c3   : > { %v8080_v14 = vpop.f32.mrf.mxu0  ;;  %8104 = vmatprep.mubr.msk.f32.mxu1 %vm1392_vm3, %v5750_v11 }
0x13c4   : > { %vm5720_vm1 = vcmp.ge.f32.partialorder %v5658_v8, 0.0  ;;  %v5736_v24 = vmul.f32 0.01, %v5658_v8  ;;  %v5673_v22 = vadd.f32 %v8080_v14, %v11201_v57  ;;  %8105 = vmatmul.mubr.msk.f32.gmra.mxu1 %vm1392_vm3, %v5751_v0  ;;  %v5753_v19 = vsel %vm5721_vm6, %v5663_v26, %v5737_v12 }
0x13c5   : > { %v5667_v9 = vpop.f32.mrf.mxu0 }
0x13c6   : > { %v5668_v20 = vadd.f32 %v11201_v57, %v5667_v9  ;;  %v5752_v2 = vsel %vm5720_vm1, %v5658_v8, %v5736_v24  ;;  %v5739_v4 = vmul.f32 0.01, %v5673_v22  ;;  %vm5723_vm5 = vcmp.ge.f32.partialorder %v5673_v22, 0.0 }
0x13c7   : > { %v8083_v40 = vpop.f32.mrf.mxu0  ;;  %8107 = vmatprep.mubr.msk.f32.mxu1 %vm1392_vm3, %v5752_v2 }
0x13c8   : > { %vm5722_vm0 = vcmp.ge.f32.partialorder %v5668_v20, 0.0  ;;  %v5738_v10 = vmul.f32 0.01, %v5668_v20  ;;  %v5683_v58 = vadd.f32 %v8083_v40, %v11201_v57  ;;  %8108 = vmatmul.mubr.msk.f32.gmra.mxu1 %vm1392_vm3, %v5753_v19  ;;  %v5755_v27 = vsel %vm5723_vm5, %v5673_v22, %v5739_v4 }
0x13c9   : > { %v5677_v52 = vpop.f32.mrf.mxu0 }
0x13ca   : > { %v5678_v62 = vadd.f32 %v11201_v57, %v5677_v52  ;;  %v5754_v49 = vsel %vm5722_vm0, %v5668_v20, %v5738_v10  ;;  %v5741_v17 = vmul.f32 0.01, %v5683_v58  ;;  %vm5725_vm4 = vcmp.ge.f32.partialorder %v5683_v58, 0.0 }
0x13cb   : > { %v8086_v35 = vpop.f32.mrf.mxu0  ;;  %8110 = vmatprep.mubr.msk.f32.mxu1 %vm1392_vm3, %v5754_v49 }
0x13cc   : > { %vm5724_vm7 = vcmp.ge.f32.partialorder %v5678_v62, 0.0  ;;  %v5740_v13 = vmul.f32 0.01, %v5678_v62  ;;  %v5693_v28 = vadd.f32 %v8086_v35, %v11201_v57  ;;  %8111 = vmatmul.mubr.msk.f32.gmra.mxu1 %vm1392_vm3, %v5755_v27  ;;  %v5757_v55 = vsel %vm5725_vm4, %v5683_v58, %v5741_v17  ;;  %v6869_v35 = vld [vmem:[#allocation2] ss:$0 sm:$0xff] }
0x13cd   : > { %v5687_v56 = vpop.f32.mrf.mxu0 }
0x13ce   : > { %v5688_v34 = vadd.f32 %v11201_v57, %v5687_v56  ;;  %v5756_v26 = vsel %vm5724_vm7, %v5678_v62, %v5740_v13  ;;  %v5743_v8 = vmul.f32 0.01, %v5693_v28  ;;  %vm5727_vm8 = vcmp.ge.f32.partialorder %v5693_v28, 0.0 }
0x13cf   : > { %v8089_v11 = vpop.f32.mrf.mxu0  ;;  %8113 = vmatprep.mubr.msk.f32.mxu1 %vm1392_vm3, %v5756_v26 }
0x13d0   : > { %vm5726_vm9 = vcmp.ge.f32.partialorder %v5688_v34, 0.0  ;;  %v5742_v0 = vmul.f32 0.01, %v5688_v34  ;;  %v5703_v12 = vadd.f32 %v8089_v11, %v11201_v57  ;;  %8114 = vmatmul.mubr.msk.f32.gmra.mxu1 %vm1392_vm3, %v5757_v55  ;;  %v5759_v9 = vsel %vm5727_vm8, %v5693_v28, %v5743_v8 }
0x13d1   : > { %v5697_v14 = vpop.f32.mrf.mxu0 }
0x13d2   : > { %v5698_v24 = vadd.f32 %v11201_v57, %v5697_v14  ;;  %v5758_v22 = vsel %vm5726_vm9, %v5688_v34, %v5742_v0  ;;  %v5745_v20 = vmul.f32 0.01, %v5703_v12  ;;  %vm5729_vm10 = vcmp.ge.f32.partialorder %v5703_v12, 0.0 }
0x13d3   : > { %v8092_v2 = vpop.f32.mrf.mxu0  ;;  %8116 = vmatprep.mubr.msk.f32.mxu1 %vm1392_vm3, %v5758_v22 }
0x13d4   : > { %vm5728_vm11 = vcmp.ge.f32.partialorder %v5698_v24, 0.0  ;;  %v5744_v19 = vmul.f32 0.01, %v5698_v24  ;;  %v5713_v4 = vadd.f32 %v8092_v2, %v11201_v57  ;;  %8117 = vmatmul.mubr.msk.f32.gmra.mxu1 %vm1392_vm3, %v5759_v9  ;;  %v5761_v52 = vsel %vm5729_vm10, %v5703_v12, %v5745_v20 }
0x13d5   : > { %v5707_v40 = vpop.f32.mrf.mxu0 }
0x13d6   : > { %v5708_v10 = vadd.f32 %v11201_v57, %v5707_v40  ;;  %v5760_v58 = vsel %vm5728_vm11, %v5698_v24, %v5744_v19  ;;  %v5747_v62 = vmul.f32 0.01, %v5713_v4  ;;  %vm5731_vm13 = vcmp.ge.f32.partialorder %v5713_v4, 0.0 }
0x13d7   : > { %8119 = vmatprep.mubr.msk.f32.mxu1 %vm1392_vm3, %v5760_v58 }
0x13d8   : > { %vm5730_vm14 = vcmp.ge.f32.partialorder %v5708_v10, 0.0  ;;  %v5746_v49 = vmul.f32 0.01, %v5708_v10  ;;  %8120 = vmatmul.mubr.msk.f32.gmra.mxu1 %vm1392_vm3, %v5761_v52  ;;  %v5763_v17 = vsel %vm5731_vm13, %v5713_v4, %v5747_v62 }
0x13da   : > { %v5762_v27 = vsel %vm5730_vm14, %v5708_v10, %v5746_v49 }
0x13db   : > { %8122 = vmatprep.mubr.msk.f32.mxu1 %vm1392_vm3, %v5762_v27 }
0x13dc   : > { %8123 = vmatmul.mubr.msk.f32.gmra.mxu1 %vm1392_vm3, %v5763_v17 }
0x1480   : > { %v8103_v13 = vpop.f32.mrf.mxu1 }
0x1481   : > { %v5895_v28 = vadd.f32 %v8103_v13, %v6869_v35 }
0x1482   : > { %v5889_v57 = vpop.f32.mrf.mxu1 }
0x1483   : > { %v5890_v56 = vadd.f32 %v6869_v35, %v5889_v57  ;;  %6050 = vrot.lane.b32.xlu1 %v5895_v28, %s8561_s2 }
0x1484   : > { %v8106_v34 = vpop.f32.mrf.mxu1 }
0x1485   : > { %v5905_v26 = vadd.f32 %v8106_v34, %v6869_v35  ;;  %6048 = vrot.lane.b32.xlu0 %v5890_v56, %s8561_s2 }
0x1486   : > { %v5899_v55 = vpop.f32.mrf.mxu1 }
0x1487   : > { %v5900_v8 = vadd.f32 %v6869_v35, %v5899_v55  ;;  %6054 = vrot.lane.b32.xlu1 %v5905_v26, %s8561_s2  ;;  %v5985_v26 = vpop.permute.xlu1 %5984 }
0x1488   : > { %v8109_v11 = vpop.f32.mrf.mxu1 }
0x1489   : > { %v5915_v0 = vadd.f32 %v8109_v11, %v6869_v35  ;;  %6052 = vrot.lane.b32.xlu0 %v5900_v8, %s8561_s2  ;;  %v5987_v11 = vpop.permute.xlu0 %5986 }
0x148a   : > { %v5909_v12 = vpop.f32.mrf.mxu1 }
0x148b   : > { %v5910_v14 = vadd.f32 %v6869_v35, %v5909_v12  ;;  %6058 = vrot.lane.b32.xlu1 %v5915_v0, %s8561_s2  ;;  %v5991_v55 = vpop.permute.xlu1 %5990 }
0x148c   : > { %v8112_v24 = vpop.f32.mrf.mxu1 }
0x148d   : > { %v5925_v22 = vadd.f32 %v8112_v24, %v6869_v35  ;;  %6056 = vrot.lane.b32.xlu0 %v5910_v14, %s8561_s2  ;;  %v5993_v12 = vpop.permute.xlu0 %5992 }
0x148e   : > { %v5919_v9 = vpop.f32.mrf.mxu1 }
0x148f   : > { %v5920_v20 = vadd.f32 %v6869_v35, %v5919_v9  ;;  %6062 = vrot.lane.b32.xlu1 %v5925_v22, %s8561_s2  ;;  %v5989_v8 = vpop.permute.xlu1 %5988 }
0x1490   : > { %v8115_v2 = vpop.f32.mrf.mxu1 }
0x1491   : > { %v5935_v19 = vadd.f32 %v8115_v2, %v6869_v35  ;;  %6060 = vrot.lane.b32.xlu0 %v5920_v20, %s8561_s2  ;;  %v5997_v24 = vpop.permute.xlu0 %5996 }
0x1492   : > { %v5929_v4 = vpop.f32.mrf.mxu1 }
0x1493   : > { %v5930_v40 = vadd.f32 %v6869_v35, %v5929_v4  ;;  %6066 = vrot.lane.b32.xlu1 %v5935_v19, %s8561_s2  ;;  %v5995_v0 = vpop.permute.xlu1 %5994  ;;  %v6289_v4 = vsel %vm1392_vm3, %v11593_v42, %v5987_v11 }
0x1494   : > { %v8118_v10 = vpop.f32.mrf.mxu1 }
0x1495   : > { %v5945_v58 = vadd.f32 %v8118_v10, %v6869_v35  ;;  %6064 = vrot.lane.b32.xlu0 %v5930_v40, %s8561_s2  ;;  %v6001_v22 = vpop.permute.xlu0 %6000 }
0x1496   : > { %v5939_v52 = vpop.f32.mrf.mxu1 }
0x1497   : > { %v5940_v62 = vadd.f32 %v6869_v35, %v5939_v52  ;;  %6070 = vrot.lane.b32.xlu1 %v5945_v58, %s8561_s2  ;;  %v5999_v14 = vpop.permute.xlu1 %5998  ;;  %v6288_v58 = vsel %vm1392_vm3, %v11594_v61, %v5985_v26  ;;  %v6290_v61 = vsel %vm1392_vm3, %v11592_v63, %v5989_v8  ;;  %v6292_v63 = vsel %vm1392_vm3, %v11590_v45, %v5993_v12 }
0x1498   : > { %v8121_v49 = vpop.f32.mrf.mxu1  ;;  %v6294_v45 = vsel %vm1392_vm3, %v11588_v44, %v5997_v24  ;;  %v6296_v44 = vsel %vm1392_vm3, %v11586_v39, %v6001_v22 }
0x1499   : > { %v5955_v27 = vadd.f32 %v8121_v49, %v6869_v35  ;;  %6068 = vrot.lane.b32.xlu0 %v5940_v62, %s8561_s2  ;;  %v6005_v20 = vpop.permute.xlu0 %6004 }
0x149a   : > { %v5949_v17 = vpop.f32.mrf.mxu1  ;;  %v6298_v39 = vsel %vm1392_vm3, %v11584_v48, %v6005_v20 }
0x149b   : > { %v5950_v13 = vadd.f32 %v6869_v35, %v5949_v17  ;;  %6074 = vrot.lane.b32.xlu1 %v5955_v27, %s8561_s2  ;;  %v6291_v27 = vsel %vm1392_vm3, %v11591_v37, %v5991_v55  ;;  %v6293_v37 = vsel %vm1392_vm3, %v11589_v53, %v5995_v0  ;;  %v6295_v53 = vsel %vm1392_vm3, %v11587_v47, %v5999_v14 }
0x149c   : > { %v8124_v28 = vpop.f32.mrf.mxu1 }
0x149d   : > { %v5965_v57 = vadd.f32 %v8124_v28, %v6869_v35  ;;  %6072 = vrot.lane.b32.xlu0 %v5950_v13, %s8561_s2 }
0x149e   : > { %v5959_v56 = vpop.f32.mrf.mxu1 }
0x149f   : > { %v5960_v34 = vadd.f32 %v6869_v35, %v5959_v56  ;;  %6078 = vrot.lane.b32.xlu1 %v5965_v57, %s8561_s2  ;;  %v6003_v35 = vpop.permute.xlu1 %6002 }
0x14a0   : > { %v6297_v47 = vsel %vm1392_vm3, %v11585_v50, %v6003_v35 }
0x14a1   : > { %6076 = vrot.lane.b32.xlu0 %v5960_v34, %s8561_s2  ;;  %s8497_s2 = sshll.u32 %s8562_s1, 4  ;;  %s8498_s2 = int_to_ptr.vmem [resolvable:$false] %s8497_s2 }
0x14a2   : > { %p8500_p0 = scmp.lt.s32.totalorder %s11375_s5, %s8498_s2 }
0x14a3   : > { %6270 = vrot.lane.b32.xlu1 %v10977_v38, %s8560_s3  ;;  %v6007_v9 = vpop.permute.xlu1 %6006  ;;  %v11257_v38 = vpop.permute.xlu0 %6008 }
0x14a4   : > { %v6299_v50 = vsel %vm1392_vm3, %v11583_v36, %v6007_v9 }
0x14a5   : > { %6268 = vrot.lane.b32.xlu0 %v10969_v51, %s8560_s3  ;;  %s6893_s3 = sshll.u32 %s8688_s18, 13 }
0x14a6   : > { %s11371_s6 = scalar_lea.hbm %s11444_s19, %s6893_s3  ;;  %s8499_s3 = scalar_lea.vmem %s8498_s2, 16384 }
0x14a7   : > { %v11255_v2 = vpop.permute.xlu1 %6010  ;;  %v11261_v51 = vpop.permute.xlu0 %6012  ;;  %p8501_p1 = scmp.lt.s32.totalorder %s8499_s3, %s8493_s25 }
0x14a8   : > { %v6301_v36 = vsel %vm1392_vm3, %v11581_v54, %v11255_v2 }
0x14a9   : > { %p8502_p2 = por %p8501_p1, %p8500_p0 }
0x14ab   : > { %v11259_v19 = vpop.permute.xlu1 %6014  ;;  %p8503_p3 = pnand %p8502_p2, %p8496_p13 }
0x14f5   : > { %v6051_v40 = vpop.permute.xlu1 %6050 }
0x14f6   : > { %v6306_v10 = vsel %vm6304_vm2, %v6289_v4, %v6051_v40 }
0x14f7   : > { %v6323_v52 = vsel %vm6321_vm12, %v6306_v10, %v10936_v3  ;;  %v6049_v62 = vpop.permute.xlu0 %6048 }
0x14f8   : > { %6390 = vst [vmem:[%s10923_s29 + $0x20] sm:$0xff] %v6323_v52  ;;  %v6305_v49 = vsel %vm6304_vm2, %v6288_v58, %v6049_v62 }
0x14f9   : > { %v6322_v42 = vsel %vm6321_vm12, %v6305_v49, %v10870_v6  ;;  %v6055_v17 = vpop.permute.xlu1 %6054 }
0x14fa   : > { %6386 = vst [vmem:[%s10923_s29] sm:$0xff] %v6322_v42  ;;  %v6308_v13 = vsel %vm6304_vm2, %v6291_v27, %v6055_v17 }
0x14fb   : > { %v6325_v3 = vsel %vm6321_vm12, %v6308_v13, %v10947_v23  ;;  %v6053_v28 = vpop.permute.xlu0 %6052 }
0x14fc   : > { %6398 = vst [vmem:[%s10923_s29 + $0x60] sm:$0xff] %v6325_v3  ;;  %v6307_v57 = vsel %vm6304_vm2, %v6290_v61, %v6053_v28 }
0x14fd   : > { %v6324_v6 = vsel %vm6321_vm12, %v6307_v57, %v10881_v43  ;;  %v6059_v56 = vpop.permute.xlu1 %6058 }
0x14fe   : > { %6394 = vst [vmem:[%s10923_s29 + $0x40] sm:$0xff] %v6324_v6  ;;  %v6310_v34 = vsel %vm6304_vm2, %v6293_v37, %v6059_v56 }
0x14ff   : > { %v6327_v23 = vsel %vm6321_vm12, %v6310_v34, %v10958_v46  ;;  %v6057_v26 = vpop.permute.xlu0 %6056 }
0x1500   : > { %6406 = vst [vmem:[%s10923_s29 + $0xa0] sm:$0xff] %v6327_v23  ;;  %v6309_v55 = vsel %vm6304_vm2, %v6292_v63, %v6057_v26 }
0x1501   : > { %v6326_v43 = vsel %vm6321_vm12, %v6309_v55, %v10892_v60  ;;  %v6063_v8 = vpop.permute.xlu1 %6062 }
0x1502   : > { %6402 = vst [vmem:[%s10923_s29 + $0x80] sm:$0xff] %v6326_v43  ;;  %v6312_v11 = vsel %vm6304_vm2, %v6295_v53, %v6063_v8 }
0x1503   : > { %v6329_v46 = vsel %vm6321_vm12, %v6312_v11, %v10974_v33  ;;  %v6061_v0 = vpop.permute.xlu0 %6060 }
0x1504   : > { %6414 = vst [vmem:[%s10923_s29 + $0xe0] sm:$0xff] %v6329_v46  ;;  %v6311_v12 = vsel %vm6304_vm2, %v6294_v45, %v6061_v0 }
0x1505   : > { %v6328_v60 = vsel %vm6321_vm12, %v6311_v12, %v10900_v15  ;;  %v6067_v14 = vpop.permute.xlu1 %6066 }
0x1506   : > { %6410 = vst [vmem:[%s10923_s29 + $0xc0] sm:$0xff] %v6328_v60  ;;  %v6314_v4 = vsel %vm6304_vm2, %v6297_v47, %v6067_v14 }
0x1507   : > { %v6331_v33 = vsel %vm6321_vm12, %v6314_v4, %v10993_v21  ;;  %v6065_v24 = vpop.permute.xlu0 %6064 }
0x1508   : > { %6422 = vst [vmem:[%s10923_s29 + $0x120] sm:$0xff] %v6331_v33  ;;  %v6313_v40 = vsel %vm6304_vm2, %v6296_v44, %v6065_v24 }
0x1509   : > { %v6330_v15 = vsel %vm6321_vm12, %v6313_v40, %v10904_v32  ;;  %v6071_v35 = vpop.permute.xlu1 %6070 }
0x150a   : > { %6418 = vst [vmem:[%s10923_s29 + $0x100] sm:$0xff] %v6330_v15  ;;  %v6316_v10 = vsel %vm6304_vm2, %v6299_v50, %v6071_v35 }
0x150b   : > { %v6333_v21 = vsel %vm6321_vm12, %v6316_v10, %v11007_v31  ;;  %v6069_v22 = vpop.permute.xlu0 %6068  ;;  %v6300_v31 = vsel %vm1392_vm3, %v11582_v59, %v11257_v38 }
0x150c   : > { %6430 = vst [vmem:[%s10923_s29 + $0x160] sm:$0xff] %v6333_v21  ;;  %v6315_v58 = vsel %vm6304_vm2, %v6298_v39, %v6069_v22 }
0x150d   : > { %v6332_v32 = vsel %vm6321_vm12, %v6315_v58, %v10906_v5  ;;  %v6075_v9 = vpop.permute.xlu1 %6074  ;;  %v6303_v5 = vsel %vm1392_vm3, %v11567_v16, %v11259_v19 }
0x150e   : > { %6426 = vst [vmem:[%s10923_s29 + $0x140] sm:$0xff] %v6332_v32  ;;  %v6318_v48 = vsel %vm6304_vm2, %v6301_v36, %v6075_v9 }
0x150f   : > { %v6335_v20 = vsel %vm6321_vm12, %v6318_v48, %v11024_v29  ;;  %v6073_v52 = vpop.permute.xlu0 %6072  ;;  %v6302_v29 = vsel %vm1392_vm3, %v11580_v18, %v11261_v51 }
0x1510   : > { %6438 = vst [vmem:[%s10923_s29 + $0x1a0] sm:$0xff] %v6335_v20  ;;  %v6317_v54 = vsel %vm6304_vm2, %v6300_v31, %v6073_v52 }
0x1511   : > { %v6334_v2 = vsel %vm6321_vm12, %v6317_v54, %v10908_v7  ;;  %v6079_v62 = vpop.permute.xlu1 %6078 }
0x1512   : > { %6434 = vst [vmem:[%s10923_s29 + $0x180] sm:$0xff] %v6334_v2  ;;  %v6320_v59 = vsel %vm6304_vm2, %v6303_v5, %v6079_v62 }
0x1513   : > { %v6337_v38 = vsel %vm6321_vm12, %v6320_v59, %v11032_v1  ;;  %v6077_v49 = vpop.permute.xlu0 %6076 }
0x1514   : > { %6446 = vst [vmem:[%s10923_s29 + $0x1e0] sm:$0xff] %v6337_v38  ;;  %v6319_v16 = vsel %vm6304_vm2, %v6302_v29, %v6077_v49 }
0x1515   : > { %v6336_v7 = vsel %vm6321_vm12, %v6319_v16, %v10911_v41  ;;  %v6271_v19 = vpop.permute.xlu1 %6270 }
0x1516   : > { %6442 = vst [vmem:[%s10923_s29 + $0x1c0] sm:$0xff] %v6336_v7  ;;  %v6369_v18 = vsel %vm6321_vm12, %v11081_v25, %v6271_v19  ;;  %v6385_v1 = vsel %vm6321_vm12, %v6271_v19, 0.0 }
0x1517   : > { %6448 = vst [vmem:[%s10923_s29 + $0x1f0] sm:$0xff] %v6369_v18  ;;  %6449 = vst [vmem:[%s10923_s29 + $0x1f8] sm:$0xff] %v6385_v1  ;;  %v6269_v51 = vpop.permute.xlu0 %6268 }
0x1518   : > { %v6368_v41 = vsel %vm6321_vm12, %v11009_v30, %v6269_v51  ;;  %v6384_v25 = vsel %vm6321_vm12, %v6269_v51, 0.0 }
0x1519   : > { %6444 = vst [vmem:[%s10923_s29 + $0x1d0] sm:$0xff] %v6368_v41  ;;  %6445 = vst [vmem:[%s10923_s29 + $0x1d8] sm:$0xff] %v6384_v25 }
0x151a   : > { %8506 = shalt.err (!%p8503_p3)
}
0x151b   : > { %s8507_s24 = scalar_lea.hbm %s11371_s6, 8192  ;;  %s8511_s18 = scalar_lea.hbm %s11444_s19, 16384 }
0x151c   : > { %p8508_p4 = scmp.ne.s32.totalorder %s11371_s6, %s8507_s24  ;;  %p8512_p9 = scmp.lt.s32.totalorder %s11371_s6, %s11444_s19 }
0x151d   : > { %p8513_p10 = scmp.lt.s32.totalorder %s8511_s18, %s8507_s24 }
0x151e   : > { %p8509_p7 = pnand %p8508_p4, %p8705_p5 }
0x151f   : > { %p8514_p11 = por %p8513_p10, %p8512_p9 }
0x1520   : > { %p8510_p8 = pneg %p8509_p7 }
0x1522   : > { %p8515_p12 = pnand %p8514_p11, %p8510_p8 }
0x1524   : > { %8518 = shalt.err (!%p8515_p12)
}
0x1525   : > { %s8563_s25 = smov 512   ;;  %s11595_s2 = smov 32  }
0x1526   : > { %8125 = dma.vmem_to_hbm [thread:$0]  (%p8705_p5), %s11375_s5, 8192, %s11371_s6, %s11384_s30, %s8563_s25, %s8563_s25, %s11595_s2  }
0x1527 PF: > { %p8131_p13 = scmp.ge.s32.totalorder %s8553_s22, 2  ;;  %s6480_s3 = sand.u32 1, %s8541_s20  }
0x1528   : > { %s6481_s28 = scalar_lea.sflag [#allocation4], %s6480_s3 }
0x1529   : > { %p8128_p0 = pnand %p8131_p13, %p8709_p6 }
0x152b   : > { %p8129_p1 = pneg %p8128_p0 }
0x152d   : > { %8536 = dma.done.wait (%p8129_p1), %s6481_s28, 8192  }
0x152e   : > { %8538 = vsyncadd (%p8129_p1), %s6481_s28, 4294959104  ;;  %s11596_s26 = sld [smem:[#allocation6_spill]]  ;;  %p31_p2 = scmp.ge.s32.totalorder %s8692_s23, 4  }
0x152f   : > { %s11597_s1 = sld [smem:[#allocation7_spill]]  ;;  %s11598_s20 = smov %s8545_s21 }
0x1530   : > { %s11600_s22 = smov %s8692_s23  ;;  %33 = sbr.rel (!%p31_p2) target bundleno = 10 (0xa), region = 140 }
0x1534   : > { %s11599_s21 = smov %s11596_s26 }
0x1535   :  { %6486 = vsyncpa [#allocation4], 1 }
0x1536   :  { %6488 = vsyncpa [#allocation4 + $0x1], 1 }

</bundles_post_ra>
